<compile_context>
chip_gen: v5e
topology: v5e:2x2
jax: 0.10.0
libtpu: 0.0.40
codegen_flags: <defaults>
</compile_context>

<pallas_src>
import math
import functools

import jax
import jax.numpy as jnp
from jax.experimental import pallas as pl
from jax.experimental.pallas import tpu as pltpu

# ----------------------------- model config ---------------------------------
EMB_SIZE = 32
NHEAD = 4
FFN = 64
NUM_ENC = 2
NUM_DEC = 2
SRC_VOCAB = 50
TGT_VOCAB = 60
TGT_VOCAB_PAD = 128      # lane-dense generator output; sliced back to 60 in glue
MAXLEN = 64
LN_EPS = 1e-5
NEG = -1e9               # large finite negative instead of -inf


# ----------------------------- weight-slab layout ----------------------------
def build_layout():
    """Static row offsets (pure Python ints) of every parameter inside the
    single (rows, 128) weight slab.  All offsets are multiples of 8."""
    off = 0

    def take(rows):
        nonlocal off
        o = off
        off += rows
        return o

    E, F = EMB_SIZE, FFN
    enc = []
    for _ in range(NUM_ENC):
        enc.append({"in_w": take(E), "out_w": take(E),
                    "l1_w": take(E), "l2_w": take(F), "vec": take(8)})
    dec = []
    for _ in range(NUM_DEC):
        dec.append({"sa_in_w": take(E), "sa_out_w": take(E),
                    "ca_in_w": take(E), "ca_out_w": take(E),
                    "l1_w": take(E), "l2_w": take(F), "vec": take(16)})
    gen_w = take(E)
    gvec = take(8)
    return {"enc": enc, "dec": dec, "gen_w": gen_w, "gvec": gvec, "rows": off}


# ----------------------------- fused forward kernel --------------------------
def _fused_kernel(x_ref, y_ref, emask_ref, smask_ref, cmask_ref, w_ref, o_ref,
                  *, lay, N, S, T, H):
    E, F = EMB_SIZE, FFN
    d = E // H

    def mat(off, rows, cols):
        return w_ref[off:off + rows, :cols]          # static slice of weight slab

    def ln(v, g, b):
        mu = jnp.mean(v, axis=-1, keepdims=True)
        var = jnp.mean((v - mu) ** 2, axis=-1, keepdims=True)
        return (v - mu) * jax.lax.rsqrt(var + LN_EPS) * g + b

    def mha(xq, xkv, w_in, b_in, w_out, b_out, mask, self_attn):
        """Packed block-diagonal multi-head attention.

        xq: (Mq, E), xkv: (Mk, E), w_in: (E, 3E) (in,out layout, Q cols
        pre-scaled by 1/sqrt(d)), mask: (H*Mq, H*Mk) additive block-diag mask.
        """
        Mq = xq.shape[0]
        if self_attn:
            qkv = jnp.dot(xq, w_in, preferred_element_type=jnp.float32) + b_in
            q, k, v = qkv[:, :E], qkv[:, E:2 * E], qkv[:, 2 * E:]
        else:
            q = jnp.dot(xq, w_in[:, :E],
                        preferred_element_type=jnp.float32) + b_in[:, :E]
            kv = jnp.dot(xkv, w_in[:, E:],
                         preferred_element_type=jnp.float32) + b_in[:, E:]
            k, v = kv[:, :E], kv[:, E:]

        # head-major packing: rows (h*N + n)*L + l, lane width d  (sublane concat only)
        qp = jnp.concatenate([q[:, h * d:(h + 1) * d] for h in range(H)], axis=0)
        kp = jnp.concatenate([k[:, h * d:(h + 1) * d] for h in range(H)], axis=0)
        vp = jnp.concatenate([v[:, h * d:(h + 1) * d] for h in range(H)], axis=0)

        # one MXU push for all B*H score blocks; off-diagonal blocks are masked
        s = jax.lax.dot_general(qp, kp, (((1,), (1,)), ((), ())),
                                preferred_element_type=jnp.float32) + mask
        m = jnp.max(s, axis=-1, keepdims=True)
        p = jnp.exp(s - m)
        denom = jnp.sum(p, axis=-1, keepdims=True)       # >= 1 always (finite mask)
        p = p * pl.reciprocal(denom, approx=True)
        op = jnp.dot(p, vp, preferred_element_type=jnp.float32)   # (H*Mq, d)

        # out-projection applied per head directly from registers and summed
        out = b_out
        for h in range(H):
            out = out + jnp.dot(op[h * Mq:(h + 1) * Mq, :],
                                w_out[h * d:(h + 1) * d, :],
                                preferred_element_type=jnp.float32)
        return out

    emask = emask_ref[...]
    smask = smask_ref[...]
    cmask = cmask_ref[...]
    gvec = w_ref[lay["gvec"]:lay["gvec"] + 8, :]

    # --------------------------- encoder stack ------------------------------
    x = x_ref[...]
    for lo in lay["enc"]:
        vec = w_ref[lo["vec"]:lo["vec"] + 8, :]
        a = mha(x, x, mat(lo["in_w"], E, 3 * E), vec[0:1, :3 * E],
                mat(lo["out_w"], E, E), vec[1:2, :E], emask, self_attn=True)
        h1 = ln(x + a, vec[2:3, :E], vec[3:4, :E])
        f = jnp.maximum(jnp.dot(h1, mat(lo["l1_w"], E, F),
                                preferred_element_type=jnp.float32)
                        + vec[4:5, :F], 0.0)
        f = jnp.dot(f, mat(lo["l2_w"], F, E),
                    preferred_element_type=jnp.float32) + vec[5:6, :E]
        x = ln(h1 + f, vec[6:7, :E], vec[7:8, :E])
    memory = ln(x, gvec[0:1, :E], gvec[1:2, :E])         # final encoder LayerNorm

    # --------------------------- decoder stack ------------------------------
    y = y_ref[...]
    for lo in lay["dec"]:
        vec = w_ref[lo["vec"]:lo["vec"] + 16, :]
        a = mha(y, y, mat(lo["sa_in_w"], E, 3 * E), vec[0:1, :3 * E],
                mat(lo["sa_out_w"], E, E), vec[1:2, :E], smask, self_attn=True)
        h1 = ln(y + a, vec[2:3, :E], vec[3:4, :E])
        a2 = mha(h1, memory, mat(lo["ca_in_w"], E, 3 * E), vec[4:5, :3 * E],
                 mat(lo["ca_out_w"], E, E), vec[5:6, :E], cmask, self_attn=False)
        h2 = ln(h1 + a2, vec[6:7, :E], vec[7:8, :E])
        f = jnp.maximum(jnp.dot(h2, mat(lo["l1_w"], E, F),
                                preferred_element_type=jnp.float32)
                        + vec[8:9, :F], 0.0)
        f = jnp.dot(f, mat(lo["l2_w"], F, E),
                    preferred_element_type=jnp.float32) + vec[9:10, :E]
        y = ln(h2 + f, vec[10:11, :E], vec[11:12, :E])
    y = ln(y, gvec[2:3, :E], gvec[3:4, :E])              # final decoder LayerNorm

    # generator -> (N*T, 128) lane-dense output
    o_ref[...] = jnp.dot(y, mat(lay["gen_w"], E, TGT_VOCAB_PAD),
                         preferred_element_type=jnp.float32) + gvec[4:5, :]


# ----------------------------- glue helpers ----------------------------------
def _full_spec(shape):
    nd = len(shape)
    return pl.BlockSpec(shape, lambda i, _n=nd: (0,) * _n)


def _pack_block_diag_mask(per_batch, H, neg):
    """(N, Lq, Lk) additive mask -> (H*N*Lq, H*N*Lk) head-major block-diagonal
    additive mask (off-diagonal = neg)."""
    N, Lq, Lk = per_batch.shape
    blocks = jnp.tile(per_batch, (H, 1, 1))              # (H*N, Lq, Lk)
    B = H * N
    eye = jnp.eye(B, dtype=bool)
    big = jnp.where(eye[:, None, :, None], blocks[:, :, None, :],
                    jnp.float32(neg))
    return big.reshape(B * Lq, B * Lk)


# ----------------------------- full forward ----------------------------------
def seq2seq_forward(packed, src, tgt, src_mask, tgt_mask,
                    src_padding_mask, tgt_padding_mask, memory_key_padding_mask):
    E, H = EMB_SIZE, NHEAD
    S, N = src.shape
    T = tgt.shape[0]
    lay = build_layout()
    emb_scale = math.sqrt(E)

    # Token-embedding gather + scaled positional add: a few hundred elements;
    # plain XLA glue (below pallas_call overhead).
    src_x = packed["src_emb"][src] * emb_scale + packed["pos"][:S][:, None, :]  # (S,N,E)
    tgt_x = packed["tgt_emb"][tgt] * emb_scale + packed["pos"][:T][:, None, :]  # (T,N,E)
    x = src_x.transpose(1, 0, 2).reshape(N * S, E)        # batch-major slabs
    y = tgt_x.transpose(1, 0, 2).reshape(N * T, E)

    neg = jnp.float32(NEG)
    src_kpm = jnp.where(src_padding_mask, neg, 0.0).astype(jnp.float32)          # (N,S)
    tgt_kpm = jnp.where(tgt_padding_mask, neg, 0.0).astype(jnp.float32)          # (N,T)
    mem_kpm = jnp.where(memory_key_padding_mask, neg, 0.0).astype(jnp.float32)   # (N,S)

    # clamp any -inf in the user-provided float masks to a large finite negative
    sm = jnp.maximum(src_mask.astype(jnp.float32), neg)
    tm = jnp.maximum(tgt_mask.astype(jnp.float32), neg)

    enc_b = sm[None, :, :] + src_kpm[:, None, :]                                 # (N,S,S)
    dec_sb = tm[None, :, :] + tgt_kpm[:, None, :]                                # (N,T,T)
    dec_cb = jnp.broadcast_to(mem_kpm[:, None, :], (N, T, S))                    # (N,T,S)

    emask = _pack_block_diag_mask(enc_b, H, NEG)         # (H*N*S, H*N*S)
    smask = _pack_block_diag_mask(dec_sb, H, NEG)        # (H*N*T, H*N*T)
    cmask = _pack_block_diag_mask(dec_cb, H, NEG)        # (H*N*T, H*N*S)

    w_slab = packed["w_slab"]
    inputs = (x, y, emask, smask, cmask, w_slab)

    out_pad = pl.pallas_call(
        functools.partial(_fused_kernel, lay=lay, N=N, S=S, T=T, H=H),
        out_shape=jax.ShapeDtypeStruct((N * T, TGT_VOCAB_PAD), jnp.float32),
        grid=(1,),
        in_specs=[_full_spec(a.shape) for a in inputs],
        out_specs=_full_spec((N * T, TGT_VOCAB_PAD)),
        compiler_params=pltpu.CompilerParams(dimension_semantics=("arbitrary",)),
    )(*inputs)

    # (N*T, TGT_VOCAB_PAD) -> (T, N, TGT_VOCAB)
    logits = out_pad[:, :TGT_VOCAB].reshape(N, T, TGT_VOCAB).transpose(1, 0, 2)
    return logits


# ----------------------------- parameter init --------------------------------
def make_pos_embedding(maxlen, E):
    pos = jnp.arange(maxlen, dtype=jnp.float32)[:, None]
    den = jnp.exp(-jnp.arange(0, E, 2, dtype=jnp.float32) * math.log(10000.0) / E)
    pe = jnp.zeros((maxlen, E), jnp.float32)
    pe = pe.at[:, 0::2].set(jnp.sin(pos * den))
    pe = pe.at[:, 1::2].set(jnp.cos(pos * den))
    return pe


def init_attn_params(key, E):
    k1, k2 = jax.random.split(key)
    return {
        "in_proj_w": 0.05 * jax.random.normal(k1, (3 * E, E), jnp.float32),
        "in_proj_b": jnp.zeros((1, 3 * E), jnp.float32),
        "out_proj_w": 0.05 * jax.random.normal(k2, (E, E), jnp.float32),
        "out_proj_b": jnp.zeros((1, E), jnp.float32),
    }


def init_encoder_layer(key, E, ff):
    ks = jax.random.split(key, 3)
    return {
        "self_attn": init_attn_params(ks[0], E),
        "linear1_w": 0.05 * jax.random.normal(ks[1], (ff, E), jnp.float32),
        "linear1_b": jnp.zeros((1, ff), jnp.float32),
        "linear2_w": 0.05 * jax.random.normal(ks[2], (E, ff), jnp.float32),
        "linear2_b": jnp.zeros((1, E), jnp.float32),
        "norm1_w": jnp.ones((1, E), jnp.float32), "norm1_b": jnp.zeros((1, E), jnp.float32),
        "norm2_w": jnp.ones((1, E), jnp.float32), "norm2_b": jnp.zeros((1, E), jnp.float32),
    }


def init_decoder_layer(key, E, ff):
    ks = jax.random.split(key, 4)
    return {
        "self_attn": init_attn_params(ks[0], E),
        "cross_attn": init_attn_params(ks[1], E),
        "linear1_w": 0.05 * jax.random.normal(ks[2], (ff, E), jnp.float32),
        "linear1_b": jnp.zeros((1, ff), jnp.float32),
        "linear2_w": 0.05 * jax.random.normal(ks[3], (E, ff), jnp.float32),
        "linear2_b": jnp.zeros((1, E), jnp.float32),
        "norm1_w": jnp.ones((1, E), jnp.float32), "norm1_b": jnp.zeros((1, E), jnp.float32),
        "norm2_w": jnp.ones((1, E), jnp.float32), "norm2_b": jnp.zeros((1, E), jnp.float32),
        "norm3_w": jnp.ones((1, E), jnp.float32), "norm3_b": jnp.zeros((1, E), jnp.float32),
    }


def init_params(key):
    keys = iter(jax.random.split(key, 3 + NUM_ENC + NUM_DEC))
    src_emb = 0.05 * jax.random.normal(next(keys), (SRC_VOCAB, EMB_SIZE), jnp.float32)
    tgt_emb = 0.05 * jax.random.normal(next(keys), (TGT_VOCAB, EMB_SIZE), jnp.float32)
    gen_w = jnp.zeros((TGT_VOCAB_PAD, EMB_SIZE), jnp.float32).at[:TGT_VOCAB].set(
        0.05 * jax.random.normal(next(keys), (TGT_VOCAB, EMB_SIZE), jnp.float32))
    return {
        "src_emb": src_emb,
        "tgt_emb": tgt_emb,
        "gen_w": gen_w,
        "gen_b": jnp.zeros((1, TGT_VOCAB_PAD), jnp.float32),
        "pos": make_pos_embedding(MAXLEN, EMB_SIZE),
        "enc_norm_w": jnp.ones((1, EMB_SIZE), jnp.float32),
        "enc_norm_b": jnp.zeros((1, EMB_SIZE), jnp.float32),
        "dec_norm_w": jnp.ones((1, EMB_SIZE), jnp.float32),
        "dec_norm_b": jnp.zeros((1, EMB_SIZE), jnp.float32),
        "enc_layers": [init_encoder_layer(next(keys), EMB_SIZE, FFN) for _ in range(NUM_ENC)],
        "dec_layers": [init_decoder_layer(next(keys), EMB_SIZE, FFN) for _ in range(NUM_DEC)],
    }


# -------------------- one-time weight packing (outside jit) ------------------
def pack_params(p):
    """Transpose all weights to (in,out), fold 1/sqrt(d) into the Q projection,
    and pack every parameter into one lane-dense (rows, 128) f32 slab."""
    lay = build_layout()
    E, H = EMB_SIZE, NHEAD
    d = E // H
    scale = 1.0 / math.sqrt(d)
    qscale = jnp.concatenate([jnp.full((E,), scale, jnp.float32),
                              jnp.ones((2 * E,), jnp.float32)])        # (3E,)
    slab = jnp.zeros((lay["rows"], 128), jnp.float32)

    def put(slab, off, arr):
        arr = jnp.asarray(arr, jnp.float32)
        if arr.ndim == 1:
            arr = arr[None, :]
        r, c = arr.shape
        return slab.at[off:off + r, :c].set(arr)

    def put_attn(slab, off_in, off_out, vec_off, vrow, attn):
        slab = put(slab, off_in, attn["in_proj_w"].T * qscale[None, :])
        slab = put(slab, off_out, attn["out_proj_w"].T)
        slab = put(slab, vec_off + vrow, attn["in_proj_b"].reshape(-1) * qscale)
        slab = put(slab, vec_off + vrow + 1, attn["out_proj_b"].reshape(-1))
        return slab

    for lp, lo in zip(p["enc_layers"], lay["enc"]):
        slab = put_attn(slab, lo["in_w"], lo["out_w"], lo["vec"], 0, lp["self_attn"])
        slab = put(slab, lo["vec"] + 2, lp["norm1_w"].reshape(-1))
        slab = put(slab, lo["vec"] + 3, lp["norm1_b"].reshape(-1))
        slab = put(slab, lo["l1_w"], lp["linear1_w"].T)
        slab = put(slab, lo["vec"] + 4, lp["linear1_b"].reshape(-1))
        slab = put(slab, lo["l2_w"], lp["linear2_w"].T)
        slab = put(slab, lo["vec"] + 5, lp["linear2_b"].reshape(-1))
        slab = put(slab, lo["vec"] + 6, lp["norm2_w"].reshape(-1))
        slab = put(slab, lo["vec"] + 7, lp["norm2_b"].reshape(-1))

    for lp, lo in zip(p["dec_layers"], lay["dec"]):
        slab = put_attn(slab, lo["sa_in_w"], lo["sa_out_w"], lo["vec"], 0, lp["self_attn"])
        slab = put(slab, lo["vec"] + 2, lp["norm1_w"].reshape(-1))
        slab = put(slab, lo["vec"] + 3, lp["norm1_b"].reshape(-1))
        slab = put_attn(slab, lo["ca_in_w"], lo["ca_out_w"], lo["vec"], 4, lp["cross_attn"])
        slab = put(slab, lo["vec"] + 6, lp["norm2_w"].reshape(-1))
        slab = put(slab, lo["vec"] + 7, lp["norm2_b"].reshape(-1))
        slab = put(slab, lo["l1_w"], lp["linear1_w"].T)
        slab = put(slab, lo["vec"] + 8, lp["linear1_b"].reshape(-1))
        slab = put(slab, lo["l2_w"], lp["linear2_w"].T)
        slab = put(slab, lo["vec"] + 9, lp["linear2_b"].reshape(-1))
        slab = put(slab, lo["vec"] + 10, lp["norm3_w"].reshape(-1))
        slab = put(slab, lo["vec"] + 11, lp["norm3_b"].reshape(-1))

    slab = put(slab, lay["gen_w"], p["gen_w"].T)                  # (E, 128)
    slab = put(slab, lay["gvec"] + 0, p["enc_norm_w"].reshape(-1))
    slab = put(slab, lay["gvec"] + 1, p["enc_norm_b"].reshape(-1))
    slab = put(slab, lay["gvec"] + 2, p["dec_norm_w"].reshape(-1))
    slab = put(slab, lay["gvec"] + 3, p["dec_norm_b"].reshape(-1))
    slab = put(slab, lay["gvec"] + 4, p["gen_b"].reshape(-1))

    return {"w_slab": slab, "src_emb": p["src_emb"],
            "tgt_emb": p["tgt_emb"], "pos": p["pos"]}


# ----------------------------- driver ----------------------------------------
if __name__ == "__main__":
    root = jax.random.PRNGKey(0)
    kp, k1, k2 = jax.random.split(root, 3)

    params = init_params(kp)
    packed = pack_params(params)          # one-time host-side packing

    S, T, N = 8, 8, 2
    src = jax.random.randint(k1, (S, N), 0, SRC_VOCAB, dtype=jnp.int32)
    tgt = jax.random.randint(k2, (T, N), 0, TGT_VOCAB, dtype=jnp.int32)

    src_mask = jnp.zeros((S, S), jnp.float32)
    tgt_mask = jnp.where(jnp.tril(jnp.ones((T, T), dtype=bool)),
                         0.0, -jnp.inf).astype(jnp.float32)   # clamped to -1e9 in glue
    src_padding_mask = jnp.zeros((N, S), dtype=bool).at[1, -2:].set(True)
    tgt_padding_mask = jnp.zeros((N, T), dtype=bool).at[1, -1:].set(True)
    memory_key_padding_mask = src_padding_mask

    fwd = jax.jit(seq2seq_forward)
    out = fwd(packed, src, tgt, src_mask, tgt_mask,
              src_padding_mask, tgt_padding_mask, memory_key_padding_mask)
    jax.block_until_ready(out)

    assert out.shape == (T, N, TGT_VOCAB), out.shape
    assert bool(jnp.all(jnp.isfinite(out)))
    print("KERNEL_OK")
</pallas_src>

<mosaic_0001>
module attributes {stable_mosaic.version = 11 : i64} {
  func.func @_fused_kernel(%arg0: i32, %arg1: memref<16x32xf32, #tpu.memory_space<vmem>>, %arg2: memref<16x32xf32, #tpu.memory_space<vmem>>, %arg3: memref<64x64xf32, #tpu.memory_space<vmem>>, %arg4: memref<64x64xf32, #tpu.memory_space<vmem>>, %arg5: memref<64x64xf32, #tpu.memory_space<vmem>>, %arg6: memref<856x128xf32, #tpu.memory_space<vmem>>, %arg7: memref<16x128xf32, #tpu.memory_space<vmem>>) attributes {dimension_semantics = [#tpu.dimension_semantics<arbitrary>], iteration_bounds = array<i64: 1>, scalar_prefetch = 0 : i64, scratch_operands = 0 : i64, tpu.core_type = #tpu.core_type<tc>, window_params = [{pipeline_mode = #tpu.pipeline_mode<synchronous>, transform_indices = @transform_0, window_bounds = array<i64: 16, 32>}, {pipeline_mode = #tpu.pipeline_mode<synchronous>, transform_indices = @transform_1, window_bounds = array<i64: 16, 32>}, {pipeline_mode = #tpu.pipeline_mode<synchronous>, transform_indices = @transform_2, window_bounds = array<i64: 64, 64>}, {pipeline_mode = #tpu.pipeline_mode<synchronous>, transform_indices = @transform_3, window_bounds = array<i64: 64, 64>}, {pipeline_mode = #tpu.pipeline_mode<synchronous>, transform_indices = @transform_4, window_bounds = array<i64: 64, 64>}, {pipeline_mode = #tpu.pipeline_mode<synchronous>, transform_indices = @transform_5, window_bounds = array<i64: 856, 128>}, {pipeline_mode = #tpu.pipeline_mode<synchronous>, transform_indices = @transform_6, window_bounds = array<i64: 16, 128>}]} {
    %c0 = arith.constant 0 : index
    %c0_0 = arith.constant 0 : index
    %0 = vector.load %arg3[%c0, %c0_0] : memref<64x64xf32, #tpu.memory_space<vmem>>, vector<64x64xf32>
    %c0_1 = arith.constant 0 : index
    %c0_2 = arith.constant 0 : index
    %1 = vector.load %arg4[%c0_1, %c0_2] : memref<64x64xf32, #tpu.memory_space<vmem>>, vector<64x64xf32>
    %c0_3 = arith.constant 0 : index
    %c0_4 = arith.constant 0 : index
    %2 = vector.load %arg5[%c0_3, %c0_4] : memref<64x64xf32, #tpu.memory_space<vmem>>, vector<64x64xf32>
    %c848 = arith.constant 848 : index
    %c0_5 = arith.constant 0 : index
    %3 = vector.load %arg6[%c848, %c0_5] : memref<856x128xf32, #tpu.memory_space<vmem>>, vector<8x128xf32>
    %c0_6 = arith.constant 0 : index
    %c0_7 = arith.constant 0 : index
    %4 = vector.load %arg1[%c0_6, %c0_7] : memref<16x32xf32, #tpu.memory_space<vmem>>, vector<16x32xf32>
    %c160 = arith.constant 160 : index
    %c0_8 = arith.constant 0 : index
    %5 = vector.load %arg6[%c160, %c0_8] : memref<856x128xf32, #tpu.memory_space<vmem>>, vector<8x128xf32>
    %c0_9 = arith.constant 0 : index
    %c0_10 = arith.constant 0 : index
    %6 = vector.load %arg6[%c0_9, %c0_10] : memref<856x128xf32, #tpu.memory_space<vmem>>, vector<32x96xf32>
    %7 = vector.extract_strided_slice %5 {offsets = [0, 0], sizes = [1, 96], strides = [1, 1]} : vector<8x128xf32> to vector<1x96xf32>
    %c32 = arith.constant 32 : index
    %c0_11 = arith.constant 0 : index
    %8 = vector.load %arg6[%c32, %c0_11] : memref<856x128xf32, #tpu.memory_space<vmem>>, vector<32x32xf32>
    %9 = vector.extract_strided_slice %5 {offsets = [1, 0], sizes = [1, 32], strides = [1, 1]} : vector<8x128xf32> to vector<1x32xf32>
    %cst = arith.constant dense<0.000000e+00> : vector<16x96xf32>
    %10 = tpu.matmul %4, %6, %cst {dimension_numbers = #tpu.dot_dimension_numbers<[1], [0], [0], [1], [0, 0, 1, 1], [], []>} : vector<16x32xf32>, vector<32x96xf32>, vector<16x96xf32> -> vector<16x96xf32>
    %11 = vector.broadcast %7 : vector<1x96xf32> to vector<16x96xf32>
    %12 = arith.addf %10, %11 : vector<16x96xf32>
    %13 = vector.extract_strided_slice %12 {offsets = [0, 0], sizes = [16, 32], strides = [1, 1]} : vector<16x96xf32> to vector<16x32xf32>
    %14 = vector.extract_strided_slice %12 {offsets = [0, 32], sizes = [16, 32], strides = [1, 1]} : vector<16x96xf32> to vector<16x32xf32>
    %15 = vector.extract_strided_slice %12 {offsets = [0, 64], sizes = [16, 32], strides = [1, 1]} : vector<16x96xf32> to vector<16x32xf32>
    %16 = vector.extract_strided_slice %13 {offsets = [0, 0], sizes = [16, 8], strides = [1, 1]} : vector<16x32xf32> to vector<16x8xf32>
    %17 = vector.extract_strided_slice %13 {offsets = [0, 8], sizes = [16, 8], strides = [1, 1]} : vector<16x32xf32> to vector<16x8xf32>
    %18 = vector.extract_strided_slice %13 {offsets = [0, 16], sizes = [16, 8], strides = [1, 1]} : vector<16x32xf32> to vector<16x8xf32>
    %19 = vector.extract_strided_slice %13 {offsets = [0, 24], sizes = [16, 8], strides = [1, 1]} : vector<16x32xf32> to vector<16x8xf32>
    %20 = tpu.concatenate %16, %17, %18, %19 in 0 : vector<16x8xf32>, vector<16x8xf32>, vector<16x8xf32>, vector<16x8xf32> -> vector<64x8xf32>
    %21 = vector.extract_strided_slice %14 {offsets = [0, 0], sizes = [16, 8], strides = [1, 1]} : vector<16x32xf32> to vector<16x8xf32>
    %22 = vector.extract_strided_slice %14 {offsets = [0, 8], sizes = [16, 8], strides = [1, 1]} : vector<16x32xf32> to vector<16x8xf32>
    %23 = vector.extract_strided_slice %14 {offsets = [0, 16], sizes = [16, 8], strides = [1, 1]} : vector<16x32xf32> to vector<16x8xf32>
    %24 = vector.extract_strided_slice %14 {offsets = [0, 24], sizes = [16, 8], strides = [1, 1]} : vector<16x32xf32> to vector<16x8xf32>
    %25 = tpu.concatenate %21, %22, %23, %24 in 0 : vector<16x8xf32>, vector<16x8xf32>, vector<16x8xf32>, vector<16x8xf32> -> vector<64x8xf32>
    %26 = vector.extract_strided_slice %15 {offsets = [0, 0], sizes = [16, 8], strides = [1, 1]} : vector<16x32xf32> to vector<16x8xf32>
    %27 = vector.extract_strided_slice %15 {offsets = [0, 8], sizes = [16, 8], strides = [1, 1]} : vector<16x32xf32> to vector<16x8xf32>
    %28 = vector.extract_strided_slice %15 {offsets = [0, 16], sizes = [16, 8], strides = [1, 1]} : vector<16x32xf32> to vector<16x8xf32>
    %29 = vector.extract_strided_slice %15 {offsets = [0, 24], sizes = [16, 8], strides = [1, 1]} : vector<16x32xf32> to vector<16x8xf32>
    %30 = tpu.concatenate %26, %27, %28, %29 in 0 : vector<16x8xf32>, vector<16x8xf32>, vector<16x8xf32>, vector<16x8xf32> -> vector<64x8xf32>
    %cst_12 = arith.constant dense<0.000000e+00> : vector<64x64xf32>
    %31 = tpu.matmul %20, %25, %cst_12 {dimension_numbers = #tpu.dot_dimension_numbers<[1], [1], [0], [0], [0, 0, 1, 0], [], []>} : vector<64x8xf32>, vector<64x8xf32>, vector<64x64xf32> -> vector<64x64xf32>
    %32 = arith.addf %31, %0 : vector<64x64xf32>
    %cst_13 = arith.constant dense<0xFF800000> : vector<64xf32>
    %33 = vector.multi_reduction <maximumf>, %32, %cst_13 [1] : vector<64x64xf32> to vector<64xf32>
    %34 = vector.shape_cast %33 : vector<64xf32> to vector<64x1xf32>
    %35 = vector.broadcast %34 : vector<64x1xf32> to vector<64x64xf32>
    %36 = arith.subf %32, %35 : vector<64x64xf32>
    %37 = math.exp %36 : vector<64x64xf32>
    %cst_14 = arith.constant dense<0.000000e+00> : vector<64xf32>
    %38 = vector.multi_reduction <add>, %37, %cst_14 [1] : vector<64x64xf32> to vector<64xf32>
    %39 = vector.shape_cast %38 : vector<64xf32> to vector<64x1xf32>
    %40 = tpu.reciprocal %39 {approx = true} : vector<64x1xf32> -> vector<64x1xf32>
    %41 = vector.broadcast %40 : vector<64x1xf32> to vector<64x64xf32>
    %42 = arith.mulf %37, %41 : vector<64x64xf32>
    %cst_15 = arith.constant dense<0.000000e+00> : vector<64x8xf32>
    %43 = tpu.matmul %42, %30, %cst_15 {dimension_numbers = #tpu.dot_dimension_numbers<[1], [0], [0], [1], [0, 0, 1, 1], [], []>} : vector<64x64xf32>, vector<64x8xf32>, vector<64x8xf32> -> vector<64x8xf32>
    %44 = vector.extract_strided_slice %43 {offsets = [0, 0], sizes = [16, 8], strides = [1, 1]} : vector<64x8xf32> to vector<16x8xf32>
    %45 = vector.extract_strided_slice %8 {offsets = [0, 0], sizes = [8, 32], strides = [1, 1]} : vector<32x32xf32> to vector<8x32xf32>
    %cst_16 = arith.constant dense<0.000000e+00> : vector<16x32xf32>
    %46 = tpu.matmul %44, %45, %cst_16 {dimension_numbers = #tpu.dot_dimension_numbers<[1], [0], [0], [1], [0, 0, 1, 1], [], []>} : vector<16x8xf32>, vector<8x32xf32>, vector<16x32xf32> -> vector<16x32xf32>
    %47 = vector.broadcast %9 : vector<1x32xf32> to vector<16x32xf32>
    %48 = arith.addf %47, %46 : vector<16x32xf32>
    %49 = vector.extract_strided_slice %43 {offsets = [16, 0], sizes = [16, 8], strides = [1, 1]} : vector<64x8xf32> to vector<16x8xf32>
    %50 = vector.extract_strided_slice %8 {offsets = [8, 0], sizes = [8, 32], strides = [1, 1]} : vector<32x32xf32> to vector<8x32xf32>
    %cst_17 = arith.constant dense<0.000000e+00> : vector<16x32xf32>
    %51 = tpu.matmul %49, %50, %cst_17 {dimension_numbers = #tpu.dot_dimension_numbers<[1], [0], [0], [1], [0, 0, 1, 1], [], []>} : vector<16x8xf32>, vector<8x32xf32>, vector<16x32xf32> -> vector<16x32xf32>
    %52 = arith.addf %48, %51 : vector<16x32xf32>
    %53 = vector.extract_strided_slice %43 {offsets = [32, 0], sizes = [16, 8], strides = [1, 1]} : vector<64x8xf32> to vector<16x8xf32>
    %54 = vector.extract_strided_slice %8 {offsets = [16, 0], sizes = [8, 32], strides = [1, 1]} : vector<32x32xf32> to vector<8x32xf32>
    %cst_18 = arith.constant dense<0.000000e+00> : vector<16x32xf32>
    %55 = tpu.matmul %53, %54, %cst_18 {dimension_numbers = #tpu.dot_dimension_numbers<[1], [0], [0], [1], [0, 0, 1, 1], [], []>} : vector<16x8xf32>, vector<8x32xf32>, vector<16x32xf32> -> vector<16x32xf32>
    %56 = arith.addf %52, %55 : vector<16x32xf32>
    %57 = vector.extract_strided_slice %43 {offsets = [48, 0], sizes = [16, 8], strides = [1, 1]} : vector<64x8xf32> to vector<16x8xf32>
    %58 = vector.extract_strided_slice %8 {offsets = [24, 0], sizes = [8, 32], strides = [1, 1]} : vector<32x32xf32> to vector<8x32xf32>
    %cst_19 = arith.constant dense<0.000000e+00> : vector<16x32xf32>
    %59 = tpu.matmul %57, %58, %cst_19 {dimension_numbers = #tpu.dot_dimension_numbers<[1], [0], [0], [1], [0, 0, 1, 1], [], []>} : vector<16x8xf32>, vector<8x32xf32>, vector<16x32xf32> -> vector<16x32xf32>
    %60 = arith.addf %56, %59 : vector<16x32xf32>
    %61 = arith.addf %4, %60 : vector<16x32xf32>
    %62 = vector.extract_strided_slice %5 {offsets = [2, 0], sizes = [1, 32], strides = [1, 1]} : vector<8x128xf32> to vector<1x32xf32>
    %63 = vector.extract_strided_slice %5 {offsets = [3, 0], sizes = [1, 32], strides = [1, 1]} : vector<8x128xf32> to vector<1x32xf32>
    %cst_20 = arith.constant dense<0.000000e+00> : vector<16xf32>
    %64 = vector.multi_reduction <add>, %61, %cst_20 [1] : vector<16x32xf32> to vector<16xf32>
    %65 = vector.shape_cast %64 : vector<16xf32> to vector<16x1xf32>
    %cst_21 = arith.constant 3.200000e+01 : f32
    %66 = vector.broadcast %cst_21 : f32 to vector<16x1xf32>
    %67 = arith.divf %65, %66 : vector<16x1xf32>
    %68 = vector.broadcast %67 : vector<16x1xf32> to vector<16x32xf32>
    %69 = arith.subf %61, %68 : vector<16x32xf32>
    %70 = arith.mulf %69, %69 : vector<16x32xf32>
    %cst_22 = arith.constant dense<0.000000e+00> : vector<16xf32>
    %71 = vector.multi_reduction <add>, %70, %cst_22 [1] : vector<16x32xf32> to vector<16xf32>
    %72 = vector.shape_cast %71 : vector<16xf32> to vector<16x1xf32>
    %cst_23 = arith.constant 3.200000e+01 : f32
    %73 = vector.broadcast %cst_23 : f32 to vector<16x1xf32>
    %74 = arith.divf %72, %73 : vector<16x1xf32>
    %75 = vector.broadcast %67 : vector<16x1xf32> to vector<16x32xf32>
    %76 = arith.subf %61, %75 : vector<16x32xf32>
    %cst_24 = arith.constant 9.99999974E-6 : f32
    %77 = vector.broadcast %cst_24 : f32 to vector<16x1xf32>
    %78 = arith.addf %74, %77 : vector<16x1xf32>
    %79 = math.rsqrt %78 : vector<16x1xf32>
    %80 = vector.broadcast %79 : vector<16x1xf32> to vector<16x32xf32>
    %81 = arith.mulf %76, %80 : vector<16x32xf32>
    %82 = vector.broadcast %62 : vector<1x32xf32> to vector<16x32xf32>
    %83 = arith.mulf %81, %82 : vector<16x32xf32>
    %84 = vector.broadcast %63 : vector<1x32xf32> to vector<16x32xf32>
    %85 = arith.addf %83, %84 : vector<16x32xf32>
    %c64 = arith.constant 64 : index
    %c0_25 = arith.constant 0 : index
    %86 = vector.load %arg6[%c64, %c0_25] : memref<856x128xf32, #tpu.memory_space<vmem>>, vector<32x64xf32>
    %cst_26 = arith.constant dense<0.000000e+00> : vector<16x64xf32>
    %87 = tpu.matmul %85, %86, %cst_26 {dimension_numbers = #tpu.dot_dimension_numbers<[1], [0], [0], [1], [0, 0, 1, 1], [], []>} : vector<16x32xf32>, vector<32x64xf32>, vector<16x64xf32> -> vector<16x64xf32>
    %88 = vector.extract_strided_slice %5 {offsets = [4, 0], sizes = [1, 64], strides = [1, 1]} : vector<8x128xf32> to vector<1x64xf32>
    %89 = vector.broadcast %88 : vector<1x64xf32> to vector<16x64xf32>
    %90 = arith.addf %87, %89 : vector<16x64xf32>
    %cst_27 = arith.constant 0.000000e+00 : f32
    %91 = vector.broadcast %cst_27 : f32 to vector<16x64xf32>
    %92 = arith.maximumf %90, %91 : vector<16x64xf32>
    %c96 = arith.constant 96 : index
    %c0_28 = arith.constant 0 : index
    %93 = vector.load %arg6[%c96, %c0_28] : memref<856x128xf32, #tpu.memory_space<vmem>>, vector<64x32xf32>
    %cst_29 = arith.constant dense<0.000000e+00> : vector<16x32xf32>
    %94 = tpu.matmul %92, %93, %cst_29 {dimension_numbers = #tpu.dot_dimension_numbers<[1], [0], [0], [1], [0, 0, 1, 1], [], []>} : vector<16x64xf32>, vector<64x32xf32>, vector<16x32xf32> -> vector<16x32xf32>
    %95 = vector.extract_strided_slice %5 {offsets = [5, 0], sizes = [1, 32], strides = [1, 1]} : vector<8x128xf32> to vector<1x32xf32>
    %96 = vector.broadcast %95 : vector<1x32xf32> to vector<16x32xf32>
    %97 = arith.addf %94, %96 : vector<16x32xf32>
    %98 = arith.addf %85, %97 : vector<16x32xf32>
    %99 = vector.extract_strided_slice %5 {offsets = [6, 0], sizes = [1, 32], strides = [1, 1]} : vector<8x128xf32> to vector<1x32xf32>
    %100 = vector.extract_strided_slice %5 {offsets = [7, 0], sizes = [1, 32], strides = [1, 1]} : vector<8x128xf32> to vector<1x32xf32>
    %cst_30 = arith.constant dense<0.000000e+00> : vector<16xf32>
    %101 = vector.multi_reduction <add>, %98, %cst_30 [1] : vector<16x32xf32> to vector<16xf32>
    %102 = vector.shape_cast %101 : vector<16xf32> to vector<16x1xf32>
    %cst_31 = arith.constant 3.200000e+01 : f32
    %103 = vector.broadcast %cst_31 : f32 to vector<16x1xf32>
    %104 = arith.divf %102, %103 : vector<16x1xf32>
    %105 = vector.broadcast %104 : vector<16x1xf32> to vector<16x32xf32>
    %106 = arith.subf %98, %105 : vector<16x32xf32>
    %107 = arith.mulf %106, %106 : vector<16x32xf32>
    %cst_32 = arith.constant dense<0.000000e+00> : vector<16xf32>
    %108 = vector.multi_reduction <add>, %107, %cst_32 [1] : vector<16x32xf32> to vector<16xf32>
    %109 = vector.shape_cast %108 : vector<16xf32> to vector<16x1xf32>
    %cst_33 = arith.constant 3.200000e+01 : f32
    %110 = vector.broadcast %cst_33 : f32 to vector<16x1xf32>
    %111 = arith.divf %109, %110 : vector<16x1xf32>
    %112 = vector.broadcast %104 : vector<16x1xf32> to vector<16x32xf32>
    %113 = arith.subf %98, %112 : vector<16x32xf32>
    %cst_34 = arith.constant 9.99999974E-6 : f32
    %114 = vector.broadcast %cst_34 : f32 to vector<16x1xf32>
    %115 = arith.addf %111, %114 : vector<16x1xf32>
    %116 = math.rsqrt %115 : vector<16x1xf32>
    %117 = vector.broadcast %116 : vector<16x1xf32> to vector<16x32xf32>
    %118 = arith.mulf %113, %117 : vector<16x32xf32>
    %119 = vector.broadcast %99 : vector<1x32xf32> to vector<16x32xf32>
    %120 = arith.mulf %118, %119 : vector<16x32xf32>
    %121 = vector.broadcast %100 : vector<1x32xf32> to vector<16x32xf32>
    %122 = arith.addf %120, %121 : vector<16x32xf32>
    %c328 = arith.constant 328 : index
    %c0_35 = arith.constant 0 : index
    %123 = vector.load %arg6[%c328, %c0_35] : memref<856x128xf32, #tpu.memory_space<vmem>>, vector<8x128xf32>
    %c168 = arith.constant 168 : index
    %c0_36 = arith.constant 0 : index
    %124 = vector.load %arg6[%c168, %c0_36] : memref<856x128xf32, #tpu.memory_space<vmem>>, vector<32x96xf32>
    %125 = vector.extract_strided_slice %123 {offsets = [0, 0], sizes = [1, 96], strides = [1, 1]} : vector<8x128xf32> to vector<1x96xf32>
    %c200 = arith.constant 200 : index
    %c0_37 = arith.constant 0 : index
    %126 = vector.load %arg6[%c200, %c0_37] : memref<856x128xf32, #tpu.memory_space<vmem>>, vector<32x32xf32>
    %127 = vector.extract_strided_slice %123 {offsets = [1, 0], sizes = [1, 32], strides = [1, 1]} : vector<8x128xf32> to vector<1x32xf32>
    %cst_38 = arith.constant dense<0.000000e+00> : vector<16x96xf32>
    %128 = tpu.matmul %122, %124, %cst_38 {dimension_numbers = #tpu.dot_dimension_numbers<[1], [0], [0], [1], [0, 0, 1, 1], [], []>} : vector<16x32xf32>, vector<32x96xf32>, vector<16x96xf32> -> vector<16x96xf32>
    %129 = vector.broadcast %125 : vector<1x96xf32> to vector<16x96xf32>
    %130 = arith.addf %128, %129 : vector<16x96xf32>
    %131 = vector.extract_strided_slice %130 {offsets = [0, 0], sizes = [16, 32], strides = [1, 1]} : vector<16x96xf32> to vector<16x32xf32>
    %132 = vector.extract_strided_slice %130 {offsets = [0, 32], sizes = [16, 32], strides = [1, 1]} : vector<16x96xf32> to vector<16x32xf32>
    %133 = vector.extract_strided_slice %130 {offsets = [0, 64], sizes = [16, 32], strides = [1, 1]} : vector<16x96xf32> to vector<16x32xf32>
    %134 = vector.extract_strided_slice %131 {offsets = [0, 0], sizes = [16, 8], strides = [1, 1]} : vector<16x32xf32> to vector<16x8xf32>
    %135 = vector.extract_strided_slice %131 {offsets = [0, 8], sizes = [16, 8], strides = [1, 1]} : vector<16x32xf32> to vector<16x8xf32>
    %136 = vector.extract_strided_slice %131 {offsets = [0, 16], sizes = [16, 8], strides = [1, 1]} : vector<16x32xf32> to vector<16x8xf32>
    %137 = vector.extract_strided_slice %131 {offsets = [0, 24], sizes = [16, 8], strides = [1, 1]} : vector<16x32xf32> to vector<16x8xf32>
    %138 = tpu.concatenate %134, %135, %136, %137 in 0 : vector<16x8xf32>, vector<16x8xf32>, vector<16x8xf32>, vector<16x8xf32> -> vector<64x8xf32>
    %139 = vector.extract_strided_slice %132 {offsets = [0, 0], sizes = [16, 8], strides = [1, 1]} : vector<16x32xf32> to vector<16x8xf32>
    %140 = vector.extract_strided_slice %132 {offsets = [0, 8], sizes = [16, 8], strides = [1, 1]} : vector<16x32xf32> to vector<16x8xf32>
    %141 = vector.extract_strided_slice %132 {offsets = [0, 16], sizes = [16, 8], strides = [1, 1]} : vector<16x32xf32> to vector<16x8xf32>
    %142 = vector.extract_strided_slice %132 {offsets = [0, 24], sizes = [16, 8], strides = [1, 1]} : vector<16x32xf32> to vector<16x8xf32>
    %143 = tpu.concatenate %139, %140, %141, %142 in 0 : vector<16x8xf32>, vector<16x8xf32>, vector<16x8xf32>, vector<16x8xf32> -> vector<64x8xf32>
    %144 = vector.extract_strided_slice %133 {offsets = [0, 0], sizes = [16, 8], strides = [1, 1]} : vector<16x32xf32> to vector<16x8xf32>
    %145 = vector.extract_strided_slice %133 {offsets = [0, 8], sizes = [16, 8], strides = [1, 1]} : vector<16x32xf32> to vector<16x8xf32>
    %146 = vector.extract_strided_slice %133 {offsets = [0, 16], sizes = [16, 8], strides = [1, 1]} : vector<16x32xf32> to vector<16x8xf32>
    %147 = vector.extract_strided_slice %133 {offsets = [0, 24], sizes = [16, 8], strides = [1, 1]} : vector<16x32xf32> to vector<16x8xf32>
    %148 = tpu.concatenate %144, %145, %146, %147 in 0 : vector<16x8xf32>, vector<16x8xf32>, vector<16x8xf32>, vector<16x8xf32> -> vector<64x8xf32>
    %cst_39 = arith.constant dense<0.000000e+00> : vector<64x64xf32>
    %149 = tpu.matmul %138, %143, %cst_39 {dimension_numbers = #tpu.dot_dimension_numbers<[1], [1], [0], [0], [0, 0, 1, 0], [], []>} : vector<64x8xf32>, vector<64x8xf32>, vector<64x64xf32> -> vector<64x64xf32>
    %150 = arith.addf %149, %0 : vector<64x64xf32>
    %cst_40 = arith.constant dense<0xFF800000> : vector<64xf32>
    %151 = vector.multi_reduction <maximumf>, %150, %cst_40 [1] : vector<64x64xf32> to vector<64xf32>
    %152 = vector.shape_cast %151 : vector<64xf32> to vector<64x1xf32>
    %153 = vector.broadcast %152 : vector<64x1xf32> to vector<64x64xf32>
    %154 = arith.subf %150, %153 : vector<64x64xf32>
    %155 = math.exp %154 : vector<64x64xf32>
    %cst_41 = arith.constant dense<0.000000e+00> : vector<64xf32>
    %156 = vector.multi_reduction <add>, %155, %cst_41 [1] : vector<64x64xf32> to vector<64xf32>
    %157 = vector.shape_cast %156 : vector<64xf32> to vector<64x1xf32>
    %158 = tpu.reciprocal %157 {approx = true} : vector<64x1xf32> -> vector<64x1xf32>
    %159 = vector.broadcast %158 : vector<64x1xf32> to vector<64x64xf32>
    %160 = arith.mulf %155, %159 : vector<64x64xf32>
    %cst_42 = arith.constant dense<0.000000e+00> : vector<64x8xf32>
    %161 = tpu.matmul %160, %148, %cst_42 {dimension_numbers = #tpu.dot_dimension_numbers<[1], [0], [0], [1], [0, 0, 1, 1], [], []>} : vector<64x64xf32>, vector<64x8xf32>, vector<64x8xf32> -> vector<64x8xf32>
    %162 = vector.extract_strided_slice %161 {offsets = [0, 0], sizes = [16, 8], strides = [1, 1]} : vector<64x8xf32> to vector<16x8xf32>
    %163 = vector.extract_strided_slice %126 {offsets = [0, 0], sizes = [8, 32], strides = [1, 1]} : vector<32x32xf32> to vector<8x32xf32>
    %cst_43 = arith.constant dense<0.000000e+00> : vector<16x32xf32>
    %164 = tpu.matmul %162, %163, %cst_43 {dimension_numbers = #tpu.dot_dimension_numbers<[1], [0], [0], [1], [0, 0, 1, 1], [], []>} : vector<16x8xf32>, vector<8x32xf32>, vector<16x32xf32> -> vector<16x32xf32>
    %165 = vector.broadcast %127 : vector<1x32xf32> to vector<16x32xf32>
    %166 = arith.addf %165, %164 : vector<16x32xf32>
    %167 = vector.extract_strided_slice %161 {offsets = [16, 0], sizes = [16, 8], strides = [1, 1]} : vector<64x8xf32> to vector<16x8xf32>
    %168 = vector.extract_strided_slice %126 {offsets = [8, 0], sizes = [8, 32], strides = [1, 1]} : vector<32x32xf32> to vector<8x32xf32>
    %cst_44 = arith.constant dense<0.000000e+00> : vector<16x32xf32>
    %169 = tpu.matmul %167, %168, %cst_44 {dimension_numbers = #tpu.dot_dimension_numbers<[1], [0], [0], [1], [0, 0, 1, 1], [], []>} : vector<16x8xf32>, vector<8x32xf32>, vector<16x32xf32> -> vector<16x32xf32>
    %170 = arith.addf %166, %169 : vector<16x32xf32>
    %171 = vector.extract_strided_slice %161 {offsets = [32, 0], sizes = [16, 8], strides = [1, 1]} : vector<64x8xf32> to vector<16x8xf32>
    %172 = vector.extract_strided_slice %126 {offsets = [16, 0], sizes = [8, 32], strides = [1, 1]} : vector<32x32xf32> to vector<8x32xf32>
    %cst_45 = arith.constant dense<0.000000e+00> : vector<16x32xf32>
    %173 = tpu.matmul %171, %172, %cst_45 {dimension_numbers = #tpu.dot_dimension_numbers<[1], [0], [0], [1], [0, 0, 1, 1], [], []>} : vector<16x8xf32>, vector<8x32xf32>, vector<16x32xf32> -> vector<16x32xf32>
    %174 = arith.addf %170, %173 : vector<16x32xf32>
    %175 = vector.extract_strided_slice %161 {offsets = [48, 0], sizes = [16, 8], strides = [1, 1]} : vector<64x8xf32> to vector<16x8xf32>
    %176 = vector.extract_strided_slice %126 {offsets = [24, 0], sizes = [8, 32], strides = [1, 1]} : vector<32x32xf32> to vector<8x32xf32>
    %cst_46 = arith.constant dense<0.000000e+00> : vector<16x32xf32>
    %177 = tpu.matmul %175, %176, %cst_46 {dimension_numbers = #tpu.dot_dimension_numbers<[1], [0], [0], [1], [0, 0, 1, 1], [], []>} : vector<16x8xf32>, vector<8x32xf32>, vector<16x32xf32> -> vector<16x32xf32>
    %178 = arith.addf %174, %177 : vector<16x32xf32>
    %179 = arith.addf %122, %178 : vector<16x32xf32>
    %180 = vector.extract_strided_slice %123 {offsets = [2, 0], sizes = [1, 32], strides = [1, 1]} : vector<8x128xf32> to vector<1x32xf32>
    %181 = vector.extract_strided_slice %123 {offsets = [3, 0], sizes = [1, 32], strides = [1, 1]} : vector<8x128xf32> to vector<1x32xf32>
    %cst_47 = arith.constant dense<0.000000e+00> : vector<16xf32>
    %182 = vector.multi_reduction <add>, %179, %cst_47 [1] : vector<16x32xf32> to vector<16xf32>
    %183 = vector.shape_cast %182 : vector<16xf32> to vector<16x1xf32>
    %cst_48 = arith.constant 3.200000e+01 : f32
    %184 = vector.broadcast %cst_48 : f32 to vector<16x1xf32>
    %185 = arith.divf %183, %184 : vector<16x1xf32>
    %186 = vector.broadcast %185 : vector<16x1xf32> to vector<16x32xf32>
    %187 = arith.subf %179, %186 : vector<16x32xf32>
    %188 = arith.mulf %187, %187 : vector<16x32xf32>
    %cst_49 = arith.constant dense<0.000000e+00> : vector<16xf32>
    %189 = vector.multi_reduction <add>, %188, %cst_49 [1] : vector<16x32xf32> to vector<16xf32>
    %190 = vector.shape_cast %189 : vector<16xf32> to vector<16x1xf32>
    %cst_50 = arith.constant 3.200000e+01 : f32
    %191 = vector.broadcast %cst_50 : f32 to vector<16x1xf32>
    %192 = arith.divf %190, %191 : vector<16x1xf32>
    %193 = vector.broadcast %185 : vector<16x1xf32> to vector<16x32xf32>
    %194 = arith.subf %179, %193 : vector<16x32xf32>
    %cst_51 = arith.constant 9.99999974E-6 : f32
    %195 = vector.broadcast %cst_51 : f32 to vector<16x1xf32>
    %196 = arith.addf %192, %195 : vector<16x1xf32>
    %197 = math.rsqrt %196 : vector<16x1xf32>
    %198 = vector.broadcast %197 : vector<16x1xf32> to vector<16x32xf32>
    %199 = arith.mulf %194, %198 : vector<16x32xf32>
    %200 = vector.broadcast %180 : vector<1x32xf32> to vector<16x32xf32>
    %201 = arith.mulf %199, %200 : vector<16x32xf32>
    %202 = vector.broadcast %181 : vector<1x32xf32> to vector<16x32xf32>
    %203 = arith.addf %201, %202 : vector<16x32xf32>
    %c232 = arith.constant 232 : index
    %c0_52 = arith.constant 0 : index
    %204 = vector.load %arg6[%c232, %c0_52] : memref<856x128xf32, #tpu.memory_space<vmem>>, vector<32x64xf32>
    %cst_53 = arith.constant dense<0.000000e+00> : vector<16x64xf32>
    %205 = tpu.matmul %203, %204, %cst_53 {dimension_numbers = #tpu.dot_dimension_numbers<[1], [0], [0], [1], [0, 0, 1, 1], [], []>} : vector<16x32xf32>, vector<32x64xf32>, vector<16x64xf32> -> vector<16x64xf32>
    %206 = vector.extract_strided_slice %123 {offsets = [4, 0], sizes = [1, 64], strides = [1, 1]} : vector<8x128xf32> to vector<1x64xf32>
    %207 = vector.broadcast %206 : vector<1x64xf32> to vector<16x64xf32>
    %208 = arith.addf %205, %207 : vector<16x64xf32>
    %cst_54 = arith.constant 0.000000e+00 : f32
    %209 = vector.broadcast %cst_54 : f32 to vector<16x64xf32>
    %210 = arith.maximumf %208, %209 : vector<16x64xf32>
    %c264 = arith.constant 264 : index
    %c0_55 = arith.constant 0 : index
    %211 = vector.load %arg6[%c264, %c0_55] : memref<856x128xf32, #tpu.memory_space<vmem>>, vector<64x32xf32>
    %cst_56 = arith.constant dense<0.000000e+00> : vector<16x32xf32>
    %212 = tpu.matmul %210, %211, %cst_56 {dimension_numbers = #tpu.dot_dimension_numbers<[1], [0], [0], [1], [0, 0, 1, 1], [], []>} : vector<16x64xf32>, vector<64x32xf32>, vector<16x32xf32> -> vector<16x32xf32>
    %213 = vector.extract_strided_slice %123 {offsets = [5, 0], sizes = [1, 32], strides = [1, 1]} : vector<8x128xf32> to vector<1x32xf32>
    %214 = vector.broadcast %213 : vector<1x32xf32> to vector<16x32xf32>
    %215 = arith.addf %212, %214 : vector<16x32xf32>
    %216 = arith.addf %203, %215 : vector<16x32xf32>
    %217 = vector.extract_strided_slice %123 {offsets = [6, 0], sizes = [1, 32], strides = [1, 1]} : vector<8x128xf32> to vector<1x32xf32>
    %218 = vector.extract_strided_slice %123 {offsets = [7, 0], sizes = [1, 32], strides = [1, 1]} : vector<8x128xf32> to vector<1x32xf32>
    %cst_57 = arith.constant dense<0.000000e+00> : vector<16xf32>
    %219 = vector.multi_reduction <add>, %216, %cst_57 [1] : vector<16x32xf32> to vector<16xf32>
    %220 = vector.shape_cast %219 : vector<16xf32> to vector<16x1xf32>
    %cst_58 = arith.constant 3.200000e+01 : f32
    %221 = vector.broadcast %cst_58 : f32 to vector<16x1xf32>
    %222 = arith.divf %220, %221 : vector<16x1xf32>
    %223 = vector.broadcast %222 : vector<16x1xf32> to vector<16x32xf32>
    %224 = arith.subf %216, %223 : vector<16x32xf32>
    %225 = arith.mulf %224, %224 : vector<16x32xf32>
    %cst_59 = arith.constant dense<0.000000e+00> : vector<16xf32>
    %226 = vector.multi_reduction <add>, %225, %cst_59 [1] : vector<16x32xf32> to vector<16xf32>
    %227 = vector.shape_cast %226 : vector<16xf32> to vector<16x1xf32>
    %cst_60 = arith.constant 3.200000e+01 : f32
    %228 = vector.broadcast %cst_60 : f32 to vector<16x1xf32>
    %229 = arith.divf %227, %228 : vector<16x1xf32>
    %230 = vector.broadcast %222 : vector<16x1xf32> to vector<16x32xf32>
    %231 = arith.subf %216, %230 : vector<16x32xf32>
    %cst_61 = arith.constant 9.99999974E-6 : f32
    %232 = vector.broadcast %cst_61 : f32 to vector<16x1xf32>
    %233 = arith.addf %229, %232 : vector<16x1xf32>
    %234 = math.rsqrt %233 : vector<16x1xf32>
    %235 = vector.broadcast %234 : vector<16x1xf32> to vector<16x32xf32>
    %236 = arith.mulf %231, %235 : vector<16x32xf32>
    %237 = vector.broadcast %217 : vector<1x32xf32> to vector<16x32xf32>
    %238 = arith.mulf %236, %237 : vector<16x32xf32>
    %239 = vector.broadcast %218 : vector<1x32xf32> to vector<16x32xf32>
    %240 = arith.addf %238, %239 : vector<16x32xf32>
    %241 = vector.extract_strided_slice %3 {offsets = [0, 0], sizes = [1, 32], strides = [1, 1]} : vector<8x128xf32> to vector<1x32xf32>
    %242 = vector.extract_strided_slice %3 {offsets = [1, 0], sizes = [1, 32], strides = [1, 1]} : vector<8x128xf32> to vector<1x32xf32>
    %cst_62 = arith.constant dense<0.000000e+00> : vector<16xf32>
    %243 = vector.multi_reduction <add>, %240, %cst_62 [1] : vector<16x32xf32> to vector<16xf32>
    %244 = vector.shape_cast %243 : vector<16xf32> to vector<16x1xf32>
    %cst_63 = arith.constant 3.200000e+01 : f32
    %245 = vector.broadcast %cst_63 : f32 to vector<16x1xf32>
    %246 = arith.divf %244, %245 : vector<16x1xf32>
    %247 = vector.broadcast %246 : vector<16x1xf32> to vector<16x32xf32>
    %248 = arith.subf %240, %247 : vector<16x32xf32>
    %249 = arith.mulf %248, %248 : vector<16x32xf32>
    %cst_64 = arith.constant dense<0.000000e+00> : vector<16xf32>
    %250 = vector.multi_reduction <add>, %249, %cst_64 [1] : vector<16x32xf32> to vector<16xf32>
    %251 = vector.shape_cast %250 : vector<16xf32> to vector<16x1xf32>
    %cst_65 = arith.constant 3.200000e+01 : f32
    %252 = vector.broadcast %cst_65 : f32 to vector<16x1xf32>
    %253 = arith.divf %251, %252 : vector<16x1xf32>
    %254 = vector.broadcast %246 : vector<16x1xf32> to vector<16x32xf32>
    %255 = arith.subf %240, %254 : vector<16x32xf32>
    %cst_66 = arith.constant 9.99999974E-6 : f32
    %256 = vector.broadcast %cst_66 : f32 to vector<16x1xf32>
    %257 = arith.addf %253, %256 : vector<16x1xf32>
    %258 = math.rsqrt %257 : vector<16x1xf32>
    %259 = vector.broadcast %258 : vector<16x1xf32> to vector<16x32xf32>
    %260 = arith.mulf %255, %259 : vector<16x32xf32>
    %261 = vector.broadcast %241 : vector<1x32xf32> to vector<16x32xf32>
    %262 = arith.mulf %260, %261 : vector<16x32xf32>
    %263 = vector.broadcast %242 : vector<1x32xf32> to vector<16x32xf32>
    %264 = arith.addf %262, %263 : vector<16x32xf32>
    %c0_67 = arith.constant 0 : index
    %c0_68 = arith.constant 0 : index
    %265 = vector.load %arg2[%c0_67, %c0_68] : memref<16x32xf32, #tpu.memory_space<vmem>>, vector<16x32xf32>
    %c560 = arith.constant 560 : index
    %c0_69 = arith.constant 0 : index
    %266 = vector.load %arg6[%c560, %c0_69] : memref<856x128xf32, #tpu.memory_space<vmem>>, vector<16x128xf32>
    %c336 = arith.constant 336 : index
    %c0_70 = arith.constant 0 : index
    %267 = vector.load %arg6[%c336, %c0_70] : memref<856x128xf32, #tpu.memory_space<vmem>>, vector<32x96xf32>
    %268 = vector.extract_strided_slice %266 {offsets = [0, 0], sizes = [1, 96], strides = [1, 1]} : vector<16x128xf32> to vector<1x96xf32>
    %c368 = arith.constant 368 : index
    %c0_71 = arith.constant 0 : index
    %269 = vector.load %arg6[%c368, %c0_71] : memref<856x128xf32, #tpu.memory_space<vmem>>, vector<32x32xf32>
    %270 = vector.extract_strided_slice %266 {offsets = [1, 0], sizes = [1, 32], strides = [1, 1]} : vector<16x128xf32> to vector<1x32xf32>
    %cst_72 = arith.constant dense<0.000000e+00> : vector<16x96xf32>
    %271 = tpu.matmul %265, %267, %cst_72 {dimension_numbers = #tpu.dot_dimension_numbers<[1], [0], [0], [1], [0, 0, 1, 1], [], []>} : vector<16x32xf32>, vector<32x96xf32>, vector<16x96xf32> -> vector<16x96xf32>
    %272 = vector.broadcast %268 : vector<1x96xf32> to vector<16x96xf32>
    %273 = arith.addf %271, %272 : vector<16x96xf32>
    %274 = vector.extract_strided_slice %273 {offsets = [0, 0], sizes = [16, 32], strides = [1, 1]} : vector<16x96xf32> to vector<16x32xf32>
    %275 = vector.extract_strided_slice %273 {offsets = [0, 32], sizes = [16, 32], strides = [1, 1]} : vector<16x96xf32> to vector<16x32xf32>
    %276 = vector.extract_strided_slice %273 {offsets = [0, 64], sizes = [16, 32], strides = [1, 1]} : vector<16x96xf32> to vector<16x32xf32>
    %277 = vector.extract_strided_slice %274 {offsets = [0, 0], sizes = [16, 8], strides = [1, 1]} : vector<16x32xf32> to vector<16x8xf32>
    %278 = vector.extract_strided_slice %274 {offsets = [0, 8], sizes = [16, 8], strides = [1, 1]} : vector<16x32xf32> to vector<16x8xf32>
    %279 = vector.extract_strided_slice %274 {offsets = [0, 16], sizes = [16, 8], strides = [1, 1]} : vector<16x32xf32> to vector<16x8xf32>
    %280 = vector.extract_strided_slice %274 {offsets = [0, 24], sizes = [16, 8], strides = [1, 1]} : vector<16x32xf32> to vector<16x8xf32>
    %281 = tpu.concatenate %277, %278, %279, %280 in 0 : vector<16x8xf32>, vector<16x8xf32>, vector<16x8xf32>, vector<16x8xf32> -> vector<64x8xf32>
    %282 = vector.extract_strided_slice %275 {offsets = [0, 0], sizes = [16, 8], strides = [1, 1]} : vector<16x32xf32> to vector<16x8xf32>
    %283 = vector.extract_strided_slice %275 {offsets = [0, 8], sizes = [16, 8], strides = [1, 1]} : vector<16x32xf32> to vector<16x8xf32>
    %284 = vector.extract_strided_slice %275 {offsets = [0, 16], sizes = [16, 8], strides = [1, 1]} : vector<16x32xf32> to vector<16x8xf32>
    %285 = vector.extract_strided_slice %275 {offsets = [0, 24], sizes = [16, 8], strides = [1, 1]} : vector<16x32xf32> to vector<16x8xf32>
    %286 = tpu.concatenate %282, %283, %284, %285 in 0 : vector<16x8xf32>, vector<16x8xf32>, vector<16x8xf32>, vector<16x8xf32> -> vector<64x8xf32>
    %287 = vector.extract_strided_slice %276 {offsets = [0, 0], sizes = [16, 8], strides = [1, 1]} : vector<16x32xf32> to vector<16x8xf32>
    %288 = vector.extract_strided_slice %276 {offsets = [0, 8], sizes = [16, 8], strides = [1, 1]} : vector<16x32xf32> to vector<16x8xf32>
    %289 = vector.extract_strided_slice %276 {offsets = [0, 16], sizes = [16, 8], strides = [1, 1]} : vector<16x32xf32> to vector<16x8xf32>
    %290 = vector.extract_strided_slice %276 {offsets = [0, 24], sizes = [16, 8], strides = [1, 1]} : vector<16x32xf32> to vector<16x8xf32>
    %291 = tpu.concatenate %287, %288, %289, %290 in 0 : vector<16x8xf32>, vector<16x8xf32>, vector<16x8xf32>, vector<16x8xf32> -> vector<64x8xf32>
    %cst_73 = arith.constant dense<0.000000e+00> : vector<64x64xf32>
    %292 = tpu.matmul %281, %286, %cst_73 {dimension_numbers = #tpu.dot_dimension_numbers<[1], [1], [0], [0], [0, 0, 1, 0], [], []>} : vector<64x8xf32>, vector<64x8xf32>, vector<64x64xf32> -> vector<64x64xf32>
    %293 = arith.addf %292, %1 : vector<64x64xf32>
    %cst_74 = arith.constant dense<0xFF800000> : vector<64xf32>
    %294 = vector.multi_reduction <maximumf>, %293, %cst_74 [1] : vector<64x64xf32> to vector<64xf32>
    %295 = vector.shape_cast %294 : vector<64xf32> to vector<64x1xf32>
    %296 = vector.broadcast %295 : vector<64x1xf32> to vector<64x64xf32>
    %297 = arith.subf %293, %296 : vector<64x64xf32>
    %298 = math.exp %297 : vector<64x64xf32>
    %cst_75 = arith.constant dense<0.000000e+00> : vector<64xf32>
    %299 = vector.multi_reduction <add>, %298, %cst_75 [1] : vector<64x64xf32> to vector<64xf32>
    %300 = vector.shape_cast %299 : vector<64xf32> to vector<64x1xf32>
    %301 = tpu.reciprocal %300 {approx = true} : vector<64x1xf32> -> vector<64x1xf32>
    %302 = vector.broadcast %301 : vector<64x1xf32> to vector<64x64xf32>
    %303 = arith.mulf %298, %302 : vector<64x64xf32>
    %cst_76 = arith.constant dense<0.000000e+00> : vector<64x8xf32>
    %304 = tpu.matmul %303, %291, %cst_76 {dimension_numbers = #tpu.dot_dimension_numbers<[1], [0], [0], [1], [0, 0, 1, 1], [], []>} : vector<64x64xf32>, vector<64x8xf32>, vector<64x8xf32> -> vector<64x8xf32>
    %305 = vector.extract_strided_slice %304 {offsets = [0, 0], sizes = [16, 8], strides = [1, 1]} : vector<64x8xf32> to vector<16x8xf32>
    %306 = vector.extract_strided_slice %269 {offsets = [0, 0], sizes = [8, 32], strides = [1, 1]} : vector<32x32xf32> to vector<8x32xf32>
    %cst_77 = arith.constant dense<0.000000e+00> : vector<16x32xf32>
    %307 = tpu.matmul %305, %306, %cst_77 {dimension_numbers = #tpu.dot_dimension_numbers<[1], [0], [0], [1], [0, 0, 1, 1], [], []>} : vector<16x8xf32>, vector<8x32xf32>, vector<16x32xf32> -> vector<16x32xf32>
    %308 = vector.broadcast %270 : vector<1x32xf32> to vector<16x32xf32>
    %309 = arith.addf %308, %307 : vector<16x32xf32>
    %310 = vector.extract_strided_slice %304 {offsets = [16, 0], sizes = [16, 8], strides = [1, 1]} : vector<64x8xf32> to vector<16x8xf32>
    %311 = vector.extract_strided_slice %269 {offsets = [8, 0], sizes = [8, 32], strides = [1, 1]} : vector<32x32xf32> to vector<8x32xf32>
    %cst_78 = arith.constant dense<0.000000e+00> : vector<16x32xf32>
    %312 = tpu.matmul %310, %311, %cst_78 {dimension_numbers = #tpu.dot_dimension_numbers<[1], [0], [0], [1], [0, 0, 1, 1], [], []>} : vector<16x8xf32>, vector<8x32xf32>, vector<16x32xf32> -> vector<16x32xf32>
    %313 = arith.addf %309, %312 : vector<16x32xf32>
    %314 = vector.extract_strided_slice %304 {offsets = [32, 0], sizes = [16, 8], strides = [1, 1]} : vector<64x8xf32> to vector<16x8xf32>
    %315 = vector.extract_strided_slice %269 {offsets = [16, 0], sizes = [8, 32], strides = [1, 1]} : vector<32x32xf32> to vector<8x32xf32>
    %cst_79 = arith.constant dense<0.000000e+00> : vector<16x32xf32>
    %316 = tpu.matmul %314, %315, %cst_79 {dimension_numbers = #tpu.dot_dimension_numbers<[1], [0], [0], [1], [0, 0, 1, 1], [], []>} : vector<16x8xf32>, vector<8x32xf32>, vector<16x32xf32> -> vector<16x32xf32>
    %317 = arith.addf %313, %316 : vector<16x32xf32>
    %318 = vector.extract_strided_slice %304 {offsets = [48, 0], sizes = [16, 8], strides = [1, 1]} : vector<64x8xf32> to vector<16x8xf32>
    %319 = vector.extract_strided_slice %269 {offsets = [24, 0], sizes = [8, 32], strides = [1, 1]} : vector<32x32xf32> to vector<8x32xf32>
    %cst_80 = arith.constant dense<0.000000e+00> : vector<16x32xf32>
    %320 = tpu.matmul %318, %319, %cst_80 {dimension_numbers = #tpu.dot_dimension_numbers<[1], [0], [0], [1], [0, 0, 1, 1], [], []>} : vector<16x8xf32>, vector<8x32xf32>, vector<16x32xf32> -> vector<16x32xf32>
    %321 = arith.addf %317, %320 : vector<16x32xf32>
    %322 = arith.addf %265, %321 : vector<16x32xf32>
    %323 = vector.extract_strided_slice %266 {offsets = [2, 0], sizes = [1, 32], strides = [1, 1]} : vector<16x128xf32> to vector<1x32xf32>
    %324 = vector.extract_strided_slice %266 {offsets = [3, 0], sizes = [1, 32], strides = [1, 1]} : vector<16x128xf32> to vector<1x32xf32>
    %cst_81 = arith.constant dense<0.000000e+00> : vector<16xf32>
    %325 = vector.multi_reduction <add>, %322, %cst_81 [1] : vector<16x32xf32> to vector<16xf32>
    %326 = vector.shape_cast %325 : vector<16xf32> to vector<16x1xf32>
    %cst_82 = arith.constant 3.200000e+01 : f32
    %327 = vector.broadcast %cst_82 : f32 to vector<16x1xf32>
    %328 = arith.divf %326, %327 : vector<16x1xf32>
    %329 = vector.broadcast %328 : vector<16x1xf32> to vector<16x32xf32>
    %330 = arith.subf %322, %329 : vector<16x32xf32>
    %331 = arith.mulf %330, %330 : vector<16x32xf32>
    %cst_83 = arith.constant dense<0.000000e+00> : vector<16xf32>
    %332 = vector.multi_reduction <add>, %331, %cst_83 [1] : vector<16x32xf32> to vector<16xf32>
    %333 = vector.shape_cast %332 : vector<16xf32> to vector<16x1xf32>
    %cst_84 = arith.constant 3.200000e+01 : f32
    %334 = vector.broadcast %cst_84 : f32 to vector<16x1xf32>
    %335 = arith.divf %333, %334 : vector<16x1xf32>
    %336 = vector.broadcast %328 : vector<16x1xf32> to vector<16x32xf32>
    %337 = arith.subf %322, %336 : vector<16x32xf32>
    %cst_85 = arith.constant 9.99999974E-6 : f32
    %338 = vector.broadcast %cst_85 : f32 to vector<16x1xf32>
    %339 = arith.addf %335, %338 : vector<16x1xf32>
    %340 = math.rsqrt %339 : vector<16x1xf32>
    %341 = vector.broadcast %340 : vector<16x1xf32> to vector<16x32xf32>
    %342 = arith.mulf %337, %341 : vector<16x32xf32>
    %343 = vector.broadcast %323 : vector<1x32xf32> to vector<16x32xf32>
    %344 = arith.mulf %342, %343 : vector<16x32xf32>
    %345 = vector.broadcast %324 : vector<1x32xf32> to vector<16x32xf32>
    %346 = arith.addf %344, %345 : vector<16x32xf32>
    %c400 = arith.constant 400 : index
    %c0_86 = arith.constant 0 : index
    %347 = vector.load %arg6[%c400, %c0_86] : memref<856x128xf32, #tpu.memory_space<vmem>>, vector<32x96xf32>
    %348 = vector.extract_strided_slice %266 {offsets = [4, 0], sizes = [1, 96], strides = [1, 1]} : vector<16x128xf32> to vector<1x96xf32>
    %c432 = arith.constant 432 : index
    %c0_87 = arith.constant 0 : index
    %349 = vector.load %arg6[%c432, %c0_87] : memref<856x128xf32, #tpu.memory_space<vmem>>, vector<32x32xf32>
    %350 = vector.extract_strided_slice %266 {offsets = [5, 0], sizes = [1, 32], strides = [1, 1]} : vector<16x128xf32> to vector<1x32xf32>
    %351 = vector.extract_strided_slice %347 {offsets = [0, 0], sizes = [32, 32], strides = [1, 1]} : vector<32x96xf32> to vector<32x32xf32>
    %cst_88 = arith.constant dense<0.000000e+00> : vector<16x32xf32>
    %352 = tpu.matmul %346, %351, %cst_88 {dimension_numbers = #tpu.dot_dimension_numbers<[1], [0], [0], [1], [0, 0, 1, 1], [], []>} : vector<16x32xf32>, vector<32x32xf32>, vector<16x32xf32> -> vector<16x32xf32>
    %353 = vector.extract_strided_slice %348 {offsets = [0, 0], sizes = [1, 32], strides = [1, 1]} : vector<1x96xf32> to vector<1x32xf32>
    %354 = vector.broadcast %353 : vector<1x32xf32> to vector<16x32xf32>
    %355 = arith.addf %352, %354 : vector<16x32xf32>
    %356 = vector.extract_strided_slice %347 {offsets = [0, 32], sizes = [32, 64], strides = [1, 1]} : vector<32x96xf32> to vector<32x64xf32>
    %cst_89 = arith.constant dense<0.000000e+00> : vector<16x64xf32>
    %357 = tpu.matmul %264, %356, %cst_89 {dimension_numbers = #tpu.dot_dimension_numbers<[1], [0], [0], [1], [0, 0, 1, 1], [], []>} : vector<16x32xf32>, vector<32x64xf32>, vector<16x64xf32> -> vector<16x64xf32>
    %358 = vector.extract_strided_slice %348 {offsets = [0, 32], sizes = [1, 64], strides = [1, 1]} : vector<1x96xf32> to vector<1x64xf32>
    %359 = vector.broadcast %358 : vector<1x64xf32> to vector<16x64xf32>
    %360 = arith.addf %357, %359 : vector<16x64xf32>
    %361 = vector.extract_strided_slice %360 {offsets = [0, 0], sizes = [16, 32], strides = [1, 1]} : vector<16x64xf32> to vector<16x32xf32>
    %362 = vector.extract_strided_slice %360 {offsets = [0, 32], sizes = [16, 32], strides = [1, 1]} : vector<16x64xf32> to vector<16x32xf32>
    %363 = vector.extract_strided_slice %355 {offsets = [0, 0], sizes = [16, 8], strides = [1, 1]} : vector<16x32xf32> to vector<16x8xf32>
    %364 = vector.extract_strided_slice %355 {offsets = [0, 8], sizes = [16, 8], strides = [1, 1]} : vector<16x32xf32> to vector<16x8xf32>
    %365 = vector.extract_strided_slice %355 {offsets = [0, 16], sizes = [16, 8], strides = [1, 1]} : vector<16x32xf32> to vector<16x8xf32>
    %366 = vector.extract_strided_slice %355 {offsets = [0, 24], sizes = [16, 8], strides = [1, 1]} : vector<16x32xf32> to vector<16x8xf32>
    %367 = tpu.concatenate %363, %364, %365, %366 in 0 : vector<16x8xf32>, vector<16x8xf32>, vector<16x8xf32>, vector<16x8xf32> -> vector<64x8xf32>
    %368 = vector.extract_strided_slice %361 {offsets = [0, 0], sizes = [16, 8], strides = [1, 1]} : vector<16x32xf32> to vector<16x8xf32>
    %369 = vector.extract_strided_slice %361 {offsets = [0, 8], sizes = [16, 8], strides = [1, 1]} : vector<16x32xf32> to vector<16x8xf32>
    %370 = vector.extract_strided_slice %361 {offsets = [0, 16], sizes = [16, 8], strides = [1, 1]} : vector<16x32xf32> to vector<16x8xf32>
    %371 = vector.extract_strided_slice %361 {offsets = [0, 24], sizes = [16, 8], strides = [1, 1]} : vector<16x32xf32> to vector<16x8xf32>
    %372 = tpu.concatenate %368, %369, %370, %371 in 0 : vector<16x8xf32>, vector<16x8xf32>, vector<16x8xf32>, vector<16x8xf32> -> vector<64x8xf32>
    %373 = vector.extract_strided_slice %362 {offsets = [0, 0], sizes = [16, 8], strides = [1, 1]} : vector<16x32xf32> to vector<16x8xf32>
    %374 = vector.extract_strided_slice %362 {offsets = [0, 8], sizes = [16, 8], strides = [1, 1]} : vector<16x32xf32> to vector<16x8xf32>
    %375 = vector.extract_strided_slice %362 {offsets = [0, 16], sizes = [16, 8], strides = [1, 1]} : vector<16x32xf32> to vector<16x8xf32>
    %376 = vector.extract_strided_slice %362 {offsets = [0, 24], sizes = [16, 8], strides = [1, 1]} : vector<16x32xf32> to vector<16x8xf32>
    %377 = tpu.concatenate %373, %374, %375, %376 in 0 : vector<16x8xf32>, vector<16x8xf32>, vector<16x8xf32>, vector<16x8xf32> -> vector<64x8xf32>
    %cst_90 = arith.constant dense<0.000000e+00> : vector<64x64xf32>
    %378 = tpu.matmul %367, %372, %cst_90 {dimension_numbers = #tpu.dot_dimension_numbers<[1], [1], [0], [0], [0, 0, 1, 0], [], []>} : vector<64x8xf32>, vector<64x8xf32>, vector<64x64xf32> -> vector<64x64xf32>
    %379 = arith.addf %378, %2 : vector<64x64xf32>
    %cst_91 = arith.constant dense<0xFF800000> : vector<64xf32>
    %380 = vector.multi_reduction <maximumf>, %379, %cst_91 [1] : vector<64x64xf32> to vector<64xf32>
    %381 = vector.shape_cast %380 : vector<64xf32> to vector<64x1xf32>
    %382 = vector.broadcast %381 : vector<64x1xf32> to vector<64x64xf32>
    %383 = arith.subf %379, %382 : vector<64x64xf32>
    %384 = math.exp %383 : vector<64x64xf32>
    %cst_92 = arith.constant dense<0.000000e+00> : vector<64xf32>
    %385 = vector.multi_reduction <add>, %384, %cst_92 [1] : vector<64x64xf32> to vector<64xf32>
    %386 = vector.shape_cast %385 : vector<64xf32> to vector<64x1xf32>
    %387 = tpu.reciprocal %386 {approx = true} : vector<64x1xf32> -> vector<64x1xf32>
    %388 = vector.broadcast %387 : vector<64x1xf32> to vector<64x64xf32>
    %389 = arith.mulf %384, %388 : vector<64x64xf32>
    %cst_93 = arith.constant dense<0.000000e+00> : vector<64x8xf32>
    %390 = tpu.matmul %389, %377, %cst_93 {dimension_numbers = #tpu.dot_dimension_numbers<[1], [0], [0], [1], [0, 0, 1, 1], [], []>} : vector<64x64xf32>, vector<64x8xf32>, vector<64x8xf32> -> vector<64x8xf32>
    %391 = vector.extract_strided_slice %390 {offsets = [0, 0], sizes = [16, 8], strides = [1, 1]} : vector<64x8xf32> to vector<16x8xf32>
    %392 = vector.extract_strided_slice %349 {offsets = [0, 0], sizes = [8, 32], strides = [1, 1]} : vector<32x32xf32> to vector<8x32xf32>
    %cst_94 = arith.constant dense<0.000000e+00> : vector<16x32xf32>
    %393 = tpu.matmul %391, %392, %cst_94 {dimension_numbers = #tpu.dot_dimension_numbers<[1], [0], [0], [1], [0, 0, 1, 1], [], []>} : vector<16x8xf32>, vector<8x32xf32>, vector<16x32xf32> -> vector<16x32xf32>
    %394 = vector.broadcast %350 : vector<1x32xf32> to vector<16x32xf32>
    %395 = arith.addf %394, %393 : vector<16x32xf32>
    %396 = vector.extract_strided_slice %390 {offsets = [16, 0], sizes = [16, 8], strides = [1, 1]} : vector<64x8xf32> to vector<16x8xf32>
    %397 = vector.extract_strided_slice %349 {offsets = [8, 0], sizes = [8, 32], strides = [1, 1]} : vector<32x32xf32> to vector<8x32xf32>
    %cst_95 = arith.constant dense<0.000000e+00> : vector<16x32xf32>
    %398 = tpu.matmul %396, %397, %cst_95 {dimension_numbers = #tpu.dot_dimension_numbers<[1], [0], [0], [1], [0, 0, 1, 1], [], []>} : vector<16x8xf32>, vector<8x32xf32>, vector<16x32xf32> -> vector<16x32xf32>
    %399 = arith.addf %395, %398 : vector<16x32xf32>
    %400 = vector.extract_strided_slice %390 {offsets = [32, 0], sizes = [16, 8], strides = [1, 1]} : vector<64x8xf32> to vector<16x8xf32>
    %401 = vector.extract_strided_slice %349 {offsets = [16, 0], sizes = [8, 32], strides = [1, 1]} : vector<32x32xf32> to vector<8x32xf32>
    %cst_96 = arith.constant dense<0.000000e+00> : vector<16x32xf32>
    %402 = tpu.matmul %400, %401, %cst_96 {dimension_numbers = #tpu.dot_dimension_numbers<[1], [0], [0], [1], [0, 0, 1, 1], [], []>} : vector<16x8xf32>, vector<8x32xf32>, vector<16x32xf32> -> vector<16x32xf32>
    %403 = arith.addf %399, %402 : vector<16x32xf32>
    %404 = vector.extract_strided_slice %390 {offsets = [48, 0], sizes = [16, 8], strides = [1, 1]} : vector<64x8xf32> to vector<16x8xf32>
    %405 = vector.extract_strided_slice %349 {offsets = [24, 0], sizes = [8, 32], strides = [1, 1]} : vector<32x32xf32> to vector<8x32xf32>
    %cst_97 = arith.constant dense<0.000000e+00> : vector<16x32xf32>
    %406 = tpu.matmul %404, %405, %cst_97 {dimension_numbers = #tpu.dot_dimension_numbers<[1], [0], [0], [1], [0, 0, 1, 1], [], []>} : vector<16x8xf32>, vector<8x32xf32>, vector<16x32xf32> -> vector<16x32xf32>
    %407 = arith.addf %403, %406 : vector<16x32xf32>
    %408 = arith.addf %346, %407 : vector<16x32xf32>
    %409 = vector.extract_strided_slice %266 {offsets = [6, 0], sizes = [1, 32], strides = [1, 1]} : vector<16x128xf32> to vector<1x32xf32>
    %410 = vector.extract_strided_slice %266 {offsets = [7, 0], sizes = [1, 32], strides = [1, 1]} : vector<16x128xf32> to vector<1x32xf32>
    %cst_98 = arith.constant dense<0.000000e+00> : vector<16xf32>
    %411 = vector.multi_reduction <add>, %408, %cst_98 [1] : vector<16x32xf32> to vector<16xf32>
    %412 = vector.shape_cast %411 : vector<16xf32> to vector<16x1xf32>
    %cst_99 = arith.constant 3.200000e+01 : f32
    %413 = vector.broadcast %cst_99 : f32 to vector<16x1xf32>
    %414 = arith.divf %412, %413 : vector<16x1xf32>
    %415 = vector.broadcast %414 : vector<16x1xf32> to vector<16x32xf32>
    %416 = arith.subf %408, %415 : vector<16x32xf32>
    %417 = arith.mulf %416, %416 : vector<16x32xf32>
    %cst_100 = arith.constant dense<0.000000e+00> : vector<16xf32>
    %418 = vector.multi_reduction <add>, %417, %cst_100 [1] : vector<16x32xf32> to vector<16xf32>
    %419 = vector.shape_cast %418 : vector<16xf32> to vector<16x1xf32>
    %cst_101 = arith.constant 3.200000e+01 : f32
    %420 = vector.broadcast %cst_101 : f32 to vector<16x1xf32>
    %421 = arith.divf %419, %420 : vector<16x1xf32>
    %422 = vector.broadcast %414 : vector<16x1xf32> to vector<16x32xf32>
    %423 = arith.subf %408, %422 : vector<16x32xf32>
    %cst_102 = arith.constant 9.99999974E-6 : f32
    %424 = vector.broadcast %cst_102 : f32 to vector<16x1xf32>
    %425 = arith.addf %421, %424 : vector<16x1xf32>
    %426 = math.rsqrt %425 : vector<16x1xf32>
    %427 = vector.broadcast %426 : vector<16x1xf32> to vector<16x32xf32>
    %428 = arith.mulf %423, %427 : vector<16x32xf32>
    %429 = vector.broadcast %409 : vector<1x32xf32> to vector<16x32xf32>
    %430 = arith.mulf %428, %429 : vector<16x32xf32>
    %431 = vector.broadcast %410 : vector<1x32xf32> to vector<16x32xf32>
    %432 = arith.addf %430, %431 : vector<16x32xf32>
    %c464 = arith.constant 464 : index
    %c0_103 = arith.constant 0 : index
    %433 = vector.load %arg6[%c464, %c0_103] : memref<856x128xf32, #tpu.memory_space<vmem>>, vector<32x64xf32>
    %cst_104 = arith.constant dense<0.000000e+00> : vector<16x64xf32>
    %434 = tpu.matmul %432, %433, %cst_104 {dimension_numbers = #tpu.dot_dimension_numbers<[1], [0], [0], [1], [0, 0, 1, 1], [], []>} : vector<16x32xf32>, vector<32x64xf32>, vector<16x64xf32> -> vector<16x64xf32>
    %435 = vector.extract_strided_slice %266 {offsets = [8, 0], sizes = [1, 64], strides = [1, 1]} : vector<16x128xf32> to vector<1x64xf32>
    %436 = vector.broadcast %435 : vector<1x64xf32> to vector<16x64xf32>
    %437 = arith.addf %434, %436 : vector<16x64xf32>
    %cst_105 = arith.constant 0.000000e+00 : f32
    %438 = vector.broadcast %cst_105 : f32 to vector<16x64xf32>
    %439 = arith.maximumf %437, %438 : vector<16x64xf32>
    %c496 = arith.constant 496 : index
    %c0_106 = arith.constant 0 : index
    %440 = vector.load %arg6[%c496, %c0_106] : memref<856x128xf32, #tpu.memory_space<vmem>>, vector<64x32xf32>
    %cst_107 = arith.constant dense<0.000000e+00> : vector<16x32xf32>
    %441 = tpu.matmul %439, %440, %cst_107 {dimension_numbers = #tpu.dot_dimension_numbers<[1], [0], [0], [1], [0, 0, 1, 1], [], []>} : vector<16x64xf32>, vector<64x32xf32>, vector<16x32xf32> -> vector<16x32xf32>
    %442 = vector.extract_strided_slice %266 {offsets = [9, 0], sizes = [1, 32], strides = [1, 1]} : vector<16x128xf32> to vector<1x32xf32>
    %443 = vector.broadcast %442 : vector<1x32xf32> to vector<16x32xf32>
    %444 = arith.addf %441, %443 : vector<16x32xf32>
    %445 = arith.addf %432, %444 : vector<16x32xf32>
    %446 = vector.extract_strided_slice %266 {offsets = [10, 0], sizes = [1, 32], strides = [1, 1]} : vector<16x128xf32> to vector<1x32xf32>
    %447 = vector.extract_strided_slice %266 {offsets = [11, 0], sizes = [1, 32], strides = [1, 1]} : vector<16x128xf32> to vector<1x32xf32>
    %cst_108 = arith.constant dense<0.000000e+00> : vector<16xf32>
    %448 = vector.multi_reduction <add>, %445, %cst_108 [1] : vector<16x32xf32> to vector<16xf32>
    %449 = vector.shape_cast %448 : vector<16xf32> to vector<16x1xf32>
    %cst_109 = arith.constant 3.200000e+01 : f32
    %450 = vector.broadcast %cst_109 : f32 to vector<16x1xf32>
    %451 = arith.divf %449, %450 : vector<16x1xf32>
    %452 = vector.broadcast %451 : vector<16x1xf32> to vector<16x32xf32>
    %453 = arith.subf %445, %452 : vector<16x32xf32>
    %454 = arith.mulf %453, %453 : vector<16x32xf32>
    %cst_110 = arith.constant dense<0.000000e+00> : vector<16xf32>
    %455 = vector.multi_reduction <add>, %454, %cst_110 [1] : vector<16x32xf32> to vector<16xf32>
    %456 = vector.shape_cast %455 : vector<16xf32> to vector<16x1xf32>
    %cst_111 = arith.constant 3.200000e+01 : f32
    %457 = vector.broadcast %cst_111 : f32 to vector<16x1xf32>
    %458 = arith.divf %456, %457 : vector<16x1xf32>
    %459 = vector.broadcast %451 : vector<16x1xf32> to vector<16x32xf32>
    %460 = arith.subf %445, %459 : vector<16x32xf32>
    %cst_112 = arith.constant 9.99999974E-6 : f32
    %461 = vector.broadcast %cst_112 : f32 to vector<16x1xf32>
    %462 = arith.addf %458, %461 : vector<16x1xf32>
    %463 = math.rsqrt %462 : vector<16x1xf32>
    %464 = vector.broadcast %463 : vector<16x1xf32> to vector<16x32xf32>
    %465 = arith.mulf %460, %464 : vector<16x32xf32>
    %466 = vector.broadcast %446 : vector<1x32xf32> to vector<16x32xf32>
    %467 = arith.mulf %465, %466 : vector<16x32xf32>
    %468 = vector.broadcast %447 : vector<1x32xf32> to vector<16x32xf32>
    %469 = arith.addf %467, %468 : vector<16x32xf32>
    %c800 = arith.constant 800 : index
    %c0_113 = arith.constant 0 : index
    %470 = vector.load %arg6[%c800, %c0_113] : memref<856x128xf32, #tpu.memory_space<vmem>>, vector<16x128xf32>
    %c576 = arith.constant 576 : index
    %c0_114 = arith.constant 0 : index
    %471 = vector.load %arg6[%c576, %c0_114] : memref<856x128xf32, #tpu.memory_space<vmem>>, vector<32x96xf32>
    %472 = vector.extract_strided_slice %470 {offsets = [0, 0], sizes = [1, 96], strides = [1, 1]} : vector<16x128xf32> to vector<1x96xf32>
    %c608 = arith.constant 608 : index
    %c0_115 = arith.constant 0 : index
    %473 = vector.load %arg6[%c608, %c0_115] : memref<856x128xf32, #tpu.memory_space<vmem>>, vector<32x32xf32>
    %474 = vector.extract_strided_slice %470 {offsets = [1, 0], sizes = [1, 32], strides = [1, 1]} : vector<16x128xf32> to vector<1x32xf32>
    %cst_116 = arith.constant dense<0.000000e+00> : vector<16x96xf32>
    %475 = tpu.matmul %469, %471, %cst_116 {dimension_numbers = #tpu.dot_dimension_numbers<[1], [0], [0], [1], [0, 0, 1, 1], [], []>} : vector<16x32xf32>, vector<32x96xf32>, vector<16x96xf32> -> vector<16x96xf32>
    %476 = vector.broadcast %472 : vector<1x96xf32> to vector<16x96xf32>
    %477 = arith.addf %475, %476 : vector<16x96xf32>
    %478 = vector.extract_strided_slice %477 {offsets = [0, 0], sizes = [16, 32], strides = [1, 1]} : vector<16x96xf32> to vector<16x32xf32>
    %479 = vector.extract_strided_slice %477 {offsets = [0, 32], sizes = [16, 32], strides = [1, 1]} : vector<16x96xf32> to vector<16x32xf32>
    %480 = vector.extract_strided_slice %477 {offsets = [0, 64], sizes = [16, 32], strides = [1, 1]} : vector<16x96xf32> to vector<16x32xf32>
    %481 = vector.extract_strided_slice %478 {offsets = [0, 0], sizes = [16, 8], strides = [1, 1]} : vector<16x32xf32> to vector<16x8xf32>
    %482 = vector.extract_strided_slice %478 {offsets = [0, 8], sizes = [16, 8], strides = [1, 1]} : vector<16x32xf32> to vector<16x8xf32>
    %483 = vector.extract_strided_slice %478 {offsets = [0, 16], sizes = [16, 8], strides = [1, 1]} : vector<16x32xf32> to vector<16x8xf32>
    %484 = vector.extract_strided_slice %478 {offsets = [0, 24], sizes = [16, 8], strides = [1, 1]} : vector<16x32xf32> to vector<16x8xf32>
    %485 = tpu.concatenate %481, %482, %483, %484 in 0 : vector<16x8xf32>, vector<16x8xf32>, vector<16x8xf32>, vector<16x8xf32> -> vector<64x8xf32>
    %486 = vector.extract_strided_slice %479 {offsets = [0, 0], sizes = [16, 8], strides = [1, 1]} : vector<16x32xf32> to vector<16x8xf32>
    %487 = vector.extract_strided_slice %479 {offsets = [0, 8], sizes = [16, 8], strides = [1, 1]} : vector<16x32xf32> to vector<16x8xf32>
    %488 = vector.extract_strided_slice %479 {offsets = [0, 16], sizes = [16, 8], strides = [1, 1]} : vector<16x32xf32> to vector<16x8xf32>
    %489 = vector.extract_strided_slice %479 {offsets = [0, 24], sizes = [16, 8], strides = [1, 1]} : vector<16x32xf32> to vector<16x8xf32>
    %490 = tpu.concatenate %486, %487, %488, %489 in 0 : vector<16x8xf32>, vector<16x8xf32>, vector<16x8xf32>, vector<16x8xf32> -> vector<64x8xf32>
    %491 = vector.extract_strided_slice %480 {offsets = [0, 0], sizes = [16, 8], strides = [1, 1]} : vector<16x32xf32> to vector<16x8xf32>
    %492 = vector.extract_strided_slice %480 {offsets = [0, 8], sizes = [16, 8], strides = [1, 1]} : vector<16x32xf32> to vector<16x8xf32>
    %493 = vector.extract_strided_slice %480 {offsets = [0, 16], sizes = [16, 8], strides = [1, 1]} : vector<16x32xf32> to vector<16x8xf32>
    %494 = vector.extract_strided_slice %480 {offsets = [0, 24], sizes = [16, 8], strides = [1, 1]} : vector<16x32xf32> to vector<16x8xf32>
    %495 = tpu.concatenate %491, %492, %493, %494 in 0 : vector<16x8xf32>, vector<16x8xf32>, vector<16x8xf32>, vector<16x8xf32> -> vector<64x8xf32>
    %cst_117 = arith.constant dense<0.000000e+00> : vector<64x64xf32>
    %496 = tpu.matmul %485, %490, %cst_117 {dimension_numbers = #tpu.dot_dimension_numbers<[1], [1], [0], [0], [0, 0, 1, 0], [], []>} : vector<64x8xf32>, vector<64x8xf32>, vector<64x64xf32> -> vector<64x64xf32>
    %497 = arith.addf %496, %1 : vector<64x64xf32>
    %cst_118 = arith.constant dense<0xFF800000> : vector<64xf32>
    %498 = vector.multi_reduction <maximumf>, %497, %cst_118 [1] : vector<64x64xf32> to vector<64xf32>
    %499 = vector.shape_cast %498 : vector<64xf32> to vector<64x1xf32>
    %500 = vector.broadcast %499 : vector<64x1xf32> to vector<64x64xf32>
    %501 = arith.subf %497, %500 : vector<64x64xf32>
    %502 = math.exp %501 : vector<64x64xf32>
    %cst_119 = arith.constant dense<0.000000e+00> : vector<64xf32>
    %503 = vector.multi_reduction <add>, %502, %cst_119 [1] : vector<64x64xf32> to vector<64xf32>
    %504 = vector.shape_cast %503 : vector<64xf32> to vector<64x1xf32>
    %505 = tpu.reciprocal %504 {approx = true} : vector<64x1xf32> -> vector<64x1xf32>
    %506 = vector.broadcast %505 : vector<64x1xf32> to vector<64x64xf32>
    %507 = arith.mulf %502, %506 : vector<64x64xf32>
    %cst_120 = arith.constant dense<0.000000e+00> : vector<64x8xf32>
    %508 = tpu.matmul %507, %495, %cst_120 {dimension_numbers = #tpu.dot_dimension_numbers<[1], [0], [0], [1], [0, 0, 1, 1], [], []>} : vector<64x64xf32>, vector<64x8xf32>, vector<64x8xf32> -> vector<64x8xf32>
    %509 = vector.extract_strided_slice %508 {offsets = [0, 0], sizes = [16, 8], strides = [1, 1]} : vector<64x8xf32> to vector<16x8xf32>
    %510 = vector.extract_strided_slice %473 {offsets = [0, 0], sizes = [8, 32], strides = [1, 1]} : vector<32x32xf32> to vector<8x32xf32>
    %cst_121 = arith.constant dense<0.000000e+00> : vector<16x32xf32>
    %511 = tpu.matmul %509, %510, %cst_121 {dimension_numbers = #tpu.dot_dimension_numbers<[1], [0], [0], [1], [0, 0, 1, 1], [], []>} : vector<16x8xf32>, vector<8x32xf32>, vector<16x32xf32> -> vector<16x32xf32>
    %512 = vector.broadcast %474 : vector<1x32xf32> to vector<16x32xf32>
    %513 = arith.addf %512, %511 : vector<16x32xf32>
    %514 = vector.extract_strided_slice %508 {offsets = [16, 0], sizes = [16, 8], strides = [1, 1]} : vector<64x8xf32> to vector<16x8xf32>
    %515 = vector.extract_strided_slice %473 {offsets = [8, 0], sizes = [8, 32], strides = [1, 1]} : vector<32x32xf32> to vector<8x32xf32>
    %cst_122 = arith.constant dense<0.000000e+00> : vector<16x32xf32>
    %516 = tpu.matmul %514, %515, %cst_122 {dimension_numbers = #tpu.dot_dimension_numbers<[1], [0], [0], [1], [0, 0, 1, 1], [], []>} : vector<16x8xf32>, vector<8x32xf32>, vector<16x32xf32> -> vector<16x32xf32>
    %517 = arith.addf %513, %516 : vector<16x32xf32>
    %518 = vector.extract_strided_slice %508 {offsets = [32, 0], sizes = [16, 8], strides = [1, 1]} : vector<64x8xf32> to vector<16x8xf32>
    %519 = vector.extract_strided_slice %473 {offsets = [16, 0], sizes = [8, 32], strides = [1, 1]} : vector<32x32xf32> to vector<8x32xf32>
    %cst_123 = arith.constant dense<0.000000e+00> : vector<16x32xf32>
    %520 = tpu.matmul %518, %519, %cst_123 {dimension_numbers = #tpu.dot_dimension_numbers<[1], [0], [0], [1], [0, 0, 1, 1], [], []>} : vector<16x8xf32>, vector<8x32xf32>, vector<16x32xf32> -> vector<16x32xf32>
    %521 = arith.addf %517, %520 : vector<16x32xf32>
    %522 = vector.extract_strided_slice %508 {offsets = [48, 0], sizes = [16, 8], strides = [1, 1]} : vector<64x8xf32> to vector<16x8xf32>
    %523 = vector.extract_strided_slice %473 {offsets = [24, 0], sizes = [8, 32], strides = [1, 1]} : vector<32x32xf32> to vector<8x32xf32>
    %cst_124 = arith.constant dense<0.000000e+00> : vector<16x32xf32>
    %524 = tpu.matmul %522, %523, %cst_124 {dimension_numbers = #tpu.dot_dimension_numbers<[1], [0], [0], [1], [0, 0, 1, 1], [], []>} : vector<16x8xf32>, vector<8x32xf32>, vector<16x32xf32> -> vector<16x32xf32>
    %525 = arith.addf %521, %524 : vector<16x32xf32>
    %526 = arith.addf %469, %525 : vector<16x32xf32>
    %527 = vector.extract_strided_slice %470 {offsets = [2, 0], sizes = [1, 32], strides = [1, 1]} : vector<16x128xf32> to vector<1x32xf32>
    %528 = vector.extract_strided_slice %470 {offsets = [3, 0], sizes = [1, 32], strides = [1, 1]} : vector<16x128xf32> to vector<1x32xf32>
    %cst_125 = arith.constant dense<0.000000e+00> : vector<16xf32>
    %529 = vector.multi_reduction <add>, %526, %cst_125 [1] : vector<16x32xf32> to vector<16xf32>
    %530 = vector.shape_cast %529 : vector<16xf32> to vector<16x1xf32>
    %cst_126 = arith.constant 3.200000e+01 : f32
    %531 = vector.broadcast %cst_126 : f32 to vector<16x1xf32>
    %532 = arith.divf %530, %531 : vector<16x1xf32>
    %533 = vector.broadcast %532 : vector<16x1xf32> to vector<16x32xf32>
    %534 = arith.subf %526, %533 : vector<16x32xf32>
    %535 = arith.mulf %534, %534 : vector<16x32xf32>
    %cst_127 = arith.constant dense<0.000000e+00> : vector<16xf32>
    %536 = vector.multi_reduction <add>, %535, %cst_127 [1] : vector<16x32xf32> to vector<16xf32>
    %537 = vector.shape_cast %536 : vector<16xf32> to vector<16x1xf32>
    %cst_128 = arith.constant 3.200000e+01 : f32
    %538 = vector.broadcast %cst_128 : f32 to vector<16x1xf32>
    %539 = arith.divf %537, %538 : vector<16x1xf32>
    %540 = vector.broadcast %532 : vector<16x1xf32> to vector<16x32xf32>
    %541 = arith.subf %526, %540 : vector<16x32xf32>
    %cst_129 = arith.constant 9.99999974E-6 : f32
    %542 = vector.broadcast %cst_129 : f32 to vector<16x1xf32>
    %543 = arith.addf %539, %542 : vector<16x1xf32>
    %544 = math.rsqrt %543 : vector<16x1xf32>
    %545 = vector.broadcast %544 : vector<16x1xf32> to vector<16x32xf32>
    %546 = arith.mulf %541, %545 : vector<16x32xf32>
    %547 = vector.broadcast %527 : vector<1x32xf32> to vector<16x32xf32>
    %548 = arith.mulf %546, %547 : vector<16x32xf32>
    %549 = vector.broadcast %528 : vector<1x32xf32> to vector<16x32xf32>
    %550 = arith.addf %548, %549 : vector<16x32xf32>
    %c640 = arith.constant 640 : index
    %c0_130 = arith.constant 0 : index
    %551 = vector.load %arg6[%c640, %c0_130] : memref<856x128xf32, #tpu.memory_space<vmem>>, vector<32x96xf32>
    %552 = vector.extract_strided_slice %470 {offsets = [4, 0], sizes = [1, 96], strides = [1, 1]} : vector<16x128xf32> to vector<1x96xf32>
    %c672 = arith.constant 672 : index
    %c0_131 = arith.constant 0 : index
    %553 = vector.load %arg6[%c672, %c0_131] : memref<856x128xf32, #tpu.memory_space<vmem>>, vector<32x32xf32>
    %554 = vector.extract_strided_slice %470 {offsets = [5, 0], sizes = [1, 32], strides = [1, 1]} : vector<16x128xf32> to vector<1x32xf32>
    %555 = vector.extract_strided_slice %551 {offsets = [0, 0], sizes = [32, 32], strides = [1, 1]} : vector<32x96xf32> to vector<32x32xf32>
    %cst_132 = arith.constant dense<0.000000e+00> : vector<16x32xf32>
    %556 = tpu.matmul %550, %555, %cst_132 {dimension_numbers = #tpu.dot_dimension_numbers<[1], [0], [0], [1], [0, 0, 1, 1], [], []>} : vector<16x32xf32>, vector<32x32xf32>, vector<16x32xf32> -> vector<16x32xf32>
    %557 = vector.extract_strided_slice %552 {offsets = [0, 0], sizes = [1, 32], strides = [1, 1]} : vector<1x96xf32> to vector<1x32xf32>
    %558 = vector.broadcast %557 : vector<1x32xf32> to vector<16x32xf32>
    %559 = arith.addf %556, %558 : vector<16x32xf32>
    %560 = vector.extract_strided_slice %551 {offsets = [0, 32], sizes = [32, 64], strides = [1, 1]} : vector<32x96xf32> to vector<32x64xf32>
    %cst_133 = arith.constant dense<0.000000e+00> : vector<16x64xf32>
    %561 = tpu.matmul %264, %560, %cst_133 {dimension_numbers = #tpu.dot_dimension_numbers<[1], [0], [0], [1], [0, 0, 1, 1], [], []>} : vector<16x32xf32>, vector<32x64xf32>, vector<16x64xf32> -> vector<16x64xf32>
    %562 = vector.extract_strided_slice %552 {offsets = [0, 32], sizes = [1, 64], strides = [1, 1]} : vector<1x96xf32> to vector<1x64xf32>
    %563 = vector.broadcast %562 : vector<1x64xf32> to vector<16x64xf32>
    %564 = arith.addf %561, %563 : vector<16x64xf32>
    %565 = vector.extract_strided_slice %564 {offsets = [0, 0], sizes = [16, 32], strides = [1, 1]} : vector<16x64xf32> to vector<16x32xf32>
    %566 = vector.extract_strided_slice %564 {offsets = [0, 32], sizes = [16, 32], strides = [1, 1]} : vector<16x64xf32> to vector<16x32xf32>
    %567 = vector.extract_strided_slice %559 {offsets = [0, 0], sizes = [16, 8], strides = [1, 1]} : vector<16x32xf32> to vector<16x8xf32>
    %568 = vector.extract_strided_slice %559 {offsets = [0, 8], sizes = [16, 8], strides = [1, 1]} : vector<16x32xf32> to vector<16x8xf32>
    %569 = vector.extract_strided_slice %559 {offsets = [0, 16], sizes = [16, 8], strides = [1, 1]} : vector<16x32xf32> to vector<16x8xf32>
    %570 = vector.extract_strided_slice %559 {offsets = [0, 24], sizes = [16, 8], strides = [1, 1]} : vector<16x32xf32> to vector<16x8xf32>
    %571 = tpu.concatenate %567, %568, %569, %570 in 0 : vector<16x8xf32>, vector<16x8xf32>, vector<16x8xf32>, vector<16x8xf32> -> vector<64x8xf32>
    %572 = vector.extract_strided_slice %565 {offsets = [0, 0], sizes = [16, 8], strides = [1, 1]} : vector<16x32xf32> to vector<16x8xf32>
    %573 = vector.extract_strided_slice %565 {offsets = [0, 8], sizes = [16, 8], strides = [1, 1]} : vector<16x32xf32> to vector<16x8xf32>
    %574 = vector.extract_strided_slice %565 {offsets = [0, 16], sizes = [16, 8], strides = [1, 1]} : vector<16x32xf32> to vector<16x8xf32>
    %575 = vector.extract_strided_slice %565 {offsets = [0, 24], sizes = [16, 8], strides = [1, 1]} : vector<16x32xf32> to vector<16x8xf32>
    %576 = tpu.concatenate %572, %573, %574, %575 in 0 : vector<16x8xf32>, vector<16x8xf32>, vector<16x8xf32>, vector<16x8xf32> -> vector<64x8xf32>
    %577 = vector.extract_strided_slice %566 {offsets = [0, 0], sizes = [16, 8], strides = [1, 1]} : vector<16x32xf32> to vector<16x8xf32>
    %578 = vector.extract_strided_slice %566 {offsets = [0, 8], sizes = [16, 8], strides = [1, 1]} : vector<16x32xf32> to vector<16x8xf32>
    %579 = vector.extract_strided_slice %566 {offsets = [0, 16], sizes = [16, 8], strides = [1, 1]} : vector<16x32xf32> to vector<16x8xf32>
    %580 = vector.extract_strided_slice %566 {offsets = [0, 24], sizes = [16, 8], strides = [1, 1]} : vector<16x32xf32> to vector<16x8xf32>
    %581 = tpu.concatenate %577, %578, %579, %580 in 0 : vector<16x8xf32>, vector<16x8xf32>, vector<16x8xf32>, vector<16x8xf32> -> vector<64x8xf32>
    %cst_134 = arith.constant dense<0.000000e+00> : vector<64x64xf32>
    %582 = tpu.matmul %571, %576, %cst_134 {dimension_numbers = #tpu.dot_dimension_numbers<[1], [1], [0], [0], [0, 0, 1, 0], [], []>} : vector<64x8xf32>, vector<64x8xf32>, vector<64x64xf32> -> vector<64x64xf32>
    %583 = arith.addf %582, %2 : vector<64x64xf32>
    %cst_135 = arith.constant dense<0xFF800000> : vector<64xf32>
    %584 = vector.multi_reduction <maximumf>, %583, %cst_135 [1] : vector<64x64xf32> to vector<64xf32>
    %585 = vector.shape_cast %584 : vector<64xf32> to vector<64x1xf32>
    %586 = vector.broadcast %585 : vector<64x1xf32> to vector<64x64xf32>
    %587 = arith.subf %583, %586 : vector<64x64xf32>
    %588 = math.exp %587 : vector<64x64xf32>
    %cst_136 = arith.constant dense<0.000000e+00> : vector<64xf32>
    %589 = vector.multi_reduction <add>, %588, %cst_136 [1] : vector<64x64xf32> to vector<64xf32>
    %590 = vector.shape_cast %589 : vector<64xf32> to vector<64x1xf32>
    %591 = tpu.reciprocal %590 {approx = true} : vector<64x1xf32> -> vector<64x1xf32>
    %592 = vector.broadcast %591 : vector<64x1xf32> to vector<64x64xf32>
    %593 = arith.mulf %588, %592 : vector<64x64xf32>
    %cst_137 = arith.constant dense<0.000000e+00> : vector<64x8xf32>
    %594 = tpu.matmul %593, %581, %cst_137 {dimension_numbers = #tpu.dot_dimension_numbers<[1], [0], [0], [1], [0, 0, 1, 1], [], []>} : vector<64x64xf32>, vector<64x8xf32>, vector<64x8xf32> -> vector<64x8xf32>
    %595 = vector.extract_strided_slice %594 {offsets = [0, 0], sizes = [16, 8], strides = [1, 1]} : vector<64x8xf32> to vector<16x8xf32>
    %596 = vector.extract_strided_slice %553 {offsets = [0, 0], sizes = [8, 32], strides = [1, 1]} : vector<32x32xf32> to vector<8x32xf32>
    %cst_138 = arith.constant dense<0.000000e+00> : vector<16x32xf32>
    %597 = tpu.matmul %595, %596, %cst_138 {dimension_numbers = #tpu.dot_dimension_numbers<[1], [0], [0], [1], [0, 0, 1, 1], [], []>} : vector<16x8xf32>, vector<8x32xf32>, vector<16x32xf32> -> vector<16x32xf32>
    %598 = vector.broadcast %554 : vector<1x32xf32> to vector<16x32xf32>
    %599 = arith.addf %598, %597 : vector<16x32xf32>
    %600 = vector.extract_strided_slice %594 {offsets = [16, 0], sizes = [16, 8], strides = [1, 1]} : vector<64x8xf32> to vector<16x8xf32>
    %601 = vector.extract_strided_slice %553 {offsets = [8, 0], sizes = [8, 32], strides = [1, 1]} : vector<32x32xf32> to vector<8x32xf32>
    %cst_139 = arith.constant dense<0.000000e+00> : vector<16x32xf32>
    %602 = tpu.matmul %600, %601, %cst_139 {dimension_numbers = #tpu.dot_dimension_numbers<[1], [0], [0], [1], [0, 0, 1, 1], [], []>} : vector<16x8xf32>, vector<8x32xf32>, vector<16x32xf32> -> vector<16x32xf32>
    %603 = arith.addf %599, %602 : vector<16x32xf32>
    %604 = vector.extract_strided_slice %594 {offsets = [32, 0], sizes = [16, 8], strides = [1, 1]} : vector<64x8xf32> to vector<16x8xf32>
    %605 = vector.extract_strided_slice %553 {offsets = [16, 0], sizes = [8, 32], strides = [1, 1]} : vector<32x32xf32> to vector<8x32xf32>
    %cst_140 = arith.constant dense<0.000000e+00> : vector<16x32xf32>
    %606 = tpu.matmul %604, %605, %cst_140 {dimension_numbers = #tpu.dot_dimension_numbers<[1], [0], [0], [1], [0, 0, 1, 1], [], []>} : vector<16x8xf32>, vector<8x32xf32>, vector<16x32xf32> -> vector<16x32xf32>
    %607 = arith.addf %603, %606 : vector<16x32xf32>
    %608 = vector.extract_strided_slice %594 {offsets = [48, 0], sizes = [16, 8], strides = [1, 1]} : vector<64x8xf32> to vector<16x8xf32>
    %609 = vector.extract_strided_slice %553 {offsets = [24, 0], sizes = [8, 32], strides = [1, 1]} : vector<32x32xf32> to vector<8x32xf32>
    %cst_141 = arith.constant dense<0.000000e+00> : vector<16x32xf32>
    %610 = tpu.matmul %608, %609, %cst_141 {dimension_numbers = #tpu.dot_dimension_numbers<[1], [0], [0], [1], [0, 0, 1, 1], [], []>} : vector<16x8xf32>, vector<8x32xf32>, vector<16x32xf32> -> vector<16x32xf32>
    %611 = arith.addf %607, %610 : vector<16x32xf32>
    %612 = arith.addf %550, %611 : vector<16x32xf32>
    %613 = vector.extract_strided_slice %470 {offsets = [6, 0], sizes = [1, 32], strides = [1, 1]} : vector<16x128xf32> to vector<1x32xf32>
    %614 = vector.extract_strided_slice %470 {offsets = [7, 0], sizes = [1, 32], strides = [1, 1]} : vector<16x128xf32> to vector<1x32xf32>
    %cst_142 = arith.constant dense<0.000000e+00> : vector<16xf32>
    %615 = vector.multi_reduction <add>, %612, %cst_142 [1] : vector<16x32xf32> to vector<16xf32>
    %616 = vector.shape_cast %615 : vector<16xf32> to vector<16x1xf32>
    %cst_143 = arith.constant 3.200000e+01 : f32
    %617 = vector.broadcast %cst_143 : f32 to vector<16x1xf32>
    %618 = arith.divf %616, %617 : vector<16x1xf32>
    %619 = vector.broadcast %618 : vector<16x1xf32> to vector<16x32xf32>
    %620 = arith.subf %612, %619 : vector<16x32xf32>
    %621 = arith.mulf %620, %620 : vector<16x32xf32>
    %cst_144 = arith.constant dense<0.000000e+00> : vector<16xf32>
    %622 = vector.multi_reduction <add>, %621, %cst_144 [1] : vector<16x32xf32> to vector<16xf32>
    %623 = vector.shape_cast %622 : vector<16xf32> to vector<16x1xf32>
    %cst_145 = arith.constant 3.200000e+01 : f32
    %624 = vector.broadcast %cst_145 : f32 to vector<16x1xf32>
    %625 = arith.divf %623, %624 : vector<16x1xf32>
    %626 = vector.broadcast %618 : vector<16x1xf32> to vector<16x32xf32>
    %627 = arith.subf %612, %626 : vector<16x32xf32>
    %cst_146 = arith.constant 9.99999974E-6 : f32
    %628 = vector.broadcast %cst_146 : f32 to vector<16x1xf32>
    %629 = arith.addf %625, %628 : vector<16x1xf32>
    %630 = math.rsqrt %629 : vector<16x1xf32>
    %631 = vector.broadcast %630 : vector<16x1xf32> to vector<16x32xf32>
    %632 = arith.mulf %627, %631 : vector<16x32xf32>
    %633 = vector.broadcast %613 : vector<1x32xf32> to vector<16x32xf32>
    %634 = arith.mulf %632, %633 : vector<16x32xf32>
    %635 = vector.broadcast %614 : vector<1x32xf32> to vector<16x32xf32>
    %636 = arith.addf %634, %635 : vector<16x32xf32>
    %c704 = arith.constant 704 : index
    %c0_147 = arith.constant 0 : index
    %637 = vector.load %arg6[%c704, %c0_147] : memref<856x128xf32, #tpu.memory_space<vmem>>, vector<32x64xf32>
    %cst_148 = arith.constant dense<0.000000e+00> : vector<16x64xf32>
    %638 = tpu.matmul %636, %637, %cst_148 {dimension_numbers = #tpu.dot_dimension_numbers<[1], [0], [0], [1], [0, 0, 1, 1], [], []>} : vector<16x32xf32>, vector<32x64xf32>, vector<16x64xf32> -> vector<16x64xf32>
    %639 = vector.extract_strided_slice %470 {offsets = [8, 0], sizes = [1, 64], strides = [1, 1]} : vector<16x128xf32> to vector<1x64xf32>
    %640 = vector.broadcast %639 : vector<1x64xf32> to vector<16x64xf32>
    %641 = arith.addf %638, %640 : vector<16x64xf32>
    %cst_149 = arith.constant 0.000000e+00 : f32
    %642 = vector.broadcast %cst_149 : f32 to vector<16x64xf32>
    %643 = arith.maximumf %641, %642 : vector<16x64xf32>
    %c736 = arith.constant 736 : index
    %c0_150 = arith.constant 0 : index
    %644 = vector.load %arg6[%c736, %c0_150] : memref<856x128xf32, #tpu.memory_space<vmem>>, vector<64x32xf32>
    %cst_151 = arith.constant dense<0.000000e+00> : vector<16x32xf32>
    %645 = tpu.matmul %643, %644, %cst_151 {dimension_numbers = #tpu.dot_dimension_numbers<[1], [0], [0], [1], [0, 0, 1, 1], [], []>} : vector<16x64xf32>, vector<64x32xf32>, vector<16x32xf32> -> vector<16x32xf32>
    %646 = vector.extract_strided_slice %470 {offsets = [9, 0], sizes = [1, 32], strides = [1, 1]} : vector<16x128xf32> to vector<1x32xf32>
    %647 = vector.broadcast %646 : vector<1x32xf32> to vector<16x32xf32>
    %648 = arith.addf %645, %647 : vector<16x32xf32>
    %649 = arith.addf %636, %648 : vector<16x32xf32>
    %650 = vector.extract_strided_slice %470 {offsets = [10, 0], sizes = [1, 32], strides = [1, 1]} : vector<16x128xf32> to vector<1x32xf32>
    %651 = vector.extract_strided_slice %470 {offsets = [11, 0], sizes = [1, 32], strides = [1, 1]} : vector<16x128xf32> to vector<1x32xf32>
    %cst_152 = arith.constant dense<0.000000e+00> : vector<16xf32>
    %652 = vector.multi_reduction <add>, %649, %cst_152 [1] : vector<16x32xf32> to vector<16xf32>
    %653 = vector.shape_cast %652 : vector<16xf32> to vector<16x1xf32>
    %cst_153 = arith.constant 3.200000e+01 : f32
    %654 = vector.broadcast %cst_153 : f32 to vector<16x1xf32>
    %655 = arith.divf %653, %654 : vector<16x1xf32>
    %656 = vector.broadcast %655 : vector<16x1xf32> to vector<16x32xf32>
    %657 = arith.subf %649, %656 : vector<16x32xf32>
    %658 = arith.mulf %657, %657 : vector<16x32xf32>
    %cst_154 = arith.constant dense<0.000000e+00> : vector<16xf32>
    %659 = vector.multi_reduction <add>, %658, %cst_154 [1] : vector<16x32xf32> to vector<16xf32>
    %660 = vector.shape_cast %659 : vector<16xf32> to vector<16x1xf32>
    %cst_155 = arith.constant 3.200000e+01 : f32
    %661 = vector.broadcast %cst_155 : f32 to vector<16x1xf32>
    %662 = arith.divf %660, %661 : vector<16x1xf32>
    %663 = vector.broadcast %655 : vector<16x1xf32> to vector<16x32xf32>
    %664 = arith.subf %649, %663 : vector<16x32xf32>
    %cst_156 = arith.constant 9.99999974E-6 : f32
    %665 = vector.broadcast %cst_156 : f32 to vector<16x1xf32>
    %666 = arith.addf %662, %665 : vector<16x1xf32>
    %667 = math.rsqrt %666 : vector<16x1xf32>
    %668 = vector.broadcast %667 : vector<16x1xf32> to vector<16x32xf32>
    %669 = arith.mulf %664, %668 : vector<16x32xf32>
    %670 = vector.broadcast %650 : vector<1x32xf32> to vector<16x32xf32>
    %671 = arith.mulf %669, %670 : vector<16x32xf32>
    %672 = vector.broadcast %651 : vector<1x32xf32> to vector<16x32xf32>
    %673 = arith.addf %671, %672 : vector<16x32xf32>
    %674 = vector.extract_strided_slice %3 {offsets = [2, 0], sizes = [1, 32], strides = [1, 1]} : vector<8x128xf32> to vector<1x32xf32>
    %675 = vector.extract_strided_slice %3 {offsets = [3, 0], sizes = [1, 32], strides = [1, 1]} : vector<8x128xf32> to vector<1x32xf32>
    %cst_157 = arith.constant dense<0.000000e+00> : vector<16xf32>
    %676 = vector.multi_reduction <add>, %673, %cst_157 [1] : vector<16x32xf32> to vector<16xf32>
    %677 = vector.shape_cast %676 : vector<16xf32> to vector<16x1xf32>
    %cst_158 = arith.constant 3.200000e+01 : f32
    %678 = vector.broadcast %cst_158 : f32 to vector<16x1xf32>
    %679 = arith.divf %677, %678 : vector<16x1xf32>
    %680 = vector.broadcast %679 : vector<16x1xf32> to vector<16x32xf32>
    %681 = arith.subf %673, %680 : vector<16x32xf32>
    %682 = arith.mulf %681, %681 : vector<16x32xf32>
    %cst_159 = arith.constant dense<0.000000e+00> : vector<16xf32>
    %683 = vector.multi_reduction <add>, %682, %cst_159 [1] : vector<16x32xf32> to vector<16xf32>
    %684 = vector.shape_cast %683 : vector<16xf32> to vector<16x1xf32>
    %cst_160 = arith.constant 3.200000e+01 : f32
    %685 = vector.broadcast %cst_160 : f32 to vector<16x1xf32>
    %686 = arith.divf %684, %685 : vector<16x1xf32>
    %687 = vector.broadcast %679 : vector<16x1xf32> to vector<16x32xf32>
    %688 = arith.subf %673, %687 : vector<16x32xf32>
    %cst_161 = arith.constant 9.99999974E-6 : f32
    %689 = vector.broadcast %cst_161 : f32 to vector<16x1xf32>
    %690 = arith.addf %686, %689 : vector<16x1xf32>
    %691 = math.rsqrt %690 : vector<16x1xf32>
    %692 = vector.broadcast %691 : vector<16x1xf32> to vector<16x32xf32>
    %693 = arith.mulf %688, %692 : vector<16x32xf32>
    %694 = vector.broadcast %674 : vector<1x32xf32> to vector<16x32xf32>
    %695 = arith.mulf %693, %694 : vector<16x32xf32>
    %696 = vector.broadcast %675 : vector<1x32xf32> to vector<16x32xf32>
    %697 = arith.addf %695, %696 : vector<16x32xf32>
    %c816 = arith.constant 816 : index
    %c0_162 = arith.constant 0 : index
    %698 = vector.load %arg6[%c816, %c0_162] : memref<856x128xf32, #tpu.memory_space<vmem>>, vector<32x128xf32>
    %cst_163 = arith.constant dense<0.000000e+00> : vector<16x128xf32>
    %699 = tpu.matmul %697, %698, %cst_163 {dimension_numbers = #tpu.dot_dimension_numbers<[1], [0], [0], [1], [0, 0, 1, 1], [], []>} : vector<16x32xf32>, vector<32x128xf32>, vector<16x128xf32> -> vector<16x128xf32>
    %700 = vector.extract_strided_slice %3 {offsets = [4, 0], sizes = [1, 128], strides = [1, 1]} : vector<8x128xf32> to vector<1x128xf32>
    %701 = vector.broadcast %700 : vector<1x128xf32> to vector<16x128xf32>
    %702 = arith.addf %699, %701 : vector<16x128xf32>
    %c0_164 = arith.constant 0 : index
    %c0_165 = arith.constant 0 : index
    %703 = vector.load %arg7[%c0_164, %c0_165] : memref<16x128xf32, #tpu.memory_space<vmem>>, vector<16x128xf32>
    tpu.vector_store %arg7[%c0_164, %c0_165], %702 {strides = array<i32>} : memref<16x128xf32, #tpu.memory_space<vmem>>, vector<16x128xf32>,
    return
  }
  func.func @transform_0(%arg0: i32) -> (i32, i32) {
    %c0_i32 = arith.constant 0 : i32
    %c0_i32_0 = arith.constant 0 : i32
    %c0_i32_1 = arith.constant 0 : i32
    return %c0_i32, %c0_i32_0 : i32, i32
  }
  func.func @transform_1(%arg0: i32) -> (i32, i32) {
    %c0_i32 = arith.constant 0 : i32
    %c0_i32_0 = arith.constant 0 : i32
    %c0_i32_1 = arith.constant 0 : i32
    return %c0_i32, %c0_i32_0 : i32, i32
  }
  func.func @transform_2(%arg0: i32) -> (i32, i32) {
    %c0_i32 = arith.constant 0 : i32
    %c0_i32_0 = arith.constant 0 : i32
    %c0_i32_1 = arith.constant 0 : i32
    return %c0_i32, %c0_i32_0 : i32, i32
  }
  func.func @transform_3(%arg0: i32) -> (i32, i32) {
    %c0_i32 = arith.constant 0 : i32
    %c0_i32_0 = arith.constant 0 : i32
    %c0_i32_1 = arith.constant 0 : i32
    return %c0_i32, %c0_i32_0 : i32, i32
  }
  func.func @transform_4(%arg0: i32) -> (i32, i32) {
    %c0_i32 = arith.constant 0 : i32
    %c0_i32_0 = arith.constant 0 : i32
    %c0_i32_1 = arith.constant 0 : i32
    return %c0_i32, %c0_i32_0 : i32, i32
  }
  func.func @transform_5(%arg0: i32) -> (i32, i32) {
    %c0_i32 = arith.constant 0 : i32
    %c0_i32_0 = arith.constant 0 : i32
    %c0_i32_1 = arith.constant 0 : i32
    return %c0_i32, %c0_i32_0 : i32, i32
  }
  func.func @transform_6(%arg0: i32) -> (i32, i32) {
    %c0_i32 = arith.constant 0 : i32
    %c0_i32_0 = arith.constant 0 : i32
    %c0_i32_1 = arith.constant 0 : i32
    return %c0_i32, %c0_i32_0 : i32, i32
  }
}

</mosaic_0001>

<bundles_post_ra>
// kernel: seq2seq_forward.1
= control target key start
LH: loop header
LB: loop body
LE: loop exit
PB: predicated region body
PF: predicated region fallthrough
CT: control target
= control target key end

     0   :  { %vm60_vm0 = vcmask 261120   ;;  %s4404_s11 = smov 120   ;;  %s4406_s12 = smov 104   ;;  %vm120_vm1 = vcmask 64512   ;;  %vm194_vm2 = vcmask 523264   ;;  %s6013_s5 = inlined_call_operand.vmem [shape: f32[856,128], index: 5, kind: input, shape index: {}]   ;;  %s6014_s0 = inlined_call_operand.vmem [shape: f32[16,32], index: 0, kind: input, shape index: {}]   ;;  %s6015_s2 = inlined_call_operand.vmem [shape: f32[64,64], index: 2, kind: input, shape index: {}]   ;;  %s6016_s1 = inlined_call_operand.vmem [shape: f32[16,32], index: 1, kind: input, shape index: {}]   ;;  %s6017_s3 = inlined_call_operand.vmem [shape: f32[64,64], index: 3, kind: input, shape index: {}]   ;;  %s6018_s4 = inlined_call_operand.vmem [shape: f32[64,64], index: 4, kind: input, shape index: {}]   ;;  %s6019_s6 = inlined_call_operand.vmem [shape: f32[16,128], index: 6, kind: output, shape index: {}]  }
   0x1   :  { %v54_v0 = vld [vmem:[%s6013_s5 + $0x18] sm:$0xff]  ;;  %v53_v1 = vld [vmem:[%s6013_s5 + $0x10] sm:$0xff]  ;;  %v52_v2 = vld [vmem:[%s6013_s5 + $0x8] sm:$0xff]  ;;  %s4407_s13 = smov 96   ;;  %s4408_s24 = smov 64  }
   0x2   :  { %79 = vmatpush.msra.mxu0 %v54_v0  ;;  %v51_v3 = vld [vmem:[%s6013_s5] sm:$0xff]  ;;  %v4467_v5 = vld [vmem:[%s6014_s0 + $0x8] sm:$0xff]  ;;  %v4558_v34 = vld [vmem:[%s6015_s2 + $0x10] sm:$0xff] }
   0x3   :  { %v4460_v4 = vld [vmem:[%s6014_s0] sm:$0xff]  ;;  %s4405_s0 = smov 112   ;;  %v4551_v30 = vld [vmem:[%s6015_s2 + $0x8] sm:$0xff]  ;;  %v4568_v38 = vld [vmem:[%s6015_s2 + $0x18] sm:$0xff] }
   0x4   :  { %80 = vmatpush.msra.mxu0 %v53_v1  ;;  %v4474_v7 = vld [vmem:[%s6013_s5 + $0xa0] sm:$0xff]  ;;  %v4587_v49 = vld [vmem:[%s6015_s2 + $0x30] sm:$0xff]  ;;  %v4594_v53 = vld [vmem:[%s6015_s2 + $0x28] sm:$0xff] }
   0x5   :  { %v59_v8 = vperm.slane %v4474_v7, 0  ;;  %v4544_v26 = vld [vmem:[%s6015_s2] sm:$0xff]  ;;  %v4604_v56 = vld [vmem:[%s6015_s2 + $0x38] sm:$0xff] }
   0x6   :  { %81 = vmatpush.msra.mxu0 %v52_v2  ;;  %v4575_v42 = vld [vmem:[%s6015_s2 + $0x20] sm:$0xff] }
   0x8   :  { %82 = vmatpush.msra.mxu0 %v51_v3 }
   0x9   :  { %3770 = vmatmul.msk.f32.vlgmr.msra.gmra.mxu0 %vm60_vm0, %v4460_v4 }
  0x11   :  { %3771 = vmatmul.msk.f32.gmra.mxu0 %vm60_vm0, %v4467_v5 }
  0x86   :  { %v84_v6 = vpop.f32.mrf.mxu0 }
  0x87   :  { %v4485_v11 = vadd.f32 %v84_v6, %v59_v8 }
  0x8e   :  { %v87_v9 = vpop.f32.mrf.mxu0 }
  0x8f   :  { %v4477_v10 = vadd.f32 %v87_v9, %v59_v8 }
  0x91   :  { %94 = vrot.lane.b32.xlu2 %v4477_v10, %s4404_s11  ;;  %98 = vrot.lane.b32.xlu1 %v4477_v10, %s4405_s0  ;;  %v4017_v60 = vpack.i.bf16 %v4485_v11, %v4477_v10 }
  0x92   :  { %102 = vrot.lane.b32.xlu0 %v4477_v10, %s4406_s12 }
  0x99   :  { %92 = vrot.lane.b32.xlu2 %v4485_v11, %s4404_s11  ;;  %96 = vrot.lane.b32.xlu1 %v4485_v11, %s4405_s0 }
  0x9a   :  { %100 = vrot.lane.b32.xlu0 %v4485_v11, %s4406_s12 }
  0xeb   :  { %v4493_v12 = vpop.permute.xlu2 %94 }
  0xf3   :  { %v4503_v15 = vpop.permute.xlu2 %92 }
 0x103   :  { %v4495_v13 = vpop.permute.xlu1 %98 }
 0x104   :  { %v4497_v14 = vpop.permute.xlu0 %102  ;;  %114 = vrot.lane.b32.xlu2 %v4495_v13, %s4407_s13 }
 0x105   :  { %118 = vrot.lane.b32.xlu0 %v4497_v14, %s4407_s13 }
 0x10b   :  { %v97_v16 = vpop.permute.xlu1 %96 }
 0x10c   :  { %v4505_v17 = vpop.permute.xlu0 %100  ;;  %108 = vrot.lane.b32.xlu2 %v4503_v15, %s4407_s13  ;;  %v4007_v43 = vpack.i.bf16 %v97_v16, %v4495_v13 }
 0x10d   :  { %112 = vrot.lane.b32.xlu0 %v97_v16, %s4407_s13  ;;  %116 = vrot.lane.b32.xlu1 %v4505_v17, %s4407_s13  ;;  %v4002_v48 = vpack.i.bf16 %v4505_v17, %v4497_v14 }
 0x115   :  { %106 = vrot.lane.b32.xlu0 %v4477_v10, %s4407_s13  ;;  %110 = vrot.lane.b32.xlu1 %v4493_v12, %s4407_s13 }
 0x11d   :  { %104 = vrot.lane.b32.xlu1 %v4485_v11, %s4407_s13 }
 0x15e   :  { %v115_v20 = vpop.permute.xlu2 %114 }
 0x166   :  { %v109_v23 = vpop.permute.xlu2 %108 }
 0x177   :  { %v119_v18 = vpop.permute.xlu0 %118 }
 0x178   :  { %3772 = vmatpush.xpose.msk.msra.mxu1 %vm120_vm1, %v119_v18 }
 0x17f   :  { %v117_v19 = vpop.permute.xlu1 %116  ;;  %v113_v21 = vpop.permute.xlu0 %112 }
 0x180   :  { %3773 = vmatpush.xpose.msk.msra.mxu1 %vm120_vm1, %v117_v19 }
 0x184   :  { %3774 = vmatpush.xpose.msk.msra.mxu1 %vm120_vm1, %v115_v20  ;;  %v4012_v20 = vpack.i.bf16 %v4503_v15, %v4493_v12 }
 0x187   :  { %v111_v22 = vpop.permute.xlu1 %110  ;;  %v107_v24 = vpop.permute.xlu0 %106 }
 0x188   :  { %3775 = vmatpush.xpose.msk.msra.mxu1 %vm120_vm1, %v113_v21 }
 0x18c   :  { %3776 = vmatpush.xpose.msk.msra.mxu1 %vm120_vm1, %v111_v22 }
 0x18f   :  { %v105_v25 = vpop.permute.xlu1 %104 }
 0x190   :  { %3777 = vmatpush.xpose.msk.msra.mxu1 %vm120_vm1, %v109_v23 }
 0x194   :  { %3778 = vmatpush.xpose.msk.msra.mxu1 %vm120_vm1, %v107_v24 }
 0x198   :  { %3779 = vmatpush.xpose.msk.msra.mxu1 %vm120_vm1, %v105_v25 }
 0x19b   :  { %3780 = vmatmul.msk.f32.vlgmr.msra.gmra.mxu1 %vm120_vm1, %v4485_v11 }
 0x1a3   :  { %3781 = vmatmul.msk.f32.gmra.mxu1 %vm120_vm1, %v4477_v10 }
 0x1ab   :  { %3782 = vmatmul.msk.f32.gmra.mxu1 %vm120_vm1, %v4503_v15 }
 0x1b3   :  { %3783 = vmatmul.msk.f32.gmra.mxu1 %vm120_vm1, %v4493_v12 }
 0x1bb   :  { %3784 = vmatmul.msk.f32.gmra.mxu1 %vm120_vm1, %v97_v16 }
 0x1c3   :  { %3785 = vmatmul.msk.f32.gmra.mxu1 %vm120_vm1, %v4495_v13 }
 0x1cb   :  { %3786 = vmatmul.msk.f32.gmra.mxu1 %vm120_vm1, %v4505_v17 }
 0x1d3   :  { %3787 = vmatmul.msk.f32.gmra.mxu1 %vm120_vm1, %v4497_v14 }
 0x218   :  { %v170_v27 = vpop.f32.mrf.mxu1 }
 0x219   :  { %v171_v28 = vadd.f32 %v170_v27, %v4544_v26 }
 0x21b   :  { %v195_v29 = vsel %vm194_vm2, %v171_v28, -inf }
 0x21c   :  { %196 = vmax.xlane.f32.xlu2 %v195_v29 }
 0x220   :  { %v173_v31 = vpop.f32.mrf.mxu1 }
 0x221   :  { %v174_v32 = vadd.f32 %v173_v31, %v4551_v30 }
 0x223   :  { %v198_v33 = vsel %vm194_vm2, %v174_v32, -inf }
 0x224   :  { %199 = vmax.xlane.f32.xlu0 %v198_v33 }
 0x228   :  { %v176_v35 = vpop.f32.mrf.mxu1 }
 0x229   :  { %v4561_v36 = vadd.f32 %v176_v35, %v4558_v34 }
 0x22b   :  { %v201_v37 = vsel %vm194_vm2, %v4561_v36, -inf }
 0x22c   :  { %202 = vmax.xlane.f32.xlu1 %v201_v37 }
 0x230   :  { %v179_v39 = vpop.f32.mrf.mxu1 }
 0x231   :  { %v180_v40 = vadd.f32 %v179_v39, %v4568_v38 }
 0x233   :  { %v204_v41 = vsel %vm194_vm2, %v180_v40, -inf }
 0x234   :  { %205 = vmax.xlane.f32.xlu2 %v204_v41 }
 0x238   :  { %v182_v44 = vpop.f32.mrf.mxu1  ;;  %4008 = vrot.lane.b32.xlu0 %v4007_v43, %s4408_s24 }
 0x239   :  { %v183_v45 = vadd.f32 %v182_v44, %v4575_v42 }
 0x23b   :  { %v207_v46 = vsel %vm194_vm2, %v183_v45, -inf }
 0x23c   :  { %208 = vmax.xlane.f32.xlu2 %v207_v46 }
 0x240   :  { %v185_v47 = vpop.f32.mrf.mxu1 }
 0x241   :  { %v4597_v54 = vadd.f32 %v185_v47, %v4594_v53 }
 0x243   :  { %v210_v55 = vsel %vm194_vm2, %v4597_v54, -inf }
 0x245   :  { %4003 = vrot.lane.b32.xlu1 %v4002_v48, %s4408_s24 }
 0x248   :  { %v188_v50 = vpop.f32.mrf.mxu1 }
 0x249   :  { %v189_v51 = vadd.f32 %v188_v50, %v4587_v49 }
 0x24b   :  { %v213_v52 = vsel %vm194_vm2, %v189_v51, -inf }
 0x24c   :  { %214 = vmax.xlane.f32.xlu2 %v213_v52 }
 0x250   :  { %v191_v57 = vpop.f32.mrf.mxu1 }
 0x251   :  { %v4607_v58 = vadd.f32 %v191_v57, %v4604_v56 }
 0x253   :  { %v216_v59 = vsel %vm194_vm2, %v4607_v58, -inf }
 0x262   :  { %211 = vmax.xlane.f32.xlu0 %v210_v55 }
 0x26f   :  { %217 = vmax.xlane.f32.xlu1 %v216_v59 }
 0x276   :  { %4018 = vrot.lane.b32.xlu0 %v4017_v60, %s4408_s24 }
 0x28f   :  { %v197_v61 = vpop.xlane.xlu2 %196 }
 0x290   :  { %v219_v62 = vsub.f32 %v171_v28, %v197_v61 }
 0x292   :  { %v227_v63 = vmul.f32 1.442695, %v219_v62 }
 0x294   :  { %4142 = vpow2.f32 %v227_v63 }
 0x297   :  { %v200_v0 = vpop.xlane.xlu0 %199 }
 0x298   :  { %v220_v1 = vsub.f32 %v174_v32, %v200_v0 }
 0x29a   :  { %v4614_v2 = vpop.eup %4142  ;;  %v229_v3 = vmul.f32 1.442695, %v220_v1 }
 0x29b   :  { %v243_v6 = vsel %vm194_vm2, %v4614_v2, 0.0 }
 0x29c   :  { %4144 = vpow2.f32 %v229_v3  ;;  %244 = vadd.xlane.f32.xlu2 %v243_v6 }
 0x29f   :  { %v203_v14 = vpop.xlane.xlu1 %202 }
 0x2a0   :  { %v221_v35 = vsub.f32 %v4561_v36, %v203_v14 }
 0x2a2   :  { %v4618_v8 = vpop.eup %4144  ;;  %v231_v39 = vmul.f32 1.442695, %v221_v35 }
 0x2a3   :  { %v246_v9 = vsel %vm194_vm2, %v4618_v8, 0.0 }
 0x2a4   :  { %247 = vadd.xlane.f32.xlu0 %v246_v9 }
 0x2a7   :  { %v206_v10 = vpop.xlane.xlu2 %205 }
 0x2a8   :  { %v222_v11 = vsub.f32 %v180_v40, %v206_v10 }
 0x2aa   :  { %v233_v13 = vmul.f32 1.442695, %v222_v11  ;;  %v4009_v24 = vpop.permute.xlu0 %4008 }
 0x2ab   :  { %v4010_v12 = vunpack.i.l.bf16 %v4009_v24  ;;  %v4011_v15 = vunpack.i.h.bf16 %v4009_v24 }
 0x2ac   :  { %4146 = vpow2.f32 %v233_v13 }
 0x2af   :  { %v209_v16 = vpop.xlane.xlu2 %208 }
 0x2b0   :  { %v223_v17 = vsub.f32 %v183_v45, %v209_v16 }
 0x2b2   :  { %v4622_v18 = vpop.eup %4146  ;;  %v235_v19 = vmul.f32 1.442695, %v223_v17 }
 0x2b3   :  { %v252_v21 = vsel %vm194_vm2, %v4622_v18, 0.0 }
 0x2b4   :  { %4148 = vpow2.f32 %v235_v19  ;;  %4013 = vrot.lane.b32.xlu2 %v4012_v20, %s4408_s24  ;;  %253 = vadd.xlane.f32.xlu1 %v252_v21 }
 0x2b7   :  { %v4004_v22 = vpop.permute.xlu1 %4003 }
 0x2b8   :  { %v4005_v23 = vunpack.i.l.bf16 %v4004_v22  ;;  %v4006_v27 = vunpack.i.h.bf16 %v4004_v22 }
 0x2ba   :  { %v4629_v25 = vpop.eup %4148  ;;  %339 = vmatpush.msra.mxu2 %v4005_v23 }
 0x2bb   :  { %v255_v28 = vsel %vm194_vm2, %v4629_v25, 0.0 }
 0x2bc   :  { %340 = vmatpush.msra.mxu2 %v4006_v27  ;;  %256 = vadd.xlane.f32.xlu1 %v255_v28 }
 0x2be   :  { %341 = vmatpush.msra.mxu2 %v4010_v12 }
 0x2bf   :  { %v215_v29 = vpop.xlane.xlu2 %214 }
 0x2c0   :  { %v225_v31 = vsub.f32 %v189_v51, %v215_v29  ;;  %342 = vmatpush.msra.mxu2 %v4011_v15  ;;  %v56_v15 = vld [vmem:[%s6013_s5 + $0x28] sm:$0xff]  ;;  %v57_v29 = vld [vmem:[%s6013_s5 + $0x30] sm:$0xff] }
 0x2c1   :  { %456 = vmatpush.msrb.mxu0 %v57_v29  ;;  %v597_v29 = vld [vmem:[%s6013_s5 + $0x88] sm:$0xff] }
 0x2c2   :  { %v239_v32 = vmul.f32 1.442695, %v225_v31  ;;  %v58_v31 = vld [vmem:[%s6013_s5 + $0x38] sm:$0xff] }
 0x2c4   :  { %4150 = vpow2.f32 %v239_v32 }
 0x2c5   :  { %4152 = vpow2.f32 %v231_v39 }
 0x2ca   :  { %v4633_v33 = vpop.eup %4150 }
 0x2cb   :  { %v261_v37 = vsel %vm194_vm2, %v4633_v33, 0.0  ;;  %v4153_v44 = vpop.eup %4152 }
 0x2cc   :  { %262 = vadd.xlane.f32.xlu1 %v261_v37  ;;  %v249_v45 = vsel %vm194_vm2, %v4153_v44, 0.0 }
 0x2d5   :  { %v212_v40 = vpop.xlane.xlu0 %211 }
 0x2d6   :  { %v224_v41 = vsub.f32 %v4597_v54, %v212_v40 }
 0x2d8   :  { %v237_v43 = vmul.f32 1.442695, %v224_v41 }
 0x2da   :  { %4154 = vpow2.f32 %v237_v43 }
 0x2dd   :  { %250 = vadd.xlane.f32.xlu2 %v249_v45  ;;  %v401_v45 = vperm.slane %v4474_v7, 1 }
 0x2e0   :  { %v4155_v46 = vpop.eup %4154 }
 0x2e1   :  { %v258_v47 = vsel %vm194_vm2, %v4155_v46, 0.0 }
 0x2e2   :  { %v218_v48 = vpop.xlane.xlu1 %217  ;;  %259 = vadd.xlane.f32.xlu0 %v258_v47 }
 0x2e3   :  { %v226_v36 = vsub.f32 %v4607_v58, %v218_v48 }
 0x2e5   :  { %v241_v50 = vmul.f32 1.442695, %v226_v36 }
 0x2e7   :  { %4156 = vpow2.f32 %v241_v50 }
 0x2e8   :  { %v4019_v55 = vpop.permute.xlu0 %4018 }
 0x2e9   :  { %v4020_v63 = vunpack.i.l.bf16 %v4019_v55  ;;  %v4021_v58 = vunpack.i.h.bf16 %v4019_v55 }
 0x2ed   :  { %v4157_v51 = vpop.eup %4156 }
 0x2ee   :  { %v264_v52 = vsel %vm194_vm2, %v4157_v51, 0.0 }
 0x2ef   :  { %265 = vadd.xlane.f32.xlu0 %v264_v52 }
 0x30f   :  { %v245_v54 = vpop.xlane.xlu2 %244 }
 0x310   :  { %4158 = vrcp.f32 %v245_v54 }
 0x316   :  { %v4159_v62 = vpop.eup %4158 }
 0x317   :  { %v4014_v57 = vpop.permute.xlu2 %4013  ;;  %v248_v61 = vpop.xlane.xlu0 %247  ;;  %v275_v0 = vmul.f32 %v4159_v62, %v4614_v2 }
 0x318   :  { %v4015_v59 = vunpack.i.l.bf16 %v4014_v57  ;;  %v4016_v60 = vunpack.i.h.bf16 %v4014_v57  ;;  %4160 = vrcp.f32 %v248_v61 }
 0x31a   :  { %343 = vmatpush.msra.mxu2 %v4015_v59 }
 0x31c   :  { %344 = vmatpush.msra.mxu2 %v4016_v60 }
 0x31e   :  { %345 = vmatpush.msra.mxu2 %v4020_v63  ;;  %v4161_v1 = vpop.eup %4160 }
 0x31f   :  { %v276_v3 = vmul.f32 %v4161_v1, %v4618_v8  ;;  %v4409_v1 = vmov 32.0  }
 0x320   :  { %346 = vmatpush.msra.mxu2 %v4021_v58 }
 0x321   :  { %3788 = vmatmul.msk.f32.vlgmr.msra.gmra.mxu2 %vm194_vm2, %v275_v0 }
 0x327   :  { %v254_v9 = vpop.xlane.xlu1 %253 }
 0x329   :  { %3789 = vmatmul.msk.f32.gmra.mxu2 %vm194_vm2, %v276_v3 }
 0x32f   :  { %v257_v13 = vpop.xlane.xlu1 %256 }
 0x33f   :  { %v263_v19 = vpop.xlane.xlu1 %262 }
 0x350   :  { %v251_v6 = vpop.xlane.xlu2 %250 }
 0x351   :  { %4162 = vrcp.f32 %v251_v6 }
 0x352   :  { %4164 = vrcp.f32 %v254_v9 }
 0x353   :  { %4166 = vrcp.f32 %v257_v13 }
 0x355   :  { %v260_v16 = vpop.xlane.xlu0 %259 }
 0x356   :  { %4168 = vrcp.f32 %v260_v16 }
 0x357   :  { %v4163_v10 = vpop.eup %4162  ;;  %4170 = vrcp.f32 %v263_v19 }
 0x358   :  { %v277_v11 = vmul.f32 %v4163_v10, %v4153_v44  ;;  %v4165_v14 = vpop.eup %4164 }
 0x359   :  { %v278_v2 = vmul.f32 %v4165_v14, %v4622_v18  ;;  %v4167_v17 = vpop.eup %4166 }
 0x35a   :  { %3790 = vmatmul.msk.f32.gmra.mxu2 %vm194_vm2, %v277_v11  ;;  %v279_v8 = vmul.f32 %v4167_v17, %v4629_v25  ;;  %v55_v25 = vld [vmem:[%s6013_s5 + $0x20] sm:$0xff] }
 0x35b   :  { %393 = vmatpush.msra.mxu3 %v55_v25 }
 0x35c   :  { %v4169_v20 = vpop.eup %4168 }
 0x35d   :  { %v280_v21 = vmul.f32 %v4169_v20, %v4155_v46  ;;  %v4171_v23 = vpop.eup %4170  ;;  %425 = vmatpush.msrb.mxu3 %v56_v15  ;;  %v598_v15 = vld [vmem:[%s6013_s5 + $0x90] sm:$0xff] }
 0x35e   :  { %v281_v18 = vmul.f32 %v4171_v23, %v4633_v33  ;;  %v558_v23 = vld [vmem:[%s6013_s5 + $0x50] sm:$0xff] }
 0x362   :  { %3791 = vmatmul.msk.f32.gmra.mxu2 %vm194_vm2, %v278_v2  ;;  %v266_v22 = vpop.xlane.xlu0 %265 }
 0x363   :  { %4172 = vrcp.f32 %v266_v22  ;;  %v559_v22 = vld [vmem:[%s6013_s5 + $0x58] sm:$0xff] }
 0x364   :  { %4174 = vrcp.f32 %v4409_v1  ;;  %579 = vmatpush.msra.mxu0 %v559_v22  ;;  %v593_v1 = vld [vmem:[%s6013_s5 + $0x68] sm:$0xff] }
 0x366   :  { %580 = vmatpush.msra.mxu0 %v558_v23 }
 0x369   :  { %v4173_v24 = vpop.eup %4172 }
 0x36a   :  { %3792 = vmatmul.msk.f32.gmra.mxu2 %vm194_vm2, %v279_v8  ;;  %v282_v27 = vmul.f32 %v4173_v24, %v4157_v51  ;;  %v4175_v3 = vpop.eup %4174  ;;  %v556_v24 = vld [vmem:[%s6013_s5 + $0x40] sm:$0xff] }
 0x36b   :  { %v506_v6 = vmul.f32 32.0, %v4175_v3  ;;  %vm510_vm3 = vweird.f32 %v4175_v3 }
 0x36d   :  { %v507_v9 = vsub.f32 1.0, %v506_v6  ;;  %v560_v6 = vperm.slane %v4474_v7, 4 }
 0x36f   :  { %v508_v10 = vmul.f32 %v4175_v3, %v507_v9 }
 0x372   :  { %3793 = vmatmul.msk.f32.gmra.mxu2 %vm194_vm2, %v280_v21 }
 0x37a   :  { %3794 = vmatmul.msk.f32.gmra.mxu2 %vm194_vm2, %v281_v18  ;;  %v557_v18 = vld [vmem:[%s6013_s5 + $0x48] sm:$0xff] }
 0x37b   :  { %581 = vmatpush.msra.mxu0 %v557_v18 }
 0x37d   :  { %582 = vmatpush.msra.mxu0 %v556_v24 }
 0x382   :  { %3795 = vmatmul.msk.f32.gmra.mxu2 %vm194_vm2, %v282_v27 }
 0x3a4   :  { %v348_v28 = vpop.f32.mrf.mxu2 }
 0x3a5   :  { %3796 = vmatmul.msk.f32.vlgmr.msra.gmra.mxu3 %vm120_vm1, %v348_v28 }
 0x3a6   :  { %487 = vmatpush.msra.mxu3 %v58_v31 }
 0x3ac   :  { %v351_v12 = vpop.f32.mrf.mxu2 }
 0x3ad   :  { %3797 = vmatmul.msk.f32.gmra.mxu3 %vm120_vm1, %v351_v12  ;;  %v599_v12 = vld [vmem:[%s6013_s5 + $0x98] sm:$0xff] }
 0x3dd   :  { %v354_v32 = vpop.f32.mrf.mxu2 }
 0x3de   :  { %3798 = vmatmul.msk.f32.vlgmr.msrb.gmra.mxu3 %vm120_vm1, %v354_v32 }
 0x3df   :  { %615 = vmatpush.msrb.mxu3 %v599_v12 }
 0x3e1   :  { %616 = vmatpush.msrb.mxu3 %v598_v15 }
 0x3e3   :  { %617 = vmatpush.msrb.mxu3 %v597_v29 }
 0x3e5   :  { %v357_v33 = vpop.f32.mrf.mxu2 }
 0x3e6   :  { %3799 = vmatmul.msk.f32.gmra.mxu3 %vm120_vm1, %v357_v33  ;;  %v596_v33 = vld [vmem:[%s6013_s5 + $0x80] sm:$0xff] }
 0x3e7   :  { %618 = vmatpush.msrb.mxu3 %v596_v33  ;;  %v686_v33 = vld [vmem:[%s6013_s5 + $0xc0] sm:$0xff] }
 0x3ed   :  { %v360_v35 = vpop.f32.mrf.mxu2 }
 0x3ee   :  { %3800 = vmatmul.msk.f32.vlgmr.msrb.gmra.mxu0 %vm120_vm1, %v360_v35 }
 0x3ef   :  { %710 = vmatpush.msrb.mxu0 %v686_v33 }
 0x3f5   :  { %v363_v37 = vpop.f32.mrf.mxu2 }
 0x3f6   :  { %3801 = vmatmul.msk.f32.gmra.mxu0 %vm120_vm1, %v363_v37 }
 0x3fd   :  { %v366_v39 = vpop.f32.mrf.mxu2 }
 0x3fe   :  { %3802 = vmatmul.msk.f32.vlgmr.msra.gmra.mxu3 %vm120_vm1, %v366_v39  ;;  %v595_v39 = vld [vmem:[%s6013_s5 + $0x78] sm:$0xff] }
 0x3ff   :  { %619 = vmatpush.msrb.mxu3 %v595_v39  ;;  %v683_v39 = vld [vmem:[%s6013_s5 + $0xa8] sm:$0xff] }
 0x405   :  { %v369_v40 = vpop.f32.mrf.mxu2 }
 0x406   :  { %3803 = vmatmul.msk.f32.gmra.mxu3 %vm120_vm1, %v369_v40 }
 0x428   :  { %v395_v41 = vpop.f32.mrf.mxu3 }
 0x429   :  { %v402_v48 = vadd.f32 %v401_v45, %v395_v41 }
 0x430   :  { %v398_v43 = vpop.f32.mrf.mxu3 }
 0x431   :  { %v403_v54 = vadd.f32 %v401_v45, %v398_v43 }
 0x461   :  { %v427_v44 = vpop.f32.mrf.mxu3 }
 0x462   :  { %v433_v36 = vadd.f32 %v427_v44, %v402_v48  ;;  %v550_v48 = vperm.slane %v4474_v7, 2 }
 0x469   :  { %v430_v46 = vpop.f32.mrf.mxu3 }
 0x46a   :  { %v434_v59 = vadd.f32 %v430_v46, %v403_v54 }
 0x46b   :  { %v458_v47 = vpop.f32.mrf.mxu0 }
 0x46c   :  { %v464_v50 = vadd.f32 %v458_v47, %v433_v36 }
 0x473   :  { %v461_v57 = vpop.f32.mrf.mxu0 }
 0x474   :  { %v465_v61 = vadd.f32 %v461_v57, %v434_v59 }
 0x481   :  { %v489_v51 = vpop.f32.mrf.mxu3 }
 0x482   :  { %v495_v52 = vadd.f32 %v489_v51, %v464_v50 }
 0x484   :  { %v497_v55 = vadd.f32 %v495_v52, %v4460_v4  ;;  %v509_v4 = vadd.f32 %v4175_v3, %v508_v10  ;;  %v553_v52 = vperm.slane %v4474_v7, 3 }
 0x486   :  { %v499_v60 = vsel %vm60_vm0, %v497_v55, 0.0  ;;  %v4681_v11 = vsel %vm510_vm3, %v4175_v3, %v509_v4  ;;  %v592_v3 = vld [vmem:[%s6013_s5 + $0x60] sm:$0xff] }
 0x487   :  { %500 = vadd.xlane.f32.xlu2 %v499_v60 }
 0x489   :  { %v492_v62 = vpop.f32.mrf.mxu3 }
 0x48a   :  { %v496_v63 = vadd.f32 %v492_v62, %v465_v61 }
 0x48c   :  { %v498_v58 = vadd.f32 %v496_v63, %v4467_v5 }
 0x48e   :  { %v502_v0 = vsel %vm60_vm0, %v498_v58, 0.0 }
 0x48f   :  { %503 = vadd.xlane.f32.xlu1 %v502_v0  ;;  %v594_v0 = vld [vmem:[%s6013_s5 + $0x70] sm:$0xff] }
 0x490   :  { %620 = vmatpush.msrb.mxu3 %v594_v0 }
 0x492   :  { %621 = vmatpush.msrb.mxu3 %v593_v1 }
 0x494   :  { %622 = vmatpush.msrb.mxu3 %v592_v3 }
 0x4fa   :  { %v501_v13 = vpop.xlane.xlu2 %500 }
 0x4fb   :  { %v512_v14 = vmul.f32 %v4681_v11, %v501_v13 }
 0x4fd   :  { %v514_v2 = vsub.f32 %v497_v55, %v512_v14 }
 0x4ff   :  { %v516_v16 = vmul.f32 %v514_v2, %v514_v2 }
 0x501   :  { %v518_v5 = vsel %vm60_vm0, %v516_v16, 0.0  ;;  %v600_v16 = vperm.slane %v4474_v7, 5 }
 0x502   :  { %519 = vadd.xlane.f32.xlu0 %v518_v5  ;;  %v504_v17 = vpop.xlane.xlu1 %503 }
 0x503   :  { %v513_v8 = vmul.f32 %v4681_v11, %v504_v17 }
 0x505   :  { %v515_v19 = vsub.f32 %v498_v58, %v513_v8 }
 0x507   :  { %v517_v20 = vmul.f32 %v515_v19, %v515_v19 }
 0x509   :  { %v521_v21 = vsel %vm60_vm0, %v517_v20, 0.0 }
 0x50a   :  { %522 = vadd.xlane.f32.xlu2 %v521_v21 }
 0x575   :  { %v520_v27 = vpop.xlane.xlu0 %519 }
 0x576   :  { %v524_v25 = vmul.f32 %v520_v27, %v4681_v11 }
 0x578   :  { %v526_v28 = vadd.f32 1e-05, %v524_v25 }
 0x57a   :  { %4176 = vrsqrt.f32 %v526_v28  ;;  %vm534_vm5 = vweird.f32 %v526_v28 }
 0x57d   :  { %v523_v31 = vpop.xlane.xlu2 %522 }
 0x57e   :  { %v525_v32 = vmul.f32 %v523_v31, %v4681_v11 }
 0x580   :  { %v4177_v35 = vpop.eup %4176  ;;  %v527_v37 = vadd.f32 1e-05, %v525_v32 }
 0x581   :  { %v529_v40 = vmul.f32 %v4177_v35, %v526_v28  ;;  %vm535_vm4 = vweird.f32 %v4177_v35 }
 0x582   :  { %4178 = vrsqrt.f32 %v527_v37  ;;  %vm536_vm6 = vmor %vm534_vm5, %vm535_vm4  ;;  %vm544_vm8 = vweird.f32 %v527_v37 }
 0x583   :  { %v530_v41 = vmul.f32 %v4177_v35, %v529_v40 }
 0x585   :  { %v531_v43 = vmul.f32 0.5, %v530_v41 }
 0x587   :  { %v532_v44 = vsub.f32 1.5, %v531_v43 }
 0x588   :  { %v4179_v45 = vpop.eup %4178 }
 0x589   :  { %v533_v46 = vmul.f32 %v4177_v35, %v532_v44  ;;  %v539_v47 = vmul.f32 %v4179_v45, %v527_v37  ;;  %vm545_vm7 = vweird.f32 %v4179_v45  ;;  %v684_v37 = vld [vmem:[%s6013_s5 + $0xb0] sm:$0xff] }
 0x58a   :  { %vm546_vm9 = vmor %vm544_vm8, %vm545_vm7 }
 0x58b   :  { %v537_v36 = vsel %vm536_vm6, %v4177_v35, %v533_v46  ;;  %v540_v50 = vmul.f32 %v4179_v45, %v539_v47  ;;  %v685_v35 = vld [vmem:[%s6013_s5 + $0xb8] sm:$0xff] }
 0x58c   :  { %v548_v51 = vmul.f32 %v537_v36, %v514_v2  ;;  %711 = vmatpush.msrb.mxu0 %v685_v35 }
 0x58d   :  { %v541_v54 = vmul.f32 0.5, %v540_v50 }
 0x58e   :  { %v551_v55 = vmul.f32 %v550_v48, %v548_v51  ;;  %712 = vmatpush.msrb.mxu0 %v684_v37 }
 0x58f   :  { %v542_v57 = vsub.f32 1.5, %v541_v54 }
 0x590   :  { %v554_v59 = vadd.f32 %v553_v52, %v551_v55  ;;  %713 = vmatpush.msrb.mxu0 %v683_v39 }
 0x591   :  { %v543_v60 = vmul.f32 %v4179_v45, %v542_v57  ;;  %v676_v57 = vperm.slane %v4474_v7, 6 }
 0x592   :  { %3804 = vmatmul.msk.f32.vlgmr.msra.gmra.mxu0 %vm60_vm0, %v554_v59 }
 0x593   :  { %v547_v61 = vsel %vm546_vm9, %v4179_v45, %v543_v60 }
 0x594   :  { %v549_v62 = vmul.f32 %v547_v61, %v515_v19 }
 0x596   :  { %v552_v63 = vmul.f32 %v550_v48, %v549_v62  ;;  %v679_v62 = vperm.slane %v4474_v7, 7  ;;  %v4766_v7 = vld [vmem:[%s6013_s5 + $0x148] sm:$0xff] }
 0x598   :  { %v555_v58 = vadd.f32 %v553_v52, %v552_v63 }
 0x59a   :  { %3805 = vmatmul.msk.f32.gmra.mxu0 %vm60_vm0, %v555_v58 }
 0x60f   :  { %v584_v9 = vpop.f32.mrf.mxu0 }
 0x610   :  { %v585_v10 = vadd.f32 %v584_v9, %v560_v6 }
 0x612   :  { %v590_v4 = vmax.f32 %v585_v10, 0.0 }
 0x614   :  { %3806 = vmatmul.msk.f32.vlgmr.msrb.gmra.mxu3 %vm194_vm2, %v590_v4 }
 0x617   :  { %v587_v13 = vpop.f32.mrf.mxu0 }
 0x618   :  { %v588_v14 = vadd.f32 %v587_v13, %v560_v6  ;;  %v691_v13 = vperm.slane %v4766_v7, 0 }
 0x61a   :  { %v591_v2 = vmax.f32 %v588_v14, 0.0 }
 0x61c   :  { %3807 = vmatmul.msk.f32.gmra.mxu3 %vm194_vm2, %v591_v2 }
 0x697   :  { %v624_v5 = vpop.f32.mrf.mxu3 }
 0x698   :  { %v625_v17 = vadd.f32 %v624_v5, %v600_v16 }
 0x69a   :  { %v630_v8 = vadd.f32 %v625_v17, %v554_v59 }
 0x69c   :  { %v632_v19 = vsel %vm60_vm0, %v630_v8, 0.0 }
 0x69d   :  { %633 = vadd.xlane.f32.xlu1 %v632_v19 }
 0x69f   :  { %v627_v20 = vpop.f32.mrf.mxu3 }
 0x6a0   :  { %v628_v21 = vadd.f32 %v627_v20, %v600_v16 }
 0x6a2   :  { %v631_v22 = vadd.f32 %v628_v21, %v555_v58 }
 0x6a4   :  { %v635_v23 = vsel %vm60_vm0, %v631_v22, 0.0 }
 0x6a5   :  { %636 = vadd.xlane.f32.xlu0 %v635_v23 }
 0x710   :  { %v634_v18 = vpop.xlane.xlu1 %633 }
 0x711   :  { %v638_v24 = vmul.f32 %v634_v18, %v4681_v11 }
 0x713   :  { %v640_v27 = vsub.f32 %v630_v8, %v638_v24 }
 0x715   :  { %v642_v25 = vmul.f32 %v640_v27, %v640_v27 }
 0x717   :  { %v644_v28 = vsel %vm60_vm0, %v642_v25, 0.0 }
 0x718   :  { %v637_v12 = vpop.xlane.xlu0 %636  ;;  %645 = vadd.xlane.f32.xlu2 %v644_v28 }
 0x719   :  { %v639_v15 = vmul.f32 %v637_v12, %v4681_v11 }
 0x71b   :  { %v641_v29 = vsub.f32 %v631_v22, %v639_v15 }
 0x71d   :  { %v643_v31 = vmul.f32 %v641_v29, %v641_v29 }
 0x71f   :  { %v647_v32 = vsel %vm60_vm0, %v643_v31, 0.0 }
 0x720   :  { %648 = vadd.xlane.f32.xlu1 %v647_v32 }
 0x78b   :  { %v646_v40 = vpop.xlane.xlu2 %645 }
 0x78c   :  { %v650_v41 = vmul.f32 %v646_v40, %v4681_v11 }
 0x78e   :  { %v652_v43 = vadd.f32 1e-05, %v650_v41 }
 0x790   :  { %4180 = vrsqrt.f32 %v652_v43  ;;  %vm660_vm11 = vweird.f32 %v652_v43 }
 0x793   :  { %v649_v44 = vpop.xlane.xlu1 %648 }
 0x794   :  { %v651_v45 = vmul.f32 %v649_v44, %v4681_v11 }
 0x796   :  { %v4181_v46 = vpop.eup %4180  ;;  %v653_v47 = vadd.f32 1e-05, %v651_v45 }
 0x797   :  { %v655_v48 = vmul.f32 %v4181_v46, %v652_v43  ;;  %vm661_vm10 = vweird.f32 %v4181_v46 }
 0x798   :  { %4182 = vrsqrt.f32 %v653_v47  ;;  %vm662_vm12 = vmor %vm660_vm11, %vm661_vm10  ;;  %vm670_vm14 = vweird.f32 %v653_v47 }
 0x799   :  { %v656_v36 = vmul.f32 %v4181_v46, %v655_v48 }
 0x79b   :  { %v657_v50 = vmul.f32 0.5, %v656_v36 }
 0x79d   :  { %v658_v51 = vsub.f32 1.5, %v657_v50 }
 0x79e   :  { %v4183_v52 = vpop.eup %4182 }
 0x79f   :  { %v659_v54 = vmul.f32 %v4181_v46, %v658_v51  ;;  %v665_v55 = vmul.f32 %v4183_v52, %v653_v47  ;;  %vm671_vm13 = vweird.f32 %v4183_v52 }
 0x7a0   :  { %vm672_vm15 = vmor %vm670_vm14, %vm671_vm13 }
 0x7a1   :  { %v663_v59 = vsel %vm662_vm12, %v4181_v46, %v659_v54  ;;  %v666_v60 = vmul.f32 %v4183_v52, %v665_v55 }
 0x7a2   :  { %v674_v61 = vmul.f32 %v663_v59, %v640_v27 }
 0x7a3   :  { %v667_v63 = vmul.f32 0.5, %v666_v60 }
 0x7a4   :  { %v677_v58 = vmul.f32 %v676_v57, %v674_v61 }
 0x7a5   :  { %v668_v0 = vsub.f32 1.5, %v667_v63 }
 0x7a6   :  { %v4755_v1 = vadd.f32 %v679_v62, %v677_v58 }
 0x7a7   :  { %v669_v3 = vmul.f32 %v4183_v52, %v668_v0 }
 0x7a8   :  { %3808 = vmatmul.msk.f32.vlgmr.msrb.gmra.mxu0 %vm60_vm0, %v4755_v1 }
 0x7a9   :  { %v673_v6 = vsel %vm672_vm15, %v4183_v52, %v669_v3 }
 0x7aa   :  { %v675_v9 = vmul.f32 %v673_v6, %v641_v29 }
 0x7ac   :  { %v678_v10 = vmul.f32 %v676_v57, %v675_v9 }
 0x7ae   :  { %v4759_v4 = vadd.f32 %v679_v62, %v678_v10 }
 0x7b0   :  { %3809 = vmatmul.msk.f32.gmra.mxu0 %vm60_vm0, %v4759_v4 }
 0x825   :  { %v715_v14 = vpop.f32.mrf.mxu0 }
 0x826   :  { %v4769_v2 = vadd.f32 %v715_v14, %v691_v13 }
 0x828   :  { %731 = vrot.lane.b32.xlu2 %v4769_v2, %s4406_s12 }
 0x82d   :  { %v718_v16 = vpop.f32.mrf.mxu0 }
 0x82e   :  { %v4773_v5 = vadd.f32 %v718_v16, %v691_v13 }
 0x830   :  { %725 = vrot.lane.b32.xlu2 %v4773_v5, %s4404_s11  ;;  %729 = vrot.lane.b32.xlu1 %v4773_v5, %s4405_s0 }
 0x831   :  { %733 = vrot.lane.b32.xlu0 %v4773_v5, %s4406_s12 }
 0x839   :  { %727 = vrot.lane.b32.xlu0 %v4769_v2, %s4405_s0 }
 0x841   :  { %723 = vrot.lane.b32.xlu0 %v4769_v2, %s4404_s11 }
 0x882   :  { %v4785_v17 = vpop.permute.xlu2 %731 }
 0x883   :  { %747 = vrot.lane.b32.xlu2 %v4785_v17, %s4407_s13 }
 0x88a   :  { %v4789_v8 = vpop.permute.xlu2 %725 }
 0x88b   :  { %741 = vrot.lane.b32.xlu2 %v4789_v8, %s4407_s13 }
 0x893   :  { %735 = vrot.lane.b32.xlu2 %v4769_v2, %s4407_s13 }
 0x8a2   :  { %v730_v19 = vpop.permute.xlu1 %729 }
 0x8a3   :  { %v734_v20 = vpop.permute.xlu0 %733  ;;  %745 = vrot.lane.b32.xlu0 %v730_v19, %s4407_s13 }
 0x8a4   :  { %749 = vrot.lane.b32.xlu1 %v734_v20, %s4407_s13 }
 0x8ab   :  { %v728_v21 = vpop.permute.xlu0 %727 }
 0x8ac   :  { %743 = vrot.lane.b32.xlu1 %v728_v21, %s4407_s13  ;;  %v4027_v48 = vpack.i.bf16 %v728_v21, %v730_v19 }
 0x8b3   :  { %v4798_v22 = vpop.permute.xlu0 %723 }
 0x8b4   :  { %737 = vrot.lane.b32.xlu1 %v4773_v5, %s4407_s13  ;;  %739 = vrot.lane.b32.xlu0 %v4798_v22, %s4407_s13 }
 0x8dd   :  { %v748_v18 = vpop.permute.xlu2 %747 }
 0x8e5   :  { %v742_v25 = vpop.permute.xlu2 %741 }
 0x8ed   :  { %v736_v15 = vpop.permute.xlu2 %735 }
 0x915   :  { %v746_v24 = vpop.permute.xlu0 %745 }
 0x916   :  { %v750_v23 = vpop.permute.xlu1 %749 }
 0x917   :  { %3810 = vmatpush.xpose.msk.msrb.mxu2 %vm120_vm1, %v750_v23 }
 0x91b   :  { %3811 = vmatpush.xpose.msk.msrb.mxu2 %vm120_vm1, %v748_v18 }
 0x91e   :  { %v744_v27 = vpop.permute.xlu1 %743 }
 0x91f   :  { %3812 = vmatpush.xpose.msk.msrb.mxu2 %vm120_vm1, %v746_v24 }
 0x923   :  { %3813 = vmatpush.xpose.msk.msrb.mxu2 %vm120_vm1, %v744_v27 }
 0x926   :  { %v740_v28 = vpop.permute.xlu0 %739  ;;  %v738_v12 = vpop.permute.xlu1 %737 }
 0x927   :  { %3814 = vmatpush.xpose.msk.msrb.mxu2 %vm120_vm1, %v742_v25 }
 0x92b   :  { %3815 = vmatpush.xpose.msk.msrb.mxu2 %vm120_vm1, %v740_v28 }
 0x92f   :  { %3816 = vmatpush.xpose.msk.msrb.mxu2 %vm120_vm1, %v738_v12 }
 0x933   :  { %3817 = vmatpush.xpose.msk.msrb.mxu2 %vm120_vm1, %v736_v15 }
 0x936   :  { %3818 = vmatmul.msk.f32.vlgmr.msrb.gmra.mxu2 %vm120_vm1, %v4769_v2 }
 0x93e   :  { %3819 = vmatmul.msk.f32.gmra.mxu2 %vm120_vm1, %v4773_v5 }
 0x946   :  { %3820 = vmatmul.msk.f32.gmra.mxu2 %vm120_vm1, %v4798_v22 }
 0x94e   :  { %3821 = vmatmul.msk.f32.gmra.mxu2 %vm120_vm1, %v4789_v8 }
 0x956   :  { %3822 = vmatmul.msk.f32.gmra.mxu2 %vm120_vm1, %v728_v21 }
 0x95e   :  { %3823 = vmatmul.msk.f32.gmra.mxu2 %vm120_vm1, %v730_v19 }
 0x966   :  { %3824 = vmatmul.msk.f32.gmra.mxu2 %vm120_vm1, %v4785_v17 }
 0x96e   :  { %3825 = vmatmul.msk.f32.gmra.mxu2 %vm120_vm1, %v734_v20 }
 0x9b9   :  { %v800_v29 = vpop.f32.mrf.mxu2 }
 0x9ba   :  { %v801_v31 = vadd.f32 %v800_v29, %v4544_v26 }
 0x9bc   :  { %v824_v32 = vsel %vm194_vm2, %v801_v31, -inf }
 0x9bd   :  { %825 = vmax.xlane.f32.xlu0 %v824_v32 }
 0x9c1   :  { %v803_v33 = vpop.f32.mrf.mxu2 }
 0x9c2   :  { %v804_v35 = vadd.f32 %v803_v33, %v4551_v30 }
 0x9c4   :  { %v827_v37 = vsel %vm194_vm2, %v804_v35, -inf }
 0x9c5   :  { %828 = vmax.xlane.f32.xlu1 %v827_v37 }
 0x9c9   :  { %v806_v39 = vpop.f32.mrf.mxu2 }
 0x9ca   :  { %v4830_v40 = vadd.f32 %v806_v39, %v4558_v34  ;;  %v4022_v34 = vpack.i.bf16 %v4785_v17, %v734_v20  ;;  %v4032_v17 = vpack.i.bf16 %v4798_v22, %v4789_v8 }
 0x9cc   :  { %v830_v41 = vsel %vm194_vm2, %v4830_v40, -inf }
 0x9cd   :  { %831 = vmax.xlane.f32.xlu2 %v830_v41 }
 0x9d1   :  { %v809_v43 = vpop.f32.mrf.mxu2 }
 0x9d2   :  { %v810_v26 = vadd.f32 %v809_v43, %v4568_v38 }
 0x9d4   :  { %v833_v44 = vsel %vm194_vm2, %v810_v26, -inf }
 0x9d5   :  { %834 = vmax.xlane.f32.xlu0 %v833_v44 }
 0x9d9   :  { %v812_v45 = vpop.f32.mrf.mxu2 }
 0x9da   :  { %v813_v30 = vadd.f32 %v812_v45, %v4575_v42 }
 0x9dc   :  { %v836_v46 = vsel %vm194_vm2, %v813_v30, -inf }
 0x9dd   :  { %837 = vmax.xlane.f32.xlu1 %v836_v46 }
 0x9e1   :  { %v815_v47 = vpop.f32.mrf.mxu2 }
 0x9e2   :  { %v4844_v51 = vadd.f32 %v815_v47, %v4594_v53 }
 0x9e4   :  { %v839_v52 = vsel %vm194_vm2, %v4844_v51, -inf }
 0x9e5   :  { %4028 = vrot.lane.b32.xlu2 %v4027_v48, %s4408_s24 }
 0x9e9   :  { %v818_v36 = vpop.f32.mrf.mxu2  ;;  %4023 = vrot.lane.b32.xlu0 %v4022_v34, %s4408_s24 }
 0x9ea   :  { %v819_v38 = vadd.f32 %v818_v36, %v4587_v49  ;;  %v4037_v49 = vpack.i.bf16 %v4769_v2, %v4773_v5 }
 0x9ec   :  { %v842_v50 = vsel %vm194_vm2, %v819_v38, -inf }
 0x9ed   :  { %843 = vmax.xlane.f32.xlu1 %v842_v50 }
 0x9f1   :  { %v821_v42 = vpop.f32.mrf.mxu2 }
 0x9f2   :  { %v4849_v54 = vadd.f32 %v821_v42, %v4604_v56 }
 0x9f4   :  { %v845_v55 = vsel %vm194_vm2, %v4849_v54, -inf }
 0xa0e   :  { %840 = vmax.xlane.f32.xlu2 %v839_v52 }
 0xa13   :  { %846 = vmax.xlane.f32.xlu0 %v845_v55 }
 0xa26   :  { %4038 = vrot.lane.b32.xlu2 %v4037_v49, %s4408_s24 }
 0xa30   :  { %v826_v57 = vpop.xlane.xlu0 %825 }
 0xa31   :  { %v848_v53 = vsub.f32 %v801_v31, %v826_v57 }
 0xa33   :  { %v856_v59 = vmul.f32 1.442695, %v848_v53 }
 0xa35   :  { %4184 = vpow2.f32 %v856_v59 }
 0xa38   :  { %v829_v60 = vpop.xlane.xlu1 %828 }
 0xa39   :  { %v849_v62 = vsub.f32 %v804_v35, %v829_v60 }
 0xa3b   :  { %v4856_v61 = vpop.eup %4184  ;;  %v858_v63 = vmul.f32 1.442695, %v849_v62 }
 0xa3c   :  { %v872_v56 = vsel %vm194_vm2, %v4856_v61, 0.0 }
 0xa3d   :  { %873 = vadd.xlane.f32.xlu1 %v872_v56  ;;  %4186 = vpow2.f32 %v858_v63 }
 0xa40   :  { %v832_v2 = vpop.xlane.xlu2 %831 }
 0xa41   :  { %v850_v29 = vsub.f32 %v4830_v40, %v832_v2 }
 0xa43   :  { %v4860_v3 = vpop.eup %4186  ;;  %v860_v31 = vmul.f32 1.442695, %v850_v29 }
 0xa44   :  { %v875_v9 = vsel %vm194_vm2, %v4860_v3, 0.0 }
 0xa48   :  { %v835_v58 = vpop.xlane.xlu0 %834  ;;  %v4029_v18 = vpop.permute.xlu2 %4028 }
 0xa49   :  { %v851_v0 = vsub.f32 %v810_v26, %v835_v58  ;;  %v4030_v27 = vunpack.i.l.bf16 %v4029_v18  ;;  %v4031_v8 = vunpack.i.h.bf16 %v4029_v18 }
 0xa4b   :  { %v862_v6 = vmul.f32 1.442695, %v851_v0 }
 0xa4d   :  { %4188 = vpow2.f32 %v862_v6 }
 0xa4f   :  { %876 = vadd.xlane.f32.xlu2 %v875_v9 }
 0xa50   :  { %v838_v10 = vpop.xlane.xlu1 %837 }
 0xa51   :  { %v852_v13 = vsub.f32 %v813_v30, %v838_v10 }
 0xa53   :  { %v4864_v14 = vpop.eup %4188  ;;  %v864_v16 = vmul.f32 1.442695, %v852_v13 }
 0xa54   :  { %v881_v5 = vsel %vm194_vm2, %v4864_v14, 0.0 }
 0xa55   :  { %4190 = vpow2.f32 %v864_v16  ;;  %882 = vadd.xlane.f32.xlu0 %v881_v5  ;;  %v687_v16 = vld [vmem:[%s6013_s5 + $0xc8] sm:$0xff] }
 0xa56   :  { %4033 = vrot.lane.b32.xlu1 %v4032_v17, %s4408_s24  ;;  %1022 = vmatpush.msra.mxu0 %v687_v16 }
 0xa5b   :  { %v4871_v19 = vpop.eup %4190  ;;  %v4024_v20 = vpop.permute.xlu0 %4023 }
 0xa5c   :  { %v4025_v21 = vunpack.i.l.bf16 %v4024_v20  ;;  %v884_v23 = vsel %vm194_vm2, %v4871_v19, 0.0  ;;  %v4026_v24 = vunpack.i.h.bf16 %v4024_v20  ;;  %v689_v20 = vld [vmem:[%s6013_s5 + $0xd8] sm:$0xff] }
 0xa5d   :  { %885 = vadd.xlane.f32.xlu0 %v884_v23  ;;  %1085 = vmatpush.msrb.mxu1 %v689_v20  ;;  %v1221_v20 = vld [vmem:[%s6013_s5 + $0x140] sm:$0xff] }
 0xa5e   :  { %968 = vmatpush.msra.mxu3 %v4025_v21  ;;  %v690_v21 = vld [vmem:[%s6013_s5 + $0xe0] sm:$0xff] }
 0xa60   :  { %v844_v25 = vpop.xlane.xlu1 %843  ;;  %969 = vmatpush.msra.mxu3 %v4026_v24 }
 0xa61   :  { %v854_v28 = vsub.f32 %v819_v38, %v844_v25 }
 0xa62   :  { %970 = vmatpush.msra.mxu3 %v4030_v27 }
 0xa63   :  { %v868_v22 = vmul.f32 1.442695, %v854_v28 }
 0xa64   :  { %971 = vmatpush.msra.mxu3 %v4031_v8 }
 0xa65   :  { %4192 = vpow2.f32 %v868_v22 }
 0xa66   :  { %4194 = vpow2.f32 %v860_v31 }
 0xa6b   :  { %v4875_v12 = vpop.eup %4192 }
 0xa6c   :  { %v890_v15 = vsel %vm194_vm2, %v4875_v12, 0.0  ;;  %v4195_v32 = vpop.eup %4194 }
 0xa6d   :  { %891 = vadd.xlane.f32.xlu2 %v890_v15  ;;  %v878_v33 = vsel %vm194_vm2, %v4195_v32, 0.0  ;;  %v1030_v15 = vperm.slane %v4766_v7, 1 }
 0xa80   :  { %879 = vadd.xlane.f32.xlu1 %v878_v33 }
 0xa81   :  { %v841_v35 = vpop.xlane.xlu2 %840 }
 0xa82   :  { %v853_v37 = vsub.f32 %v4844_v51, %v841_v35 }
 0xa84   :  { %v866_v39 = vmul.f32 1.442695, %v853_v37 }
 0xa86   :  { %4196 = vpow2.f32 %v866_v39  ;;  %v847_v41 = vpop.xlane.xlu0 %846 }
 0xa87   :  { %v855_v43 = vsub.f32 %v4849_v54, %v847_v41 }
 0xa89   :  { %v870_v26 = vmul.f32 1.442695, %v855_v43  ;;  %v4039_v47 = vpop.permute.xlu2 %4038 }
 0xa8a   :  { %v4040_v51 = vunpack.i.l.bf16 %v4039_v47  ;;  %v4041_v42 = vunpack.i.h.bf16 %v4039_v47 }
 0xa8b   :  { %4198 = vpow2.f32 %v870_v26 }
 0xa8c   :  { %v4197_v44 = vpop.eup %4196 }
 0xa8d   :  { %v887_v45 = vsel %vm194_vm2, %v4197_v44, 0.0 }
 0xa8e   :  { %888 = vadd.xlane.f32.xlu0 %v887_v45 }
 0xa91   :  { %v4199_v40 = vpop.eup %4198 }
 0xa92   :  { %v893_v30 = vsel %vm194_vm2, %v4199_v40, 0.0 }
 0xa93   :  { %894 = vadd.xlane.f32.xlu1 %v893_v30 }
 0xab0   :  { %v874_v46 = vpop.xlane.xlu1 %873 }
 0xab1   :  { %4200 = vrcp.f32 %v874_v46 }
 0xab7   :  { %v4201_v50 = vpop.eup %4200 }
 0xab8   :  { %v904_v52 = vmul.f32 %v4201_v50, %v4856_v61 }
 0xac2   :  { %v877_v38 = vpop.xlane.xlu2 %876 }
 0xac3   :  { %4202 = vrcp.f32 %v877_v38 }
 0xac8   :  { %v4034_v48 = vpop.permute.xlu1 %4033  ;;  %v883_v57 = vpop.xlane.xlu0 %882 }
 0xac9   :  { %v4035_v34 = vunpack.i.l.bf16 %v4034_v48  ;;  %v4036_v36 = vunpack.i.h.bf16 %v4034_v48  ;;  %v4203_v54 = vpop.eup %4202 }
 0xaca   :  { %v905_v55 = vmul.f32 %v4203_v54, %v4860_v3 }
 0xacb   :  { %972 = vmatpush.msra.mxu3 %v4035_v34 }
 0xacd   :  { %973 = vmatpush.msra.mxu3 %v4036_v36 }
 0xacf   :  { %974 = vmatpush.msra.mxu3 %v4040_v51 }
 0xad0   :  { %v886_v60 = vpop.xlane.xlu0 %885 }
 0xad1   :  { %975 = vmatpush.msra.mxu3 %v4041_v42 }
 0xad2   :  { %3826 = vmatmul.msk.f32.vlgmr.msra.gmra.mxu3 %vm194_vm2, %v904_v52 }
 0xada   :  { %3827 = vmatmul.msk.f32.gmra.mxu3 %vm194_vm2, %v905_v55  ;;  %v1181_v55 = vld [vmem:[%s6013_s5 + $0x100] sm:$0xff] }
 0xadb   :  { %1201 = vmatpush.msra.mxu1 %v1181_v55 }
 0xae0   :  { %v892_v0 = vpop.xlane.xlu2 %891 }
 0xaf3   :  { %v880_v49 = vpop.xlane.xlu1 %879 }
 0xaf4   :  { %4204 = vrcp.f32 %v880_v49  ;;  %v1180_v49 = vld [vmem:[%s6013_s5 + $0xf8] sm:$0xff] }
 0xaf5   :  { %4206 = vrcp.f32 %v883_v57  ;;  %1202 = vmatpush.msra.mxu1 %v1180_v49  ;;  %v1179_v57 = vld [vmem:[%s6013_s5 + $0xf0] sm:$0xff] }
 0xaf6   :  { %4208 = vrcp.f32 %v886_v60 }
 0xaf7   :  { %1203 = vmatpush.msra.mxu1 %v1179_v57 }
 0xafa   :  { %v4205_v53 = vpop.eup %4204 }
 0xafb   :  { %v906_v59 = vmul.f32 %v4205_v53, %v4195_v32  ;;  %v4207_v56 = vpop.eup %4206  ;;  %v1178_v53 = vld [vmem:[%s6013_s5 + $0xe8] sm:$0xff] }
 0xafc   :  { %v907_v61 = vmul.f32 %v4207_v56, %v4864_v14  ;;  %v4209_v63 = vpop.eup %4208  ;;  %1204 = vmatpush.msra.mxu1 %v1178_v53 }
 0xafd   :  { %3828 = vmatmul.msk.f32.gmra.mxu3 %vm194_vm2, %v906_v59  ;;  %v908_v58 = vmul.f32 %v4209_v63, %v4871_v19  ;;  %v688_v19 = vld [vmem:[%s6013_s5 + $0xd0] sm:$0xff]  ;;  %v1359_v63 = vld [vmem:[%s6013_s5 + $0x158] sm:$0xff] }
 0xafe   :  { %1054 = vmatpush.msrb.mxu0 %v688_v19  ;;  %v1172_v19 = vperm.slane %v4766_v7, 2 }
 0xb01   :  { %v889_v62 = vpop.xlane.xlu0 %888 }
 0xb02   :  { %4210 = vrcp.f32 %v889_v62  ;;  %v1360_v62 = vld [vmem:[%s6013_s5 + $0x160] sm:$0xff] }
 0xb03   :  { %4212 = vrcp.f32 %v892_v0 }
 0xb05   :  { %3829 = vmatmul.msk.f32.gmra.mxu3 %vm194_vm2, %v907_v61  ;;  %v1361_v61 = vld [vmem:[%s6013_s5 + $0x168] sm:$0xff] }
 0xb06   :  { %v895_v9 = vpop.xlane.xlu1 %894 }
 0xb07   :  { %4214 = vrcp.f32 %v895_v9 }
 0xb08   :  { %v4211_v3 = vpop.eup %4210 }
 0xb09   :  { %v909_v6 = vmul.f32 %v4211_v3, %v4197_v44  ;;  %v4213_v10 = vpop.eup %4212  ;;  %v1358_v3 = vld [vmem:[%s6013_s5 + $0x150] sm:$0xff] }
 0xb0a   :  { %v910_v13 = vmul.f32 %v4213_v10, %v4875_v12 }
 0xb0d   :  { %3830 = vmatmul.msk.f32.gmra.mxu3 %vm194_vm2, %v908_v58  ;;  %v4215_v14 = vpop.eup %4214 }
 0xb0e   :  { %v911_v2 = vmul.f32 %v4215_v14, %v4199_v40 }
 0xb15   :  { %3831 = vmatmul.msk.f32.gmra.mxu3 %vm194_vm2, %v909_v6 }
 0xb1d   :  { %3832 = vmatmul.msk.f32.gmra.mxu3 %vm194_vm2, %v910_v13 }
 0xb25   :  { %3833 = vmatmul.msk.f32.gmra.mxu3 %vm194_vm2, %v911_v2 }
 0xb55   :  { %v977_v5 = vpop.f32.mrf.mxu3 }
 0xb56   :  { %3834 = vmatmul.msk.f32.vlgmr.msra.gmra.mxu0 %vm120_vm1, %v977_v5 }
 0xb57   :  { %1116 = vmatpush.msra.mxu0 %v690_v21  ;;  %v1220_v21 = vld [vmem:[%s6013_s5 + $0x138] sm:$0xff] }
 0xb5d   :  { %v980_v17 = vpop.f32.mrf.mxu3 }
 0xb5e   :  { %3835 = vmatmul.msk.f32.gmra.mxu0 %vm120_vm1, %v980_v17 }
 0xb80   :  { %v983_v23 = vpop.f32.mrf.mxu3 }
 0xb81   :  { %3836 = vmatmul.msk.f32.vlgmr.msrb.gmra.mxu0 %vm120_vm1, %v983_v23 }
 0xb82   :  { %1237 = vmatpush.msrb.mxu0 %v1221_v20  ;;  %v34_v20 = vld [vmem:[%s6017_s3 + $0x18] sm:$0xff] }
 0xb84   :  { %1238 = vmatpush.msrb.mxu0 %v1220_v21 }
 0xb88   :  { %v986_v18 = vpop.f32.mrf.mxu3 }
 0xb89   :  { %3837 = vmatmul.msk.f32.gmra.mxu0 %vm120_vm1, %v986_v18 }
 0xb90   :  { %v989_v24 = vpop.f32.mrf.mxu3 }
 0xb91   :  { %3838 = vmatmul.msk.f32.vlgmr.msrb.gmra.mxu1 %vm120_vm1, %v989_v24 }
 0xb92   :  { %1385 = vmatpush.msrb.mxu1 %v1361_v61 }
 0xb94   :  { %1386 = vmatpush.msrb.mxu1 %v1360_v62 }
 0xb96   :  { %1387 = vmatpush.msrb.mxu1 %v1359_v63 }
 0xb98   :  { %v992_v27 = vpop.f32.mrf.mxu3  ;;  %1388 = vmatpush.msrb.mxu1 %v1358_v3 }
 0xb99   :  { %3839 = vmatmul.msk.f32.gmra.mxu1 %vm120_vm1, %v992_v27  ;;  %v1175_v27 = vperm.slane %v4766_v7, 3 }
 0xba0   :  { %v995_v25 = vpop.f32.mrf.mxu3 }
 0xba1   :  { %3840 = vmatmul.msk.f32.vlgmr.msra.gmra.mxu0 %vm120_vm1, %v995_v25  ;;  %v1219_v25 = vld [vmem:[%s6013_s5 + $0x130] sm:$0xff] }
 0xba2   :  { %1239 = vmatpush.msrb.mxu0 %v1219_v25 }
 0xba8   :  { %v998_v28 = vpop.f32.mrf.mxu3 }
 0xba9   :  { %3841 = vmatmul.msk.f32.gmra.mxu0 %vm120_vm1, %v998_v28 }
 0xbd3   :  { %v1024_v8 = vpop.f32.mrf.mxu0 }
 0xbd4   :  { %v1031_v32 = vadd.f32 %v1030_v15, %v1024_v8 }
 0xbdb   :  { %v1027_v22 = vpop.f32.mrf.mxu0 }
 0xbdc   :  { %v1032_v41 = vadd.f32 %v1030_v15, %v1027_v22  ;;  %v1218_v22 = vld [vmem:[%s6013_s5 + $0x128] sm:$0xff] }
 0xbdd   :  { %1240 = vmatpush.msrb.mxu0 %v1218_v22 }
 0xbfe   :  { %v1056_v12 = vpop.f32.mrf.mxu0 }
 0xbff   :  { %v1062_v33 = vadd.f32 %v1056_v12, %v1031_v32 }
 0xc06   :  { %v1059_v29 = vpop.f32.mrf.mxu0 }
 0xc07   :  { %v1063_v44 = vadd.f32 %v1059_v29, %v1032_v41  ;;  %v1217_v29 = vld [vmem:[%s6013_s5 + $0x120] sm:$0xff]  ;;  %v4993_v41 = vld [vmem:[%s6016_s1 + $0x8] sm:$0xff] }
 0xc08   :  { %1241 = vmatpush.msrb.mxu0 %v1217_v29 }
 0xc0e   :  { %v1087_v31 = vpop.f32.mrf.mxu1 }
 0xc0f   :  { %v1093_v35 = vadd.f32 %v1087_v31, %v1062_v33 }
 0xc16   :  { %v1090_v26 = vpop.f32.mrf.mxu1 }
 0xc17   :  { %v1094_v40 = vadd.f32 %v1090_v26, %v1063_v44  ;;  %v1215_v26 = vld [vmem:[%s6013_s5 + $0x110] sm:$0xff]  ;;  %v1214_v44 = vld [vmem:[%s6013_s5 + $0x108] sm:$0xff] }
 0xc1e   :  { %v1118_v37 = vpop.f32.mrf.mxu0 }
 0xc1f   :  { %v1124_v39 = vadd.f32 %v1118_v37, %v1093_v35 }
 0xc21   :  { %v1126_v43 = vadd.f32 %v1124_v39, %v4755_v1  ;;  %v4986_v39 = vld [vmem:[%s6016_s1] sm:$0xff] }
 0xc23   :  { %v1128_v45 = vsel %vm60_vm0, %v1126_v43, 0.0 }
 0xc24   :  { %1129 = vadd.xlane.f32.xlu0 %v1128_v45  ;;  %v1182_v45 = vperm.slane %v4766_v7, 4 }
 0xc26   :  { %v1121_v30 = vpop.f32.mrf.mxu0 }
 0xc27   :  { %v1125_v46 = vadd.f32 %v1121_v30, %v1094_v40 }
 0xc29   :  { %v1127_v47 = vadd.f32 %v1125_v46, %v4759_v4 }
 0xc2b   :  { %v1131_v48 = vsel %vm60_vm0, %v1127_v47, 0.0 }
 0xc2c   :  { %1132 = vadd.xlane.f32.xlu2 %v1131_v48 }
 0xc97   :  { %v1130_v34 = vpop.xlane.xlu0 %1129 }
 0xc98   :  { %v1134_v36 = vmul.f32 %v1130_v34, %v4681_v11  ;;  %v5011_v34 = vld [vmem:[%s6013_s5 + $0x230] sm:$0xff] }
 0xc9a   :  { %v1136_v38 = vsub.f32 %v1126_v43, %v1134_v36  ;;  %v1216_v43 = vld [vmem:[%s6013_s5 + $0x118] sm:$0xff] }
 0xc9b   :  { %1242 = vmatpush.msrb.mxu0 %v1216_v43 }
 0xc9c   :  { %v1138_v50 = vmul.f32 %v1136_v38, %v1136_v38 }
 0xc9d   :  { %1243 = vmatpush.msrb.mxu0 %v1215_v26 }
 0xc9e   :  { %v1140_v1 = vsel %vm60_vm0, %v1138_v50, 0.0 }
 0xc9f   :  { %1141 = vadd.xlane.f32.xlu1 %v1140_v1  ;;  %v1133_v51 = vpop.xlane.xlu2 %1132  ;;  %1244 = vmatpush.msrb.mxu0 %v1214_v44  ;;  %v38_v44 = vld [vmem:[%s6017_s3 + $0x38] sm:$0xff] }
 0xca0   :  { %v1135_v42 = vmul.f32 %v1133_v51, %v4681_v11 }
 0xca2   :  { %v4926_v52 = vsub.f32 %v1127_v47, %v1135_v42 }
 0xca4   :  { %v1139_v54 = vmul.f32 %v4926_v52, %v4926_v52 }
 0xca6   :  { %v1143_v4 = vsel %vm60_vm0, %v1139_v54, 0.0 }
 0xca7   :  { %1144 = vadd.xlane.f32.xlu0 %v1143_v4 }
 0xd12   :  { %v1142_v59 = vpop.xlane.xlu1 %1141 }
 0xd13   :  { %v1146_v60 = vmul.f32 %v1142_v59, %v4681_v11 }
 0xd15   :  { %v1148_v56 = vadd.f32 1e-05, %v1146_v60 }
 0xd17   :  { %4216 = vrsqrt.f32 %v1148_v56  ;;  %vm1156_vm4 = vweird.f32 %v1148_v56 }
 0xd1a   :  { %v1145_v58 = vpop.xlane.xlu0 %1144 }
 0xd1b   :  { %v1147_v0 = vmul.f32 %v1145_v58, %v4681_v11 }
 0xd1d   :  { %v4217_v6 = vpop.eup %4216  ;;  %v1149_v9 = vadd.f32 1e-05, %v1147_v0  ;;  %v31_v0 = vld [vmem:[%s6017_s3] sm:$0xff] }
 0xd1e   :  { %v1151_v10 = vmul.f32 %v4217_v6, %v1148_v56  ;;  %vm1157_vm3 = vweird.f32 %v4217_v6 }
 0xd1f   :  { %4218 = vrsqrt.f32 %v1149_v9  ;;  %vm1158_vm5 = vmor %vm1156_vm4, %vm1157_vm3  ;;  %vm1166_vm7 = vweird.f32 %v1149_v9 }
 0xd20   :  { %v1152_v13 = vmul.f32 %v4217_v6, %v1151_v10  ;;  %v32_v10 = vld [vmem:[%s6017_s3 + $0x8] sm:$0xff] }
 0xd22   :  { %v1153_v14 = vmul.f32 0.5, %v1152_v13 }
 0xd24   :  { %v1154_v2 = vsub.f32 1.5, %v1153_v14 }
 0xd25   :  { %v4219_v16 = vpop.eup %4218 }
 0xd26   :  { %v1155_v5 = vmul.f32 %v4217_v6, %v1154_v2  ;;  %v1161_v17 = vmul.f32 %v4219_v16, %v1149_v9  ;;  %vm1167_vm6 = vweird.f32 %v4219_v16 }
 0xd27   :  { %vm1168_vm8 = vmor %vm1166_vm7, %vm1167_vm6 }
 0xd28   :  { %v1159_v23 = vsel %vm1158_vm5, %v4217_v6, %v1155_v5  ;;  %v1162_v18 = vmul.f32 %v4219_v16, %v1161_v17 }
 0xd29   :  { %v1170_v24 = vmul.f32 %v1159_v23, %v1136_v38  ;;  %v1366_v38 = vperm.slane %v5011_v34, 0 }
 0xd2a   :  { %v1163_v28 = vmul.f32 0.5, %v1162_v18 }
 0xd2b   :  { %v1173_v8 = vmul.f32 %v1172_v19, %v1170_v24  ;;  %v35_v24 = vld [vmem:[%s6017_s3 + $0x20] sm:$0xff] }
 0xd2c   :  { %v1164_v12 = vsub.f32 1.5, %v1163_v28 }
 0xd2d   :  { %v4971_v15 = vadd.f32 %v1175_v27, %v1173_v8 }
 0xd2e   :  { %v1165_v31 = vmul.f32 %v4219_v16, %v1164_v12  ;;  %v37_v12 = vld [vmem:[%s6017_s3 + $0x30] sm:$0xff] }
 0xd2f   :  { %3842 = vmatmul.msk.f32.vlgmr.msra.gmra.mxu1 %vm60_vm0, %v4971_v15 }
 0xd30   :  { %v1169_v32 = vsel %vm1168_vm8, %v4219_v16, %v1165_v31  ;;  %v33_v16 = vld [vmem:[%s6017_s3 + $0x10] sm:$0xff] }
 0xd31   :  { %v1171_v33 = vmul.f32 %v1169_v32, %v4926_v52 }
 0xd33   :  { %v1174_v35 = vmul.f32 %v1172_v19, %v1171_v33 }
 0xd35   :  { %v4979_v37 = vadd.f32 %v1175_v27, %v1174_v35  ;;  %v36_v35 = vld [vmem:[%s6017_s3 + $0x28] sm:$0xff] }
 0xd37   :  { %3843 = vmatmul.msk.f32.gmra.mxu1 %vm60_vm0, %v4979_v37 }
 0xd3f   :  { %3846 = vmatmul.msk.f32.vlgmr.msrb.gmra.mxu1 %vm60_vm0, %v4986_v39 }
 0xd47   :  { %3847 = vmatmul.msk.f32.gmra.mxu1 %vm60_vm0, %v4993_v41 }
 0xdac   :  { %v1206_v40 = vpop.f32.mrf.mxu1 }
 0xdad   :  { %v1207_v30 = vadd.f32 %v1206_v40, %v1182_v45 }
 0xdaf   :  { %v1212_v46 = vmax.f32 %v1207_v30, 0.0 }
 0xdb1   :  { %3844 = vmatmul.msk.f32.vlgmr.msrb.gmra.mxu0 %vm194_vm2, %v1212_v46 }
 0xdb4   :  { %v1209_v47 = vpop.f32.mrf.mxu1 }
 0xdb5   :  { %v1210_v48 = vadd.f32 %v1209_v47, %v1182_v45 }
 0xdb7   :  { %v1213_v36 = vmax.f32 %v1210_v48, 0.0 }
 0xdb9   :  { %3845 = vmatmul.msk.f32.gmra.mxu0 %vm194_vm2, %v1213_v36 }
 0xdbc   :  { %v1390_v50 = vpop.f32.mrf.mxu1 }
 0xdbd   :  { %v5015_v1 = vadd.f32 %v1390_v50, %v1366_v38 }
 0xdbf   :  { %1406 = vrot.lane.b32.xlu1 %v5015_v1, %s4406_s12 }
 0xdc4   :  { %v1393_v51 = vpop.f32.mrf.mxu1 }
 0xdc5   :  { %v5019_v42 = vadd.f32 %v1393_v51, %v1366_v38 }
 0xdc7   :  { %1404 = vrot.lane.b32.xlu0 %v5019_v42, %s4405_s0  ;;  %1408 = vrot.lane.b32.xlu2 %v5019_v42, %s4406_s12  ;;  %v4057_v46 = vpack.i.bf16 %v5015_v1, %v5019_v42 }
 0xdc8   :  { %1398 = vrot.lane.b32.xlu1 %v5015_v1, %s4404_s11 }
 0xdcf   :  { %1400 = vrot.lane.b32.xlu0 %v5019_v42, %s4404_s11  ;;  %1402 = vrot.lane.b32.xlu2 %v5015_v1, %s4405_s0 }
 0xe21   :  { %v5031_v52 = vpop.permute.xlu2 %1408 }
 0xe22   :  { %1424 = vrot.lane.b32.xlu2 %v5031_v52, %s4407_s13 }
 0xe29   :  { %v5035_v54 = vpop.permute.xlu2 %1402 }
 0xe2a   :  { %1418 = vrot.lane.b32.xlu2 %v5035_v54, %s4407_s13 }
 0xe31   :  { %v5039_v4 = vpop.permute.xlu1 %1406 }
 0xe32   :  { %1412 = vrot.lane.b32.xlu2 %v5019_v42, %s4407_s13  ;;  %1422 = vrot.lane.b32.xlu0 %v5039_v4, %s4407_s13  ;;  %v4042_v32 = vpack.i.bf16 %v5039_v4, %v5031_v52 }
 0xe39   :  { %v1405_v55 = vpop.permute.xlu0 %1404 }
 0xe3a   :  { %1420 = vrot.lane.b32.xlu1 %v1405_v55, %s4407_s13  ;;  %v5046_v49 = vpop.permute.xlu1 %1398  ;;  %v4047_v8 = vpack.i.bf16 %v5035_v54, %v1405_v55 }
 0xe41   :  { %v5048_v57 = vpop.permute.xlu0 %1400 }
 0xe42   :  { %1416 = vrot.lane.b32.xlu0 %v5048_v57, %s4407_s13  ;;  %1414 = vrot.lane.b32.xlu1 %v5046_v49, %s4407_s13 }
 0xe4a   :  { %1410 = vrot.lane.b32.xlu0 %v5015_v1, %s4407_s13 }
 0xe7c   :  { %v1425_v53 = vpop.permute.xlu2 %1424 }
 0xe7d   :  { %3848 = vmatpush.xpose.msk.msrb.mxu3 %vm120_vm1, %v1425_v53 }
 0xe84   :  { %v1419_v56 = vpop.permute.xlu2 %1418 }
 0xe8c   :  { %v1413_v63 = vpop.permute.xlu2 %1412 }
 0xea4   :  { %v1423_v59 = vpop.permute.xlu0 %1422 }
 0xea5   :  { %3849 = vmatpush.xpose.msk.msrb.mxu3 %vm120_vm1, %v1423_v59 }
 0xeac   :  { %v1421_v60 = vpop.permute.xlu1 %1420 }
 0xead   :  { %3850 = vmatpush.xpose.msk.msrb.mxu3 %vm120_vm1, %v1421_v60 }
 0xeb1   :  { %3851 = vmatpush.xpose.msk.msrb.mxu3 %vm120_vm1, %v1419_v56 }
 0xeb4   :  { %v1417_v61 = vpop.permute.xlu0 %1416  ;;  %v1415_v62 = vpop.permute.xlu1 %1414 }
 0xeb5   :  { %3852 = vmatpush.xpose.msk.msrb.mxu3 %vm120_vm1, %v1417_v61 }
 0xeb9   :  { %3853 = vmatpush.xpose.msk.msrb.mxu3 %vm120_vm1, %v1415_v62 }
 0xebc   :  { %v1411_v58 = vpop.permute.xlu0 %1410 }
 0xebd   :  { %3854 = vmatpush.xpose.msk.msrb.mxu3 %vm120_vm1, %v1413_v63 }
 0xec1   :  { %3855 = vmatpush.xpose.msk.msrb.mxu3 %vm120_vm1, %v1411_v58 }
 0xec4   :  { %3856 = vmatmul.msk.f32.vlgmr.msrb.gmra.mxu3 %vm120_vm1, %v5015_v1 }
 0xecc   :  { %3857 = vmatmul.msk.f32.gmra.mxu3 %vm120_vm1, %v5019_v42 }
 0xed4   :  { %3858 = vmatmul.msk.f32.gmra.mxu3 %vm120_vm1, %v5046_v49 }
 0xedc   :  { %3859 = vmatmul.msk.f32.gmra.mxu3 %vm120_vm1, %v5048_v57 }
 0xee4   :  { %3860 = vmatmul.msk.f32.gmra.mxu3 %vm120_vm1, %v5035_v54 }
 0xeec   :  { %3861 = vmatmul.msk.f32.gmra.mxu3 %vm120_vm1, %v1405_v55 }
 0xef4   :  { %3862 = vmatmul.msk.f32.gmra.mxu3 %vm120_vm1, %v5039_v4 }
 0xefc   :  { %3863 = vmatmul.msk.f32.gmra.mxu3 %vm120_vm1, %v5031_v52 }
 0xf47   :  { %v1475_v3 = vpop.f32.mrf.mxu3 }
 0xf48   :  { %v1476_v6 = vadd.f32 %v1475_v3, %v31_v0 }
 0xf4a   :  { %v1499_v9 = vsel %vm194_vm2, %v1476_v6, -inf }
 0xf4b   :  { %1500 = vmax.xlane.f32.xlu1 %v1499_v9 }
 0xf4f   :  { %v1478_v13 = vpop.f32.mrf.mxu3 }
 0xf50   :  { %v1479_v14 = vadd.f32 %v1478_v13, %v32_v10  ;;  %v4052_v10 = vpack.i.bf16 %v5046_v49, %v5048_v57  ;;  %v1222_v57 = vperm.slane %v4766_v7, 5 }
 0xf52   :  { %v1502_v2 = vsel %vm194_vm2, %v1479_v14, -inf }
 0xf53   :  { %1503 = vmax.xlane.f32.xlu2 %v1502_v2 }
 0xf57   :  { %v1481_v5 = vpop.f32.mrf.mxu3 }
 0xf58   :  { %v5090_v17 = vadd.f32 %v1481_v5, %v33_v16  ;;  %v1246_v16 = vpop.f32.mrf.mxu0 }
 0xf5a   :  { %v1505_v19 = vsel %vm194_vm2, %v5090_v17, -inf }
 0xf5b   :  { %1506 = vmax.xlane.f32.xlu0 %v1505_v19 }
 0xf5f   :  { %v1484_v21 = vpop.f32.mrf.mxu3 }
 0xf60   :  { %v1485_v23 = vadd.f32 %v1484_v21, %v34_v20  ;;  %v1249_v49 = vpop.f32.mrf.mxu0 }
 0xf62   :  { %v1508_v18 = vsel %vm194_vm2, %v1485_v23, -inf }
 0xf63   :  { %1509 = vmax.xlane.f32.xlu2 %v1508_v18 }
 0xf67   :  { %v1487_v27 = vpop.f32.mrf.mxu3 }
 0xf68   :  { %v1488_v25 = vadd.f32 %v1487_v27, %v35_v24 }
 0xf6a   :  { %v1511_v28 = vsel %vm194_vm2, %v1488_v25, -inf }
 0xf6b   :  { %1512 = vmax.xlane.f32.xlu1 %v1511_v28 }
 0xf6f   :  { %v1490_v22 = vpop.f32.mrf.mxu3  ;;  %4048 = vrot.lane.b32.xlu0 %v4047_v8, %s4408_s24 }
 0xf70   :  { %v5114_v43 = vadd.f32 %v1490_v22, %v36_v35 }
 0xf72   :  { %v1514_v26 = vsel %vm194_vm2, %v5114_v43, -inf }
 0xf77   :  { %v1493_v29 = vpop.f32.mrf.mxu3 }
 0xf78   :  { %v1494_v31 = vadd.f32 %v1493_v29, %v37_v12  ;;  %v1247_v12 = vadd.f32 %v1246_v16, %v1222_v57 }
 0xf7a   :  { %v1517_v33 = vsel %vm194_vm2, %v1494_v31, -inf }
 0xf7b   :  { %4043 = vrot.lane.b32.xlu2 %v4042_v32, %s4408_s24  ;;  %1518 = vmax.xlane.f32.xlu1 %v1517_v33  ;;  %v1252_v32 = vadd.f32 %v1247_v12, %v4971_v15  ;;  %v1364_v12 = vld [vmem:[%s6013_s5 + $0x180] sm:$0xff] }
 0xf7f   :  { %v1496_v45 = vpop.f32.mrf.mxu3 }
 0xf80   :  { %v5121_v40 = vadd.f32 %v1496_v45, %v38_v44 }
 0xf82   :  { %v1520_v30 = vsel %vm194_vm2, %v5121_v40, -inf }
 0xf99   :  { %1515 = vmax.xlane.f32.xlu0 %v1514_v26 }
 0xfa4   :  { %1521 = vmax.xlane.f32.xlu2 %v1520_v30 }
 0xfad   :  { %4058 = vrot.lane.b32.xlu0 %v4057_v46, %s4408_s24 }
 0xfbe   :  { %v1501_v47 = vpop.xlane.xlu1 %1500 }
 0xfbf   :  { %v1523_v48 = vsub.f32 %v1476_v6, %v1501_v47 }
 0xfc1   :  { %v1531_v36 = vmul.f32 1.442695, %v1523_v48 }
 0xfc3   :  { %4220 = vpow2.f32 %v1531_v36 }
 0xfc6   :  { %v1504_v38 = vpop.xlane.xlu2 %1503 }
 0xfc7   :  { %v1524_v50 = vsub.f32 %v1479_v14, %v1504_v38 }
 0xfc9   :  { %v5128_v51 = vpop.eup %4220  ;;  %v1533_v52 = vmul.f32 1.442695, %v1524_v50 }
 0xfca   :  { %v1547_v54 = vsel %vm194_vm2, %v5128_v51, 0.0 }
 0xfcb   :  { %1548 = vadd.xlane.f32.xlu1 %v1547_v54  ;;  %4222 = vpow2.f32 %v1533_v52 }
 0xfce   :  { %v1507_v53 = vpop.xlane.xlu0 %1506 }
 0xfcf   :  { %v1525_v24 = vsub.f32 %v5090_v17, %v1507_v53  ;;  %v1254_v17 = vsel %vm60_vm0, %v1252_v32, 0.0 }
 0xfd1   :  { %v5132_v4 = vpop.eup %4222 }
 0xfd2   :  { %v1550_v1 = vsel %vm194_vm2, %v5132_v4, 0.0 }
 0xfd6   :  { %v1510_v55 = vpop.xlane.xlu2 %1509 }
 0xfd7   :  { %v1526_v42 = vsub.f32 %v1485_v23, %v1510_v55  ;;  %1551 = vadd.xlane.f32.xlu0 %v1550_v1  ;;  %v1250_v23 = vadd.f32 %v1249_v49, %v1222_v57 }
 0xfd9   :  { %v1537_v59 = vmul.f32 1.442695, %v1526_v42  ;;  %v1253_v27 = vadd.f32 %v1250_v23, %v4979_v37 }
 0xfdb   :  { %4224 = vpow2.f32 %v1537_v59  ;;  %v1257_v28 = vsel %vm60_vm0, %v1253_v27, 0.0 }
 0xfde   :  { %v4044_v60 = vpop.permute.xlu2 %4043  ;;  %v1513_v56 = vpop.xlane.xlu1 %1512 }
 0xfdf   :  { %v4045_v61 = vunpack.i.l.bf16 %v4044_v60  ;;  %v1527_v62 = vsub.f32 %v1488_v25, %v1513_v56  ;;  %v4046_v58 = vunpack.i.h.bf16 %v4044_v60  ;;  %v1535_v25 = vmul.f32 1.442695, %v1525_v24 }
 0xfe1   :  { %v5136_v63 = vpop.eup %4224  ;;  %v1539_v0 = vmul.f32 1.442695, %v1527_v62  ;;  %v4049_v3 = vpop.permute.xlu0 %4048  ;;  %1643 = vmatpush.msra.mxu0 %v4045_v61 }
 0xfe2   :  { %v4050_v6 = vunpack.i.l.bf16 %v4049_v3  ;;  %v1556_v9 = vsel %vm194_vm2, %v5136_v63, 0.0  ;;  %v4051_v13 = vunpack.i.h.bf16 %v4049_v3 }
 0xfe3   :  { %4226 = vpow2.f32 %v1539_v0  ;;  %1557 = vadd.xlane.f32.xlu2 %v1556_v9  ;;  %1644 = vmatpush.msra.mxu0 %v4046_v58 }
 0xfe4   :  { %4053 = vrot.lane.b32.xlu1 %v4052_v10, %s4408_s24 }
 0xfe5   :  { %1645 = vmatpush.msra.mxu0 %v4050_v6 }
 0xfe7   :  { %1646 = vmatpush.msra.mxu0 %v4051_v13 }
 0xfe9   :  { %v5143_v14 = vpop.eup %4226 }
 0xfea   :  { %v1559_v2 = vsel %vm194_vm2, %v5143_v14, 0.0 }
 0xfeb   :  { %1560 = vadd.xlane.f32.xlu2 %v1559_v2 }
 0xfee   :  { %v1519_v5 = vpop.xlane.xlu1 %1518 }
 0xfef   :  { %v1529_v19 = vsub.f32 %v1494_v31, %v1519_v5 }
 0xff1   :  { %v1543_v20 = vmul.f32 1.442695, %v1529_v19 }
 0xff3   :  { %4228 = vpow2.f32 %v1543_v20 }
 0xff4   :  { %4230 = vpow2.f32 %v1535_v25 }
 0xff9   :  { %v5148_v21 = vpop.eup %4228 }
 0xffa   :  { %v1565_v18 = vsel %vm194_vm2, %v5148_v21, 0.0  ;;  %v4231_v8 = vpop.eup %4230 }
 0xffb   :  { %1566 = vadd.xlane.f32.xlu2 %v1565_v18  ;;  %v1553_v29 = vsel %vm194_vm2, %v4231_v8, 0.0 }
0x1003   :  { %1258 = vadd.xlane.f32.xlu2 %v1257_v28 }
0x100c   :  { %v1516_v22 = vpop.xlane.xlu0 %1515 }
0x100d   :  { %v1528_v7 = vsub.f32 %v5114_v43, %v1516_v22 }
0x100e   :  { %1554 = vadd.xlane.f32.xlu1 %v1553_v29 }
0x100f   :  { %v1541_v31 = vmul.f32 1.442695, %v1528_v7 }
0x1011   :  { %4232 = vpow2.f32 %v1541_v31 }
0x1016   :  { %1255 = vadd.xlane.f32.xlu1 %v1254_v17 }
0x1017   :  { %v4233_v37 = vpop.eup %4232  ;;  %v1522_v33 = vpop.xlane.xlu2 %1521 }
0x1018   :  { %v1530_v35 = vsub.f32 %v5121_v40, %v1522_v33  ;;  %v1562_v26 = vsel %vm194_vm2, %v4233_v37, 0.0 }
0x1019   :  { %1563 = vadd.xlane.f32.xlu0 %v1562_v26  ;;  %v4384_v26 = vld [vmem:[%s6013_s5 + $0x148] sm:$0xff] }
0x101a   :  { %v1545_v44 = vmul.f32 1.442695, %v1530_v35 }
0x101c   :  { %4234 = vpow2.f32 %v1545_v44  ;;  %v1298_v44 = vperm.slane %v4384_v26, 6 }
0x101f   :  { %v4059_v15 = vpop.permute.xlu0 %4058 }
0x1020   :  { %v4060_v38 = vunpack.i.l.bf16 %v4059_v15  ;;  %v4061_v52 = vunpack.i.h.bf16 %v4059_v15 }
0x1022   :  { %v5161_v43 = vpop.eup %4234 }
0x1023   :  { %v1568_v45 = vsel %vm194_vm2, %v5161_v43, 0.0 }
0x1024   :  { %1569 = vadd.xlane.f32.xlu0 %v1568_v45 }
0x103e   :  { %v1549_v30 = vpop.xlane.xlu1 %1548 }
0x103f   :  { %4236 = vrcp.f32 %v1549_v30 }
0x1045   :  { %v4237_v40 = vpop.eup %4236 }
0x1046   :  { %v1579_v54 = vmul.f32 %v4237_v40, %v5128_v51 }
0x104a   :  { %v1552_v36 = vpop.xlane.xlu0 %1551 }
0x104b   :  { %4238 = vrcp.f32 %v1552_v36 }
0x1051   :  { %v4239_v55 = vpop.eup %4238 }
0x1052   :  { %v1580_v42 = vmul.f32 %v4239_v55, %v5132_v4 }
0x1056   :  { %v4054_v46 = vpop.permute.xlu1 %4053  ;;  %v1558_v50 = vpop.xlane.xlu2 %1557 }
0x1057   :  { %v4055_v47 = vunpack.i.l.bf16 %v4054_v46  ;;  %v4056_v48 = vunpack.i.h.bf16 %v4054_v46  ;;  %v1301_v46 = vperm.slane %v4384_v26, 7 }
0x1059   :  { %1647 = vmatpush.msra.mxu0 %v4055_v47  ;;  %v1365_v47 = vld [vmem:[%s6013_s5 + $0x188] sm:$0xff] }
0x105b   :  { %1648 = vmatpush.msra.mxu0 %v4056_v48 }
0x105d   :  { %1649 = vmatpush.msra.mxu0 %v4060_v38 }
0x105e   :  { %v1561_v1 = vpop.xlane.xlu2 %1560 }
0x105f   :  { %1650 = vmatpush.msra.mxu0 %v4061_v52 }
0x1060   :  { %3864 = vmatmul.msk.f32.vlgmr.msra.gmra.mxu0 %vm194_vm2, %v1579_v54 }
0x1068   :  { %3865 = vmatmul.msk.f32.gmra.mxu0 %vm194_vm2, %v1580_v42 }
0x106e   :  { %v1567_v53 = vpop.xlane.xlu2 %1566 }
0x1076   :  { %v1259_v59 = vpop.xlane.xlu2 %1258 }
0x1077   :  { %v1261_v60 = vmul.f32 %v1259_v59, %v4681_v11 }
0x1079   :  { %v5170_v56 = vsub.f32 %v1253_v27, %v1261_v60 }
0x107b   :  { %v1265_v61 = vmul.f32 %v5170_v56, %v5170_v56 }
0x107d   :  { %v1269_v51 = vsel %vm60_vm0, %v1265_v61, 0.0 }
0x107e   :  { %1270 = vadd.xlane.f32.xlu1 %v1269_v51 }
0x1081   :  { %v1555_v62 = vpop.xlane.xlu1 %1554 }
0x1082   :  { %4240 = vrcp.f32 %v1555_v62 }
0x1083   :  { %4242 = vrcp.f32 %v1558_v50 }
0x1084   :  { %4244 = vrcp.f32 %v1561_v1 }
0x1088   :  { %v4241_v58 = vpop.eup %4240 }
0x1089   :  { %v1256_v0 = vpop.xlane.xlu1 %1255  ;;  %v1581_v4 = vmul.f32 %v4241_v58, %v4231_v8  ;;  %v4243_v9 = vpop.eup %4242 }
0x108a   :  { %v1260_v3 = vmul.f32 %v1256_v0, %v4681_v11  ;;  %v1582_v2 = vmul.f32 %v4243_v9, %v5136_v63  ;;  %v4245_v5 = vpop.eup %4244 }
0x108b   :  { %3866 = vmatmul.msk.f32.gmra.mxu0 %vm194_vm2, %v1581_v4  ;;  %v1583_v19 = vmul.f32 %v4245_v5, %v5143_v14  ;;  %v1362_v14 = vld [vmem:[%s6013_s5 + $0x170] sm:$0xff] }
0x108c   :  { %v5177_v6 = vsub.f32 %v1252_v32, %v1260_v3  ;;  %v1564_v16 = vpop.xlane.xlu0 %1563  ;;  %1697 = vmatpush.msra.mxu1 %v1362_v14  ;;  %v1856_v14 = vld [vmem:[%s6013_s5 + $0x1a8] sm:$0xff] }
0x108d   :  { %4246 = vrcp.f32 %v1564_v16 }
0x108e   :  { %v1264_v10 = vmul.f32 %v5177_v6, %v5177_v6  ;;  %4248 = vrcp.f32 %v1567_v53  ;;  %1760 = vmatpush.msrb.mxu1 %v1364_v12  ;;  %v1853_v12 = vld [vmem:[%s6013_s5 + $0x190] sm:$0xff] }
0x1090   :  { %v1266_v13 = vsel %vm60_vm0, %v1264_v10, 0.0 }
0x1091   :  { %1267 = vadd.xlane.f32.xlu0 %v1266_v13 }
0x1093   :  { %3867 = vmatmul.msk.f32.gmra.mxu0 %vm194_vm2, %v1582_v2  ;;  %v4247_v20 = vpop.eup %4246 }
0x1094   :  { %v1584_v49 = vmul.f32 %v4247_v20, %v4233_v37  ;;  %v4249_v23 = vpop.eup %4248 }
0x1095   :  { %v1585_v18 = vmul.f32 %v4249_v23, %v5148_v21  ;;  %v1363_v21 = vld [vmem:[%s6013_s5 + $0x178] sm:$0xff]  ;;  %v1705_v23 = vperm.slane %v5011_v34, 1 }
0x1096   :  { %1729 = vmatpush.msra.mxu2 %v1363_v21 }
0x1097   :  { %v1570_v57 = vpop.xlane.xlu0 %1569 }
0x1098   :  { %4250 = vrcp.f32 %v1570_v57  ;;  %1791 = vmatpush.msrb.mxu2 %v1365_v47 }
0x109b   :  { %3868 = vmatmul.msk.f32.gmra.mxu0 %vm194_vm2, %v1583_v19 }
0x109e   :  { %v4251_v63 = vpop.eup %4250 }
0x109f   :  { %v1586_v24 = vmul.f32 %v4251_v63, %v5161_v43 }
0x10a3   :  { %3869 = vmatmul.msk.f32.gmra.mxu0 %vm194_vm2, %v1584_v49 }
0x10ab   :  { %3870 = vmatmul.msk.f32.gmra.mxu0 %vm194_vm2, %v1585_v18 }
0x10b3   :  { %3871 = vmatmul.msk.f32.gmra.mxu0 %vm194_vm2, %v1586_v24  ;;  %v1855_v24 = vld [vmem:[%s6013_s5 + $0x1a0] sm:$0xff] }
0x10dd   :  { %v1652_v27 = vpop.f32.mrf.mxu0 }
0x10de   :  { %3872 = vmatmul.msk.f32.vlgmr.msra.gmra.mxu1 %vm120_vm1, %v1652_v27 }
0x10df   :  { %1880 = vmatpush.msra.mxu1 %v1856_v14 }
0x10e1   :  { %1881 = vmatpush.msra.mxu1 %v1855_v24 }
0x10e5   :  { %v1655_v25 = vpop.f32.mrf.mxu0 }
0x10e6   :  { %3873 = vmatmul.msk.f32.gmra.mxu1 %vm120_vm1, %v1655_v25  ;;  %v4062_v25 = vpack.i.bf16 %v1855_v24, %v1856_v14 }
0x10f1   :  { %v1271_v28 = vpop.xlane.xlu1 %1270 }
0x10f2   :  { %v1273_v8 = vmul.f32 %v1271_v28, %v4681_v11  ;;  %v1854_v28 = vld [vmem:[%s6013_s5 + $0x198] sm:$0xff] }
0x10f3   :  { %1882 = vmatpush.msra.mxu1 %v1854_v28 }
0x10f4   :  { %v1275_v22 = vadd.f32 1e-05, %v1273_v8 }
0x10f5   :  { %1883 = vmatpush.msra.mxu1 %v1853_v12 }
0x10f6   :  { %4252 = vrsqrt.f32 %v1275_v22  ;;  %vm1292_vm10 = vweird.f32 %v1275_v22 }
0x10fc   :  { %v4253_v7 = vpop.eup %4252 }
0x10fd   :  { %v1287_v29 = vmul.f32 %v4253_v7, %v1275_v22  ;;  %vm1293_vm9 = vweird.f32 %v4253_v7 }
0x10fe   :  { %vm1294_vm11 = vmor %vm1292_vm10, %vm1293_vm9 }
0x10ff   :  { %v1288_v31 = vmul.f32 %v4253_v7, %v1287_v29 }
0x1101   :  { %v1289_v32 = vmul.f32 0.5, %v1288_v31 }
0x1103   :  { %v1290_v17 = vsub.f32 1.5, %v1289_v32 }
0x1104   :  { %v1268_v37 = vpop.xlane.xlu0 %1267 }
0x1105   :  { %v1291_v33 = vmul.f32 %v4253_v7, %v1290_v17  ;;  %v1272_v35 = vmul.f32 %v1268_v37, %v4681_v11 }
0x1107   :  { %v1274_v43 = vadd.f32 1e-05, %v1272_v35  ;;  %v1295_v45 = vsel %vm1294_vm11, %v4253_v7, %v1291_v33 }
0x1108   :  { %v1658_v30 = vpop.f32.mrf.mxu0  ;;  %v1297_v15 = vmul.f32 %v1295_v45, %v5170_v56  ;;  %v4067_v45 = vpack.i.bf16 %v1853_v12, %v1854_v28  ;;  %v1861_v28 = vperm.slane %v5011_v34, 4 }
0x1109   :  { %4254 = vrsqrt.f32 %v1274_v43  ;;  %3874 = vmatmul.msk.f32.vlgmr.msra.gmra.mxu2 %vm120_vm1, %v1658_v30  ;;  %vm1282_vm13 = vweird.f32 %v1274_v43 }
0x110a   :  { %v1300_v48 = vmul.f32 %v1298_v44, %v1297_v15 }
0x110c   :  { %v1303_v36 = vadd.f32 %v1301_v46, %v1300_v48 }
0x110e   :  { %v1307_v40 = vsel %vm60_vm0, %v1303_v36, 0.0 }
0x110f   :  { %v4255_v38 = vpop.eup %4254  ;;  %1308 = vadd.xlane.f32.xlu0 %v1307_v40 }
0x1110   :  { %v1277_v50 = vmul.f32 %v4255_v38, %v1274_v43  ;;  %v1661_v52 = vpop.f32.mrf.mxu0  ;;  %vm1283_vm12 = vweird.f32 %v4255_v38 }
0x1111   :  { %3875 = vmatmul.msk.f32.gmra.mxu2 %vm120_vm1, %v1661_v52  ;;  %vm1284_vm14 = vmor %vm1282_vm13, %vm1283_vm12 }
0x1112   :  { %v1278_v54 = vmul.f32 %v4255_v38, %v1277_v50 }
0x1114   :  { %v1279_v55 = vmul.f32 0.5, %v1278_v54 }
0x1116   :  { %v1280_v1 = vsub.f32 1.5, %v1279_v55 }
0x1118   :  { %v1281_v42 = vmul.f32 %v4255_v38, %v1280_v1  ;;  %v1664_v53 = vpop.f32.mrf.mxu0 }
0x1119   :  { %3876 = vmatmul.msk.f32.vlgmr.msrb.gmra.mxu1 %vm120_vm1, %v1664_v53 }
0x111a   :  { %v1285_v59 = vsel %vm1284_vm14, %v4255_v38, %v1281_v42 }
0x111b   :  { %v1296_v60 = vmul.f32 %v1285_v59, %v5177_v6 }
0x111d   :  { %v1299_v56 = vmul.f32 %v1298_v44, %v1296_v60 }
0x111f   :  { %v1302_v61 = vadd.f32 %v1301_v46, %v1299_v56 }
0x1120   :  { %v1667_v51 = vpop.f32.mrf.mxu0 }
0x1121   :  { %3877 = vmatmul.msk.f32.gmra.mxu1 %vm120_vm1, %v1667_v51  ;;  %v1304_v62 = vsel %vm60_vm0, %v1302_v61, 0.0 }
0x1122   :  { %1305 = vadd.xlane.f32.xlu2 %v1304_v62 }
0x1128   :  { %v1670_v58 = vpop.f32.mrf.mxu0 }
0x1129   :  { %3878 = vmatmul.msk.f32.vlgmr.msrb.gmra.mxu2 %vm120_vm1, %v1670_v58 }
0x1130   :  { %v1673_v0 = vpop.f32.mrf.mxu0 }
0x1131   :  { %3879 = vmatmul.msk.f32.gmra.mxu2 %vm120_vm1, %v1673_v0 }
0x115b   :  { %v1699_v13 = vpop.f32.mrf.mxu1 }
0x115c   :  { %v1706_v27 = vadd.f32 %v1705_v23, %v1699_v13 }
0x1163   :  { %v1702_v57 = vpop.f32.mrf.mxu1 }
0x1164   :  { %v1707_v29 = vadd.f32 %v1705_v23, %v1702_v57 }
0x1182   :  { %v1309_v4 = vpop.xlane.xlu0 %1308 }
0x1183   :  { %v1311_v3 = vmul.f32 %v1309_v4, %v4681_v11 }
0x1185   :  { %v5221_v9 = vsub.f32 %v1303_v36, %v1311_v3 }
0x1187   :  { %v1315_v6 = vmul.f32 %v5221_v9, %v5221_v9 }
0x1189   :  { %v1319_v10 = vsel %vm60_vm0, %v1315_v6, 0.0 }
0x118a   :  { %1320 = vadd.xlane.f32.xlu2 %v1319_v10 }
0x118c   :  { %v1731_v19 = vpop.f32.mrf.mxu2 }
0x118d   :  { %v1737_v21 = vadd.f32 %v1731_v19, %v1706_v27 }
0x1194   :  { %v1734_v18 = vpop.f32.mrf.mxu2 }
0x1195   :  { %v1306_v2 = vpop.xlane.xlu2 %1305  ;;  %v1738_v17 = vadd.f32 %v1734_v18, %v1707_v29 }
0x1196   :  { %v1310_v16 = vmul.f32 %v1306_v2, %v4681_v11  ;;  %v1762_v63 = vpop.f32.mrf.mxu1  ;;  %v47_v2 = vld [vmem:[%s6013_s5 + $0x350] sm:$0xff] }
0x1197   :  { %v1768_v8 = vadd.f32 %v1762_v63, %v1737_v21  ;;  %v1351_v14 = vperm.slane %v47_v2, 1 }
0x1198   :  { %v5227_v5 = vsub.f32 %v1302_v61, %v1310_v16 }
0x119a   :  { %v1314_v20 = vmul.f32 %v5227_v5, %v5227_v5 }
0x119c   :  { %v1316_v49 = vsel %vm60_vm0, %v1314_v20, 0.0 }
0x119d   :  { %1317 = vadd.xlane.f32.xlu1 %v1316_v49  ;;  %v1348_v49 = vperm.slane %v47_v2, 0 }
0x119e   :  { %v1765_v32 = vpop.f32.mrf.mxu1 }
0x119f   :  { %v1769_v33 = vadd.f32 %v1765_v32, %v1738_v17 }
0x11a2   :  { %4063 = vrot.lane.b32.xlu2 %v4062_v25, %s4407_s13 }
0x11ac   :  { %v1793_v22 = vpop.f32.mrf.mxu2 }
0x11ad   :  { %v1799_v7 = vadd.f32 %v1793_v22, %v1768_v8 }
0x11af   :  { %v1801_v31 = vadd.f32 %v1799_v7, %v4986_v39 }
0x11b1   :  { %v1803_v37 = vsel %vm60_vm0, %v1801_v31, 0.0 }
0x11b2   :  { %1804 = vadd.xlane.f32.xlu0 %v1803_v37 }
0x11b4   :  { %v1796_v35 = vpop.f32.mrf.mxu2 }
0x11b5   :  { %v1800_v26 = vadd.f32 %v1796_v35, %v1769_v33 }
0x11b7   :  { %v1802_v44 = vadd.f32 %v1800_v26, %v4993_v41 }
0x11b9   :  { %v1806_v43 = vsel %vm60_vm0, %v1802_v44, 0.0 }
0x11ba   :  { %1807 = vadd.xlane.f32.xlu1 %v1806_v43  ;;  %v1847_v43 = vperm.slane %v5011_v34, 2 }
0x11c6   :  { %4068 = vrot.lane.b32.xlu0 %v4067_v45, %s4407_s13 }
0x11fd   :  { %v1321_v30 = vpop.xlane.xlu2 %1320 }
0x11fe   :  { %v1323_v40 = vmul.f32 %v1321_v30, %v4681_v11 }
0x1200   :  { %v1325_v41 = vadd.f32 1e-05, %v1323_v40 }
0x1202   :  { %vm1342_vm6 = vweird.f32 %v1325_v41 }
0x1205   :  { %v4064_v46 = vpop.permute.xlu2 %4063 }
0x1206   :  { %v4066_v47 = vunpack.i.h.bf16 %v4064_v46  ;;  %v4065_v48 = vunpack.i.l.bf16 %v4064_v46  ;;  %v1850_v46 = vperm.slane %v5011_v34, 3 }
0x1208   :  { %1929 = vmatpush.msra.mxu2 %v4065_v48 }
0x120a   :  { %1930 = vmatpush.msra.mxu2 %v4066_v47 }
0x1210   :  { %v1318_v15 = vpop.xlane.xlu1 %1317 }
0x1211   :  { %v1322_v39 = vmul.f32 %v1318_v15, %v4681_v11 }
0x1213   :  { %v1324_v36 = vadd.f32 1e-05, %v1322_v39 }
0x1215   :  { %4256 = vrsqrt.f32 %v1324_v36  ;;  %vm1332_vm3 = vweird.f32 %v1324_v36 }
0x1216   :  { %4258 = vrsqrt.f32 %v1325_v41 }
0x121b   :  { %v4257_v38 = vpop.eup %4256 }
0x121c   :  { %v1327_v50 = vmul.f32 %v4257_v38, %v1324_v36  ;;  %v4259_v54 = vpop.eup %4258  ;;  %vm1333_vm15 = vweird.f32 %v4257_v38 }
0x121d   :  { %v1337_v55 = vmul.f32 %v4259_v54, %v1325_v41  ;;  %vm1334_vm4 = vmor %vm1332_vm3, %vm1333_vm15  ;;  %vm1343_vm5 = vweird.f32 %v4259_v54 }
0x121e   :  { %v1328_v52 = vmul.f32 %v4257_v38, %v1327_v50  ;;  %vm1344_vm7 = vmor %vm1342_vm6, %vm1343_vm5 }
0x121f   :  { %v1338_v60 = vmul.f32 %v4259_v54, %v1337_v55 }
0x1220   :  { %v1329_v1 = vmul.f32 0.5, %v1328_v52 }
0x1221   :  { %v1339_v62 = vmul.f32 0.5, %v1338_v60 }
0x1222   :  { %v1330_v56 = vsub.f32 1.5, %v1329_v1 }
0x1223   :  { %v1340_v6 = vsub.f32 1.5, %v1339_v62 }
0x1224   :  { %v1331_v58 = vmul.f32 %v4257_v38, %v1330_v56 }
0x1225   :  { %v1805_v42 = vpop.xlane.xlu0 %1804  ;;  %v1341_v20 = vmul.f32 %v4259_v54, %v1340_v6 }
0x1226   :  { %v1809_v53 = vmul.f32 %v1805_v42, %v4681_v11  ;;  %v1335_v10 = vsel %vm1334_vm4, %v4257_v38, %v1331_v58 }
0x1227   :  { %v1346_v16 = vmul.f32 %v1335_v10, %v5227_v5  ;;  %v1345_v18 = vsel %vm1344_vm7, %v4259_v54, %v1341_v20 }
0x1228   :  { %v5254_v59 = vsub.f32 %v1801_v31, %v1809_v53  ;;  %v1347_v25 = vmul.f32 %v1345_v18, %v5221_v9 }
0x1229   :  { %v1349_v57 = vmul.f32 %v1348_v49, %v1346_v16 }
0x122a   :  { %v1813_v61 = vmul.f32 %v5254_v59, %v5254_v59  ;;  %v1350_v5 = vmul.f32 %v1348_v49, %v1347_v25  ;;  %v39_v49 = vld [vmem:[%s6018_s4] sm:$0xff] }
0x122b   :  { %v5269_v27 = vadd.f32 %v1351_v14, %v1349_v57 }
0x122c   :  { %v1815_v51 = vsel %vm60_vm0, %v1813_v61, 0.0  ;;  %v5274_v21 = vadd.f32 %v1351_v14, %v1350_v5  ;;  %v41_v5 = vld [vmem:[%s6018_s4 + $0x10] sm:$0xff] }
0x122d   :  { %1816 = vadd.xlane.f32.xlu1 %v1815_v51  ;;  %v1808_v0 = vpop.xlane.xlu1 %1807 }
0x122e   :  { %v1810_v4 = vmul.f32 %v1808_v0, %v4681_v11 }
0x1230   :  { %v5260_v3 = vsub.f32 %v1802_v44, %v1810_v4 }
0x1232   :  { %v1814_v13 = vmul.f32 %v5260_v3, %v5260_v3 }
0x1234   :  { %v1818_v19 = vsel %vm60_vm0, %v1814_v13, 0.0 }
0x1235   :  { %1819 = vadd.xlane.f32.xlu1 %v1818_v19 }
0x1238   :  { %v4069_v23 = vpop.permute.xlu0 %4068 }
0x1239   :  { %v4071_v63 = vunpack.i.h.bf16 %v4069_v23  ;;  %v4070_v24 = vunpack.i.l.bf16 %v4069_v23 }
0x123b   :  { %1931 = vmatpush.msra.mxu2 %v4070_v24 }
0x123d   :  { %1932 = vmatpush.msra.mxu2 %v4071_v63  ;;  %v40_v63 = vld [vmem:[%s6018_s4 + $0x8] sm:$0xff] }
0x123e   :  { %3882 = vmatmul.msk.f32.vlgmr.msra.gmra.mxu2 %vm60_vm0, %v5269_v27 }
0x1246   :  { %3883 = vmatmul.msk.f32.gmra.mxu2 %vm60_vm0, %v5274_v21 }
0x124e   :  { %1908 = vrot.lane.b32.xlu1 %v1861_v28, %s4407_s13 }
0x12a0   :  { %v1817_v8 = vpop.xlane.xlu1 %1816 }
0x12a1   :  { %v1821_v22 = vmul.f32 %v1817_v8, %v4681_v11 }
0x12a3   :  { %v1823_v12 = vadd.f32 1e-05, %v1821_v22 }
0x12a5   :  { %4260 = vrsqrt.f32 %v1823_v12  ;;  %vm1831_vm9 = vweird.f32 %v1823_v12 }
0x12a8   :  { %v1820_v9 = vpop.xlane.xlu1 %1819 }
0x12a9   :  { %v1822_v7 = vmul.f32 %v1820_v9, %v4681_v11 }
0x12ab   :  { %v4261_v29 = vpop.eup %4260  ;;  %v1824_v31 = vadd.f32 1e-05, %v1822_v7 }
0x12ac   :  { %v1826_v32 = vmul.f32 %v4261_v29, %v1823_v12  ;;  %vm1832_vm8 = vweird.f32 %v4261_v29  ;;  %v42_v12 = vld [vmem:[%s6018_s4 + $0x18] sm:$0xff] }
0x12ad   :  { %4262 = vrsqrt.f32 %v1824_v31  ;;  %vm1833_vm10 = vmor %vm1831_vm9, %vm1832_vm8  ;;  %vm1841_vm12 = vweird.f32 %v1824_v31 }
0x12ae   :  { %v1827_v17 = vmul.f32 %v4261_v29, %v1826_v32 }
0x12b0   :  { %v1828_v37 = vmul.f32 0.5, %v1827_v17 }
0x12b2   :  { %v1829_v33 = vsub.f32 1.5, %v1828_v37 }
0x12b3   :  { %v4263_v35 = vpop.eup %4262 }
0x12b4   :  { %v1830_v26 = vmul.f32 %v4261_v29, %v1829_v33  ;;  %v1836_v44 = vmul.f32 %v4263_v35, %v1824_v31  ;;  %vm1842_vm11 = vweird.f32 %v4263_v35 }
0x12b5   :  { %vm1843_vm13 = vmor %vm1841_vm12, %vm1842_vm11 }
0x12b6   :  { %v1834_v45 = vsel %vm1833_vm10, %v4261_v29, %v1830_v26  ;;  %v1837_v30 = vmul.f32 %v4263_v35, %v1836_v44  ;;  %v43_v44 = vld [vmem:[%s6018_s4 + $0x20] sm:$0xff] }
0x12b7   :  { %v1845_v15 = vmul.f32 %v1834_v45, %v5254_v59 }
0x12b8   :  { %v1838_v39 = vmul.f32 0.5, %v1837_v30  ;;  %v45_v30 = vld [vmem:[%s6018_s4 + $0x30] sm:$0xff] }
0x12b9   :  { %v1848_v47 = vmul.f32 %v1847_v43, %v1845_v15 }
0x12ba   :  { %v1839_v48 = vsub.f32 1.5, %v1838_v39 }
0x12bb   :  { %v5285_v36 = vadd.f32 %v1850_v46, %v1848_v47 }
0x12bc   :  { %v1840_v40 = vmul.f32 %v4263_v35, %v1839_v48 }
0x12bd   :  { %3880 = vmatmul.msk.f32.vlgmr.msra.gmra.mxu1 %vm60_vm0, %v5285_v36 }
0x12be   :  { %v1844_v41 = vsel %vm1843_vm13, %v4263_v35, %v1840_v40 }
0x12bf   :  { %v1846_v38 = vmul.f32 %v1844_v41, %v5260_v3  ;;  %v46_v41 = vld [vmem:[%s6018_s4 + $0x38] sm:$0xff] }
0x12c0   :  { %v1909_v50 = vpop.permute.xlu1 %1908 }
0x12c1   :  { %v1934_v52 = vpop.f32.mrf.mxu2  ;;  %v1849_v54 = vmul.f32 %v1847_v43, %v1846_v38 }
0x12c2   :  { %v5290_v55 = vadd.f32 %v1934_v52, %v1909_v50 }
0x12c3   :  { %v5292_v34 = vadd.f32 %v1850_v46, %v1849_v54  ;;  %v44_v46 = vld [vmem:[%s6018_s4 + $0x28] sm:$0xff] }
0x12c4   :  { %1964 = vrot.lane.b32.xlu2 %v5290_v55, %s4406_s12 }
0x12c5   :  { %3881 = vmatmul.msk.f32.gmra.mxu1 %vm60_vm0, %v5292_v34 }
0x12c9   :  { %v1937_v1 = vpop.f32.mrf.mxu2 }
0x12ca   :  { %v5298_v42 = vadd.f32 %v1937_v1, %v1909_v50 }
0x12cc   :  { %1966 = vrot.lane.b32.xlu0 %v5298_v42, %s4406_s12  ;;  %1960 = vrot.lane.b32.xlu2 %v5290_v55, %s4405_s0  ;;  %v4087_v1 = vpack.i.bf16 %v5290_v55, %v5298_v42 }
0x12d4   :  { %1962 = vrot.lane.b32.xlu0 %v5298_v42, %s4405_s0  ;;  %1956 = vrot.lane.b32.xlu2 %v5290_v55, %s4404_s11 }
0x12dc   :  { %1958 = vrot.lane.b32.xlu0 %v5298_v42, %s4404_s11 }
0x131e   :  { %v1965_v60 = vpop.permute.xlu2 %1964 }
0x1326   :  { %v1961_v58 = vpop.permute.xlu2 %1960 }
0x132e   :  { %v5324_v6 = vpop.permute.xlu2 %1956 }
0x133a   :  { %v1885_v53 = vpop.f32.mrf.mxu1 }
0x133b   :  { %v1886_v59 = vadd.f32 %v1885_v53, %v1861_v28 }
0x133d   :  { %1942 = vrot.lane.b32.xlu1 %v1886_v59, %s4404_s11  ;;  %1946 = vrot.lane.b32.xlu2 %v1886_v59, %s4405_s0 }
0x133e   :  { %v1967_v56 = vpop.permute.xlu0 %1966 }
0x133f   :  { %v4072_v61 = vpack.i.bf16 %v1965_v60, %v1967_v56  ;;  %3884 = vmatpush.xpose.msk.msra.mxu3 %vm120_vm1, %v1967_v56 }
0x1342   :  { %v1888_v51 = vpop.f32.mrf.mxu1 }
0x1343   :  { %v1889_v62 = vadd.f32 %v1888_v51, %v1861_v28  ;;  %3885 = vmatpush.xpose.msk.msra.mxu3 %vm120_vm1, %v1965_v60 }
0x1345   :  { %1948 = vrot.lane.b32.xlu1 %v1889_v62, %s4405_s0  ;;  %1944 = vrot.lane.b32.xlu0 %v1889_v62, %s4404_s11 }
0x1346   :  { %1952 = vrot.lane.b32.xlu2 %v1889_v62, %s4406_s12  ;;  %v1963_v0 = vpop.permute.xlu0 %1962 }
0x1347   :  { %v4077_v4 = vpack.i.bf16 %v1961_v58, %v1963_v0  ;;  %3886 = vmatpush.xpose.msk.msra.mxu3 %vm120_vm1, %v1963_v0 }
0x134b   :  { %3887 = vmatpush.xpose.msk.msra.mxu3 %vm120_vm1, %v1961_v58 }
0x134d   :  { %1950 = vrot.lane.b32.xlu0 %v1886_v59, %s4406_s12 }
0x134e   :  { %v5320_v3 = vpop.permute.xlu0 %1958 }
0x134f   :  { %3888 = vmatpush.xpose.msk.msra.mxu3 %vm120_vm1, %v5320_v3  ;;  %v4082_v54 = vpack.i.bf16 %v5324_v6, %v5320_v3 }
0x1353   :  { %3889 = vmatpush.xpose.msk.msra.mxu3 %vm120_vm1, %v5324_v6 }
0x1357   :  { %3890 = vmatpush.xpose.msk.msra.mxu3 %vm120_vm1, %v5298_v42 }
0x135b   :  { %3891 = vmatpush.xpose.msk.msra.mxu3 %vm120_vm1, %v5290_v55 }
0x135e   :  { %3892 = vmatmul.msk.f32.vlgmr.msra.gmra.mxu3 %vm120_vm1, %v1886_v59 }
0x1366   :  { %3893 = vmatmul.msk.f32.gmra.mxu3 %vm120_vm1, %v1889_v62 }
0x1397   :  { %v1947_v2 = vpop.permute.xlu2 %1946 }
0x13a0   :  { %v1953_v20 = vpop.permute.xlu2 %1952 }
0x13af   :  { %v1943_v10 = vpop.permute.xlu1 %1942 }
0x13b0   :  { %3894 = vmatmul.msk.f32.gmra.mxu3 %vm120_vm1, %v1943_v10 }
0x13b7   :  { %v1945_v13 = vpop.permute.xlu0 %1944  ;;  %v1949_v16 = vpop.permute.xlu1 %1948 }
0x13b8   :  { %3895 = vmatmul.msk.f32.gmra.mxu3 %vm120_vm1, %v1945_v13 }
0x13bf   :  { %v1951_v19 = vpop.permute.xlu0 %1950 }
0x13c0   :  { %3896 = vmatmul.msk.f32.gmra.mxu3 %vm120_vm1, %v1947_v2 }
0x13c8   :  { %3897 = vmatmul.msk.f32.gmra.mxu3 %vm120_vm1, %v1949_v16 }
0x13d0   :  { %3898 = vmatmul.msk.f32.gmra.mxu3 %vm120_vm1, %v1951_v19 }
0x13d8   :  { %3899 = vmatmul.msk.f32.gmra.mxu3 %vm120_vm1, %v1953_v20 }
0x13e1   :  { %v2017_v57 = vpop.f32.mrf.mxu3 }
0x13e2   :  { %v2018_v23 = vadd.f32 %v2017_v57, %v39_v49 }
0x13e4   :  { %v2041_v18 = vsel %vm194_vm2, %v2018_v23, -inf }
0x13e5   :  { %2042 = vmax.xlane.f32.xlu1 %v2041_v18 }
0x13e9   :  { %v2020_v24 = vpop.f32.mrf.mxu3 }
0x13ea   :  { %v2021_v14 = vadd.f32 %v2020_v24, %v40_v63 }
0x13ec   :  { %v2044_v25 = vsel %vm194_vm2, %v2021_v14, -inf }
0x13ed   :  { %2045 = vmax.xlane.f32.xlu0 %v2044_v25 }
0x1433   :  { %v2023_v28 = vpop.f32.mrf.mxu3 }
0x1434   :  { %v2024_v8 = vadd.f32 %v2023_v28, %v41_v5 }
0x1436   :  { %v2047_v22 = vsel %vm194_vm2, %v2024_v8, -inf }
0x1437   :  { %2048 = vmax.xlane.f32.xlu2 %v2047_v22 }
0x143b   :  { %v2026_v9 = vpop.f32.mrf.mxu3 }
0x143c   :  { %v2027_v7 = vadd.f32 %v2026_v9, %v42_v12 }
0x143e   :  { %v2050_v29 = vsel %vm194_vm2, %v2027_v7, -inf }
0x143f   :  { %2051 = vmax.xlane.f32.xlu1 %v2050_v29 }
0x1443   :  { %v2029_v32 = vpop.f32.mrf.mxu3 }
0x1444   :  { %v2030_v43 = vadd.f32 %v2029_v32, %v43_v44 }
0x1446   :  { %v2053_v45 = vsel %vm194_vm2, %v2030_v43, -inf }
0x144b   :  { %v2032_v35 = vpop.f32.mrf.mxu3 }
0x144c   :  { %v2033_v47 = vadd.f32 %v2032_v35, %v44_v46 }
0x144e   :  { %v2056_v40 = vsel %vm194_vm2, %v2033_v47, -inf }
0x144f   :  { %4078 = vrot.lane.b32.xlu2 %v4077_v4, %s4407_s13 }
0x1453   :  { %v2035_v15 = vpop.f32.mrf.mxu3 }
0x1454   :  { %v2036_v39 = vadd.f32 %v2035_v15, %v45_v30 }
0x1456   :  { %v2059_v48 = vsel %vm194_vm2, %v2036_v39, -inf }
0x1458   :  { %4073 = vrot.lane.b32.xlu1 %v4072_v61, %s4407_s13  ;;  %v2043_v31 = vpop.xlane.xlu1 %2042 }
0x1459   :  { %v2065_v17 = vsub.f32 %v2018_v23, %v2043_v31 }
0x145b   :  { %v2073_v37 = vmul.f32 1.442695, %v2065_v17  ;;  %v2038_v38 = vpop.f32.mrf.mxu3 }
0x145c   :  { %v2039_v50 = vadd.f32 %v2038_v38, %v46_v41 }
0x145d   :  { %4264 = vpow2.f32 %v2073_v37 }
0x145e   :  { %v2062_v52 = vsel %vm194_vm2, %v2039_v50, -inf }
0x1460   :  { %v2046_v53 = vpop.xlane.xlu0 %2045 }
0x1461   :  { %v2066_v59 = vsub.f32 %v2021_v14, %v2046_v53 }
0x1463   :  { %v5358_v33 = vpop.eup %4264  ;;  %v2075_v60 = vmul.f32 1.442695, %v2066_v59  ;;  %v1857_v59 = vld [vmem:[%s6013_s5 + $0x1b0] sm:$0xff] }
0x1464   :  { %v2089_v26 = vsel %vm194_vm2, %v5358_v33, 0.0  ;;  %2239 = vmatpush.msrb.mxu2 %v1857_v59 }
0x1465   :  { %2090 = vadd.xlane.f32.xlu0 %v2089_v26  ;;  %4266 = vpow2.f32 %v2075_v60 }
0x146b   :  { %v5384_v0 = vpop.eup %4266 }
0x146c   :  { %v2092_v42 = vsel %vm194_vm2, %v5384_v0, 0.0 }
0x146d   :  { %2054 = vmax.xlane.f32.xlu0 %v2053_v45 }
0x1475   :  { %2060 = vmax.xlane.f32.xlu0 %v2059_v48 }
0x1478   :  { %2057 = vmax.xlane.f32.xlu2 %v2056_v40 }
0x1482   :  { %2063 = vmax.xlane.f32.xlu1 %v2062_v52 }
0x1489   :  { %4083 = vrot.lane.b32.xlu0 %v4082_v54, %s4407_s13 }
0x1490   :  { %4088 = vrot.lane.b32.xlu2 %v4087_v1, %s4407_s13 }
0x14aa   :  { %v2049_v56 = vpop.xlane.xlu2 %2048 }
0x14ab   :  { %v2067_v61 = vsub.f32 %v2024_v8, %v2049_v56 }
0x14ad   :  { %v2077_v51 = vmul.f32 1.442695, %v2067_v61 }
0x14af   :  { %4268 = vpow2.f32 %v2077_v51 }
0x14b2   :  { %v2052_v62 = vpop.xlane.xlu1 %2051  ;;  %v4079_v16 = vpop.permute.xlu2 %4078 }
0x14b3   :  { %v2068_v58 = vsub.f32 %v2027_v7, %v2052_v62  ;;  %v4080_v20 = vunpack.i.l.bf16 %v4079_v16  ;;  %v4081_v49 = vunpack.i.h.bf16 %v4079_v16 }
0x14b5   :  { %v5386_v4 = vpop.eup %4268  ;;  %v2079_v3 = vmul.f32 1.442695, %v2068_v58 }
0x14b6   :  { %v2095_v55 = vsel %vm194_vm2, %v5386_v4, 0.0 }
0x14b7   :  { %4270 = vpow2.f32 %v2079_v3  ;;  %2096 = vadd.xlane.f32.xlu0 %v2095_v55 }
0x14b9   :  { %2093 = vadd.xlane.f32.xlu2 %v2092_v42 }
0x14bd   :  { %v5392_v6 = vpop.eup %4270 }
0x14be   :  { %v2098_v10 = vsel %vm194_vm2, %v5392_v6, 0.0 }
0x14bf   :  { %2099 = vadd.xlane.f32.xlu1 %v2098_v10  ;;  %v1858_v10 = vld [vmem:[%s6013_s5 + $0x1b8] sm:$0xff] }
0x14c0   :  { %2271 = vmatpush.msrb.mxu0 %v1858_v10 }
0x14ca   :  { %v4074_v13 = vpop.permute.xlu1 %4073 }
0x14cb   :  { %v4075_v2 = vunpack.i.l.bf16 %v4074_v13  ;;  %v4076_v19 = vunpack.i.h.bf16 %v4074_v13 }
0x14cd   :  { %2185 = vmatpush.msrb.mxu1 %v4075_v2 }
0x14cf   :  { %2186 = vmatpush.msrb.mxu1 %v4076_v19  ;;  %v1859_v19 = vld [vmem:[%s6013_s5 + $0x1c0] sm:$0xff] }
0x14d0   :  { %2302 = vmatpush.msra.mxu2 %v1859_v19 }
0x14d1   :  { %2187 = vmatpush.msrb.mxu1 %v4080_v20  ;;  %v1860_v20 = vld [vmem:[%s6013_s5 + $0x1c8] sm:$0xff] }
0x14d2   :  { %2333 = vmatpush.msra.mxu0 %v1860_v20 }
0x14d3   :  { %2188 = vmatpush.msrb.mxu1 %v4081_v49 }
0x14d8   :  { %v2091_v57 = vpop.xlane.xlu0 %2090 }
0x14e0   :  { %v2055_v23 = vpop.xlane.xlu0 %2054 }
0x14e1   :  { %v2069_v18 = vsub.f32 %v2030_v43, %v2055_v23 }
0x14e3   :  { %v2081_v63 = vmul.f32 1.442695, %v2069_v18 }
0x14e5   :  { %4272 = vpow2.f32 %v2081_v63 }
0x14e8   :  { %v2061_v24 = vpop.xlane.xlu0 %2060 }
0x14e9   :  { %v2071_v14 = vsub.f32 %v2036_v39, %v2061_v24 }
0x14eb   :  { %v4273_v25 = vpop.eup %4272  ;;  %v2085_v5 = vmul.f32 1.442695, %v2071_v14  ;;  %v2058_v28 = vpop.xlane.xlu2 %2057 }
0x14ec   :  { %v2070_v8 = vsub.f32 %v2033_v47, %v2058_v28  ;;  %v2101_v22 = vsel %vm194_vm2, %v4273_v25, 0.0 }
0x14ed   :  { %4274 = vpow2.f32 %v2085_v5  ;;  %2102 = vadd.xlane.f32.xlu1 %v2101_v22 }
0x14ee   :  { %v2083_v12 = vmul.f32 1.442695, %v2070_v8 }
0x14f0   :  { %4276 = vpow2.f32 %v2083_v12 }
0x14f1   :  { %4278 = vrcp.f32 %v2091_v57 }
0x14f3   :  { %v4275_v9 = vpop.eup %4274  ;;  %v4089_v44 = vpop.permute.xlu2 %4088 }
0x14f4   :  { %v2107_v7 = vsel %vm194_vm2, %v4275_v9, 0.0  ;;  %v4090_v15 = vunpack.i.l.bf16 %v4089_v44  ;;  %v4091_v39 = vunpack.i.h.bf16 %v4089_v44 }
0x14f5   :  { %v2064_v29 = vpop.xlane.xlu1 %2063  ;;  %2108 = vadd.xlane.f32.xlu0 %v2107_v7 }
0x14f6   :  { %v4277_v31 = vpop.eup %4276  ;;  %v2072_v32 = vsub.f32 %v2039_v50, %v2064_v29 }
0x14f7   :  { %v2104_v17 = vsel %vm194_vm2, %v4277_v31, 0.0  ;;  %v4279_v45 = vpop.eup %4278 }
0x14f8   :  { %v2087_v37 = vmul.f32 1.442695, %v2072_v32  ;;  %2105 = vadd.xlane.f32.xlu2 %v2104_v17  ;;  %v2121_v47 = vmul.f32 %v4279_v45, %v5358_v33 }
0x14fa   :  { %4280 = vpow2.f32 %v2087_v37 }
0x14fb   :  { %v4084_v35 = vpop.permute.xlu0 %4083 }
0x14fc   :  { %v4085_v26 = vunpack.i.l.bf16 %v4084_v35  ;;  %v4086_v43 = vunpack.i.h.bf16 %v4084_v35 }
0x14fe   :  { %2189 = vmatpush.msrb.mxu1 %v4085_v26 }
0x1500   :  { %v4281_v30 = vpop.eup %4280  ;;  %2190 = vmatpush.msrb.mxu1 %v4086_v43 }
0x1501   :  { %v2110_v46 = vsel %vm194_vm2, %v4281_v30, 0.0 }
0x1502   :  { %2111 = vadd.xlane.f32.xlu1 %v2110_v46  ;;  %2191 = vmatpush.msrb.mxu1 %v4090_v15 }
0x1504   :  { %2192 = vmatpush.msrb.mxu1 %v4091_v39 }
0x1505   :  { %3900 = vmatmul.msk.f32.vlgmr.msrb.gmra.mxu1 %vm194_vm2, %v2121_v47 }
0x152a   :  { %v2097_v40 = vpop.xlane.xlu0 %2096 }
0x152c   :  { %v2094_v48 = vpop.xlane.xlu2 %2093 }
0x152d   :  { %4282 = vrcp.f32 %v2094_v48 }
0x152e   :  { %4284 = vrcp.f32 %v2097_v40 }
0x1532   :  { %v2100_v50 = vpop.xlane.xlu1 %2099 }
0x1533   :  { %v4283_v41 = vpop.eup %4282  ;;  %4286 = vrcp.f32 %v2100_v50 }
0x1534   :  { %v2122_v38 = vmul.f32 %v4283_v41, %v5384_v0  ;;  %v4285_v52 = vpop.eup %4284 }
0x1535   :  { %v2123_v54 = vmul.f32 %v4285_v52, %v5386_v4  ;;  %v2397_v52 = vld [vmem:[%s6013_s5 + $0x1e0] sm:$0xff] }
0x1536   :  { %3901 = vmatmul.msk.f32.gmra.mxu1 %vm194_vm2, %v2122_v38 }
0x1539   :  { %v4287_v33 = vpop.eup %4286 }
0x153a   :  { %v2124_v1 = vmul.f32 %v4287_v33, %v5392_v6  ;;  %v2395_v33 = vld [vmem:[%s6013_s5 + $0x1d0] sm:$0xff] }
0x153e   :  { %3902 = vmatmul.msk.f32.gmra.mxu1 %vm194_vm2, %v2123_v54  ;;  %v2396_v54 = vld [vmem:[%s6013_s5 + $0x1d8] sm:$0xff] }
0x1546   :  { %3903 = vmatmul.msk.f32.gmra.mxu1 %vm194_vm2, %v2124_v1 }
0x1560   :  { %v2103_v53 = vpop.xlane.xlu1 %2102 }
0x1561   :  { %4288 = vrcp.f32 %v2103_v53 }
0x1567   :  { %v4289_v60 = vpop.eup %4288 }
0x1568   :  { %v2125_v56 = vmul.f32 %v4289_v60, %v4273_v25  ;;  %v2109_v51 = vpop.xlane.xlu0 %2108  ;;  %v5435_v25 = vld [vmem:[%s6013_s5 + $0x230] sm:$0xff]  ;;  %v2438_v60 = vld [vmem:[%s6013_s5 + $0x228] sm:$0xff] }
0x1569   :  { %v2247_v5 = vperm.slane %v5435_v25, 5  ;;  %v2389_v19 = vperm.slane %v5435_v25, 6 }
0x156a   :  { %3904 = vmatmul.msk.f32.gmra.mxu1 %vm194_vm2, %v2125_v56  ;;  %v2437_v56 = vld [vmem:[%s6013_s5 + $0x220] sm:$0xff] }
0x156b   :  { %v2106_v61 = vpop.xlane.xlu2 %2105 }
0x156c   :  { %4290 = vrcp.f32 %v2106_v61  ;;  %v2436_v61 = vld [vmem:[%s6013_s5 + $0x218] sm:$0xff] }
0x156d   :  { %4292 = vrcp.f32 %v2109_v51 }
0x1572   :  { %v4291_v62 = vpop.eup %4290 }
0x1573   :  { %v2126_v58 = vmul.f32 %v4291_v62, %v4277_v31  ;;  %v4293_v4 = vpop.eup %4292 }
0x1574   :  { %v2127_v3 = vmul.f32 %v4293_v4, %v4275_v9 }
0x1575   :  { %3905 = vmatmul.msk.f32.gmra.mxu1 %vm194_vm2, %v2126_v58  ;;  %v2112_v0 = vpop.xlane.xlu1 %2111  ;;  %v2435_v58 = vld [vmem:[%s6013_s5 + $0x210] sm:$0xff] }
0x1576   :  { %4294 = vrcp.f32 %v2112_v0 }
0x157c   :  { %v4295_v55 = vpop.eup %4294 }
0x157d   :  { %3906 = vmatmul.msk.f32.gmra.mxu1 %vm194_vm2, %v2127_v3  ;;  %v2128_v6 = vmul.f32 %v4295_v55, %v4281_v30  ;;  %v2434_v3 = vld [vmem:[%s6013_s5 + $0x208] sm:$0xff] }
0x1582   :  { %v2194_v42 = vpop.f32.mrf.mxu1 }
0x1583   :  { %3908 = vmatmul.msk.f32.vlgmr.msrb.gmra.mxu2 %vm120_vm1, %v2194_v42 }
0x1585   :  { %3907 = vmatmul.msk.f32.gmra.mxu1 %vm194_vm2, %v2128_v6 }
0x15b3   :  { %v2197_v13 = vpop.f32.mrf.mxu1 }
0x15b4   :  { %3909 = vmatmul.msk.f32.gmra.mxu2 %vm120_vm1, %v2197_v13 }
0x15bb   :  { %v2200_v2 = vpop.f32.mrf.mxu1 }
0x15bc   :  { %3910 = vmatmul.msk.f32.vlgmr.msrb.gmra.mxu0 %vm120_vm1, %v2200_v2 }
0x15bd   :  { %2454 = vmatpush.msrb.mxu0 %v2438_v60  ;;  %v2525_v60 = vld [vmem:[%s6013_s5 + $0x250] sm:$0xff] }
0x15bf   :  { %2455 = vmatpush.msrb.mxu0 %v2437_v56  ;;  %v2524_v56 = vld [vmem:[%s6013_s5 + $0x248] sm:$0xff] }
0x15c1   :  { %2456 = vmatpush.msrb.mxu0 %v2436_v61  ;;  %v2523_v61 = vld [vmem:[%s6013_s5 + $0x240] sm:$0xff] }
0x15c3   :  { %v2203_v16 = vpop.f32.mrf.mxu1  ;;  %2457 = vmatpush.msrb.mxu0 %v2435_v58 }
0x15c4   :  { %3911 = vmatmul.msk.f32.gmra.mxu0 %vm120_vm1, %v2203_v16 }
0x15c5   :  { %2458 = vmatpush.msrb.mxu0 %v2434_v3 }
0x15e7   :  { %v2206_v49 = vpop.f32.mrf.mxu1 }
0x15e8   :  { %3912 = vmatmul.msk.f32.vlgmr.msra.gmra.mxu2 %vm120_vm1, %v2206_v49 }
0x15f2   :  { %v2209_v57 = vpop.f32.mrf.mxu1 }
0x15f3   :  { %3913 = vmatmul.msk.f32.gmra.mxu2 %vm120_vm1, %v2209_v57  ;;  %v2392_v57 = vperm.slane %v5435_v25, 7  ;;  %v2433_v25 = vld [vmem:[%s6013_s5 + $0x200] sm:$0xff] }
0x15f4   :  { %2459 = vmatpush.msrb.mxu0 %v2433_v25 }
0x15fa   :  { %v2212_v23 = vpop.f32.mrf.mxu1 }
0x15fb   :  { %3914 = vmatmul.msk.f32.vlgmr.msra.gmra.mxu0 %vm120_vm1, %v2212_v23 }
0x1602   :  { %v2215_v18 = vpop.f32.mrf.mxu1 }
0x1603   :  { %3915 = vmatmul.msk.f32.gmra.mxu0 %vm120_vm1, %v2215_v18 }
0x1606   :  { %v2241_v63 = vpop.f32.mrf.mxu2 }
0x1607   :  { %v2248_v8 = vadd.f32 %v2247_v5, %v2241_v63 }
0x1637   :  { %v2244_v14 = vpop.f32.mrf.mxu2 }
0x1638   :  { %v2249_v31 = vadd.f32 %v2247_v5, %v2244_v14 }
0x1639   :  { %v2273_v24 = vpop.f32.mrf.mxu0 }
0x163a   :  { %v2279_v12 = vadd.f32 %v2273_v24, %v2248_v8 }
0x1641   :  { %v2276_v28 = vpop.f32.mrf.mxu0 }
0x1642   :  { %v2280_v37 = vadd.f32 %v2276_v28, %v2249_v31 }
0x166b   :  { %v2304_v22 = vpop.f32.mrf.mxu2 }
0x166c   :  { %v2310_v9 = vadd.f32 %v2304_v22, %v2279_v12 }
0x1676   :  { %v2307_v17 = vpop.f32.mrf.mxu2 }
0x1677   :  { %v2311_v26 = vadd.f32 %v2307_v17, %v2280_v37 }
0x1678   :  { %v2335_v7 = vpop.f32.mrf.mxu0 }
0x1679   :  { %v2341_v29 = vadd.f32 %v2335_v7, %v2310_v9  ;;  %v2432_v9 = vld [vmem:[%s6013_s5 + $0x1f8] sm:$0xff]  ;;  %v2431_v7 = vld [vmem:[%s6013_s5 + $0x1f0] sm:$0xff] }
0x167a   :  { %2460 = vmatpush.msrb.mxu0 %v2432_v9  ;;  %v5530_v9 = vld [vmem:[%s6013_s5 + $0x320] sm:$0xff] }
0x167b   :  { %v2343_v32 = vadd.f32 %v2341_v29, %v5285_v36  ;;  %v5491_v29 = vld [vmem:[%s6013_s5 + $0x238] sm:$0xff] }
0x167c   :  { %2461 = vmatpush.msrb.mxu0 %v2431_v7  ;;  %v2399_v31 = vperm.slane %v5491_v29, 0  ;;  %v2531_v7 = vperm.slane %v5530_v9, 0 }
0x167d   :  { %v2345_v35 = vsel %vm60_vm0, %v2343_v32, 0.0 }
0x167e   :  { %2346 = vadd.xlane.f32.xlu2 %v2345_v35 }
0x1680   :  { %v2338_v44 = vpop.f32.mrf.mxu0 }
0x1681   :  { %v2342_v43 = vadd.f32 %v2338_v44, %v2311_v26 }
0x1683   :  { %v2344_v45 = vadd.f32 %v2342_v43, %v5292_v34  ;;  %v2398_v34 = vld [vmem:[%s6013_s5 + $0x1e8] sm:$0xff]  ;;  %v2439_v43 = vperm.slane %v5491_v29, 1 }
0x1684   :  { %2418 = vmatpush.msrb.mxu2 %v2398_v34 }
0x1685   :  { %v2348_v30 = vsel %vm60_vm0, %v2344_v45, 0.0 }
0x1686   :  { %2349 = vadd.xlane.f32.xlu0 %v2348_v30  ;;  %2419 = vmatpush.msrb.mxu2 %v2397_v52 }
0x1688   :  { %2420 = vmatpush.msrb.mxu2 %v2396_v54 }
0x168a   :  { %2421 = vmatpush.msrb.mxu2 %v2395_v33 }
0x16f1   :  { %v2347_v15 = vpop.xlane.xlu2 %2346 }
0x16f2   :  { %v2351_v46 = vmul.f32 %v2347_v15, %v4681_v11 }
0x16f4   :  { %v2353_v39 = vsub.f32 %v2343_v32, %v2351_v46 }
0x16f6   :  { %v2355_v47 = vmul.f32 %v2353_v39, %v2353_v39 }
0x16f8   :  { %v2357_v36 = vsel %vm60_vm0, %v2355_v47, 0.0 }
0x16f9   :  { %2358 = vadd.xlane.f32.xlu1 %v2357_v36  ;;  %v2350_v48 = vpop.xlane.xlu0 %2349 }
0x16fa   :  { %v2352_v40 = vmul.f32 %v2350_v48, %v4681_v11 }
0x16fc   :  { %v2354_v41 = vsub.f32 %v2344_v45, %v2352_v40 }
0x16fe   :  { %v2356_v38 = vmul.f32 %v2354_v41, %v2354_v41 }
0x1700   :  { %v2360_v50 = vsel %vm60_vm0, %v2356_v38, 0.0 }
0x1701   :  { %2361 = vadd.xlane.f32.xlu2 %v2360_v50 }
0x176c   :  { %v2359_v1 = vpop.xlane.xlu1 %2358 }
0x176d   :  { %v2363_v53 = vmul.f32 %v2359_v1, %v4681_v11 }
0x176f   :  { %v2365_v59 = vadd.f32 1e-05, %v2363_v53 }
0x1771   :  { %4296 = vrsqrt.f32 %v2365_v59  ;;  %vm2373_vm15 = vweird.f32 %v2365_v59 }
0x1774   :  { %v2362_v51 = vpop.xlane.xlu2 %2361 }
0x1775   :  { %v2364_v62 = vmul.f32 %v2362_v51, %v4681_v11 }
0x1777   :  { %v4297_v0 = vpop.eup %4296  ;;  %v2366_v4 = vadd.f32 1e-05, %v2364_v62 }
0x1778   :  { %v2368_v55 = vmul.f32 %v4297_v0, %v2365_v59  ;;  %vm2374_vm14 = vweird.f32 %v4297_v0  ;;  %v2526_v59 = vld [vmem:[%s6013_s5 + $0x258] sm:$0xff] }
0x1779   :  { %4298 = vrsqrt.f32 %v2366_v4  ;;  %vm2375_vm3 = vmor %vm2373_vm15, %vm2374_vm14  ;;  %vm2383_vm5 = vweird.f32 %v2366_v4  ;;  %2550 = vmatpush.msra.mxu2 %v2526_v59  ;;  %v4388_v59 = vld [vmem:[%s6017_s3 + $0x10] sm:$0xff] }
0x177a   :  { %v2369_v42 = vmul.f32 %v4297_v0, %v2368_v55 }
0x177b   :  { %2551 = vmatpush.msra.mxu2 %v2525_v60 }
0x177c   :  { %v2370_v6 = vmul.f32 0.5, %v2369_v42 }
0x177d   :  { %2552 = vmatpush.msra.mxu2 %v2524_v56 }
0x177e   :  { %v2371_v10 = vsub.f32 1.5, %v2370_v6 }
0x177f   :  { %v4299_v13 = vpop.eup %4298  ;;  %2553 = vmatpush.msra.mxu2 %v2523_v61 }
0x1780   :  { %v2372_v2 = vmul.f32 %v4297_v0, %v2371_v10  ;;  %v2378_v16 = vmul.f32 %v4299_v13, %v2366_v4  ;;  %vm2384_vm4 = vweird.f32 %v4299_v13 }
0x1781   :  { %vm2385_vm6 = vmor %vm2383_vm5, %vm2384_vm4 }
0x1782   :  { %v2376_v20 = vsel %vm2375_vm3, %v4297_v0, %v2372_v2  ;;  %v2379_v49 = vmul.f32 %v4299_v13, %v2378_v16 }
0x1783   :  { %v2387_v23 = vmul.f32 %v2376_v20, %v2353_v39  ;;  %v2515_v20 = vperm.slane %v5491_v29, 2 }
0x1784   :  { %v2380_v18 = vmul.f32 0.5, %v2379_v49 }
0x1785   :  { %v2390_v63 = vmul.f32 %v2389_v19, %v2387_v23  ;;  %v2518_v23 = vperm.slane %v5491_v29, 3 }
0x1786   :  { %v2381_v24 = vsub.f32 1.5, %v2380_v18 }
0x1787   :  { %v2393_v14 = vadd.f32 %v2392_v57, %v2390_v63 }
0x1788   :  { %v2382_v5 = vmul.f32 %v4299_v13, %v2381_v24 }
0x1789   :  { %3916 = vmatmul.msk.f32.vlgmr.msrb.gmra.mxu2 %vm60_vm0, %v2393_v14 }
0x178a   :  { %v2386_v28 = vsel %vm2385_vm6, %v4299_v13, %v2382_v5 }
0x178b   :  { %v2388_v8 = vmul.f32 %v2386_v28, %v2354_v41 }
0x178d   :  { %v2391_v22 = vmul.f32 %v2389_v19, %v2388_v8 }
0x178f   :  { %v2394_v12 = vadd.f32 %v2392_v57, %v2391_v22 }
0x1791   :  { %3917 = vmatmul.msk.f32.gmra.mxu2 %vm60_vm0, %v2394_v12 }
0x180c   :  { %v2423_v32 = vpop.f32.mrf.mxu2 }
0x180d   :  { %v2424_v17 = vadd.f32 %v2423_v32, %v2399_v31 }
0x180f   :  { %v2429_v37 = vmax.f32 %v2424_v17, 0.0 }
0x1811   :  { %3918 = vmatmul.msk.f32.vlgmr.msrb.gmra.mxu0 %vm194_vm2, %v2429_v37 }
0x1814   :  { %v2426_v35 = vpop.f32.mrf.mxu2 }
0x1815   :  { %v2427_v26 = vadd.f32 %v2426_v35, %v2399_v31 }
0x1817   :  { %v2430_v44 = vmax.f32 %v2427_v26, 0.0 }
0x1819   :  { %3919 = vmatmul.msk.f32.gmra.mxu0 %vm194_vm2, %v2430_v44 }
0x188e   :  { %v2463_v45 = vpop.f32.mrf.mxu0 }
0x188f   :  { %v2464_v30 = vadd.f32 %v2463_v45, %v2439_v43 }
0x1891   :  { %v2469_v15 = vadd.f32 %v2464_v30, %v2393_v14 }
0x1893   :  { %v2471_v46 = vsel %vm60_vm0, %v2469_v15, 0.0 }
0x1894   :  { %2472 = vadd.xlane.f32.xlu0 %v2471_v46 }
0x1896   :  { %v2466_v39 = vpop.f32.mrf.mxu0 }
0x1897   :  { %v2467_v47 = vadd.f32 %v2466_v39, %v2439_v43 }
0x1899   :  { %v2470_v36 = vadd.f32 %v2467_v47, %v2394_v12 }
0x189b   :  { %v2474_v48 = vsel %vm60_vm0, %v2470_v36, 0.0 }
0x189c   :  { %2475 = vadd.xlane.f32.xlu1 %v2474_v48 }
0x1907   :  { %v2473_v40 = vpop.xlane.xlu0 %2472 }
0x1908   :  { %v2477_v41 = vmul.f32 %v2473_v40, %v4681_v11 }
0x190a   :  { %v2479_v38 = vsub.f32 %v2469_v15, %v2477_v41 }
0x190c   :  { %v2481_v50 = vmul.f32 %v2479_v38, %v2479_v38 }
0x190e   :  { %v2483_v34 = vsel %vm60_vm0, %v2481_v50, 0.0 }
0x190f   :  { %v2476_v52 = vpop.xlane.xlu1 %2475  ;;  %2484 = vadd.xlane.f32.xlu2 %v2483_v34 }
0x1910   :  { %v2478_v54 = vmul.f32 %v2476_v52, %v4681_v11 }
0x1912   :  { %v2480_v33 = vsub.f32 %v2470_v36, %v2478_v54  ;;  %v4387_v54 = vld [vmem:[%s6017_s3 + $0x8] sm:$0xff] }
0x1914   :  { %v2482_v1 = vmul.f32 %v2480_v33, %v2480_v33 }
0x1916   :  { %v2486_v53 = vsel %vm60_vm0, %v2482_v1, 0.0 }
0x1917   :  { %2487 = vadd.xlane.f32.xlu0 %v2486_v53 }
0x1982   :  { %v2485_v51 = vpop.xlane.xlu2 %2484 }
0x1983   :  { %v2489_v62 = vmul.f32 %v2485_v51, %v4681_v11  ;;  %v4389_v51 = vld [vmem:[%s6017_s3 + $0x18] sm:$0xff] }
0x1985   :  { %v2491_v58 = vadd.f32 1e-05, %v2489_v62 }
0x1987   :  { %4300 = vrsqrt.f32 %v2491_v58  ;;  %vm2499_vm8 = vweird.f32 %v2491_v58 }
0x198a   :  { %v2488_v0 = vpop.xlane.xlu0 %2487 }
0x198b   :  { %v2490_v4 = vmul.f32 %v2488_v0, %v4681_v11 }
0x198d   :  { %v4301_v3 = vpop.eup %4300  ;;  %v2492_v55 = vadd.f32 1e-05, %v2490_v4 }
0x198e   :  { %v2494_v42 = vmul.f32 %v4301_v3, %v2491_v58  ;;  %vm2500_vm7 = vweird.f32 %v4301_v3 }
0x198f   :  { %4302 = vrsqrt.f32 %v2492_v55  ;;  %vm2501_vm9 = vmor %vm2499_vm8, %vm2500_vm7  ;;  %vm2509_vm11 = vweird.f32 %v2492_v55 }
0x1990   :  { %v2495_v6 = vmul.f32 %v4301_v3, %v2494_v42 }
0x1992   :  { %v2496_v10 = vmul.f32 0.5, %v2495_v6 }
0x1994   :  { %v2497_v13 = vsub.f32 1.5, %v2496_v10 }
0x1995   :  { %v4303_v2 = vpop.eup %4302 }
0x1996   :  { %v2498_v16 = vmul.f32 %v4301_v3, %v2497_v13  ;;  %v2504_v19 = vmul.f32 %v4303_v2, %v2492_v55  ;;  %vm2510_vm10 = vweird.f32 %v4303_v2 }
0x1997   :  { %vm2511_vm12 = vmor %vm2509_vm11, %vm2510_vm10 }
0x1998   :  { %v2502_v49 = vsel %vm2501_vm9, %v4301_v3, %v2498_v16  ;;  %v2505_v57 = vmul.f32 %v4303_v2, %v2504_v19  ;;  %v4390_v3 = vld [vmem:[%s6017_s3 + $0x20] sm:$0xff] }
0x1999   :  { %v2513_v18 = vmul.f32 %v2502_v49, %v2479_v38  ;;  %v4386_v38 = vld [vmem:[%s6017_s3] sm:$0xff] }
0x199a   :  { %v2506_v63 = vmul.f32 0.5, %v2505_v57 }
0x199b   :  { %v2516_v24 = vmul.f32 %v2515_v20, %v2513_v18  ;;  %v4393_v18 = vld [vmem:[%s6017_s3 + $0x38] sm:$0xff] }
0x199c   :  { %v2507_v14 = vsub.f32 1.5, %v2506_v63 }
0x199d   :  { %v5519_v5 = vadd.f32 %v2518_v23, %v2516_v24 }
0x199e   :  { %v2508_v28 = vmul.f32 %v4303_v2, %v2507_v14 }
0x199f   :  { %3920 = vmatmul.msk.f32.vlgmr.msra.gmra.mxu2 %vm60_vm0, %v5519_v5 }
0x19a0   :  { %v2512_v8 = vsel %vm2511_vm12, %v4303_v2, %v2508_v28  ;;  %v4391_v2 = vld [vmem:[%s6017_s3 + $0x30] sm:$0xff] }
0x19a1   :  { %v2514_v22 = vmul.f32 %v2512_v8, %v2480_v33 }
0x19a3   :  { %v2517_v12 = vmul.f32 %v2515_v20, %v2514_v22  ;;  %v4392_v20 = vld [vmem:[%s6017_s3 + $0x28] sm:$0xff] }
0x19a5   :  { %v5523_v25 = vadd.f32 %v2518_v23, %v2517_v12 }
0x19a7   :  { %3921 = vmatmul.msk.f32.gmra.mxu2 %vm60_vm0, %v5523_v25 }
0x1a22   :  { %v2555_v29 = vpop.f32.mrf.mxu2 }
0x1a23   :  { %v5533_v31 = vadd.f32 %v2555_v29, %v2531_v7 }
0x1a25   :  { %2571 = vrot.lane.b32.xlu2 %v5533_v31, %s4406_s12 }
0x1a2a   :  { %v2558_v32 = vpop.f32.mrf.mxu2 }
0x1a2b   :  { %v5537_v17 = vadd.f32 %v2558_v32, %v2531_v7 }
0x1a2d   :  { %2563 = vrot.lane.b32.xlu2 %v5533_v31, %s4404_s11  ;;  %2569 = vrot.lane.b32.xlu0 %v5537_v17, %s4405_s0  ;;  %v4107_v14 = vpack.i.bf16 %v5533_v31, %v5537_v17 }
0x1a2e   :  { %2573 = vrot.lane.b32.xlu1 %v5537_v17, %s4406_s12 }
0x1a35   :  { %2567 = vrot.lane.b32.xlu0 %v5533_v31, %s4405_s0 }
0x1a36   :  { %2565 = vrot.lane.b32.xlu1 %v5537_v17, %s4404_s11 }
0x1a7f   :  { %v5549_v37 = vpop.permute.xlu2 %2571 }
0x1a80   :  { %2587 = vrot.lane.b32.xlu1 %v5549_v37, %s4407_s13 }
0x1a87   :  { %v5558_v44 = vpop.permute.xlu2 %2563 }
0x1a9f   :  { %v2570_v35 = vpop.permute.xlu0 %2569 }
0x1aa0   :  { %v5553_v26 = vpop.permute.xlu1 %2573  ;;  %2585 = vrot.lane.b32.xlu2 %v2570_v35, %s4407_s13 }
0x1aa1   :  { %2589 = vrot.lane.b32.xlu0 %v5553_v26, %s4407_s13  ;;  %v4092_v10 = vpack.i.bf16 %v5549_v37, %v5553_v26 }
0x1aa7   :  { %v2568_v43 = vpop.permute.xlu0 %2567 }
0x1aa8   :  { %v5560_v45 = vpop.permute.xlu1 %2565  ;;  %2579 = vrot.lane.b32.xlu2 %v5558_v44, %s4407_s13  ;;  %v4097_v0 = vpack.i.bf16 %v2568_v43, %v2570_v35 }
0x1aa9   :  { %2583 = vrot.lane.b32.xlu0 %v2568_v43, %s4407_s13  ;;  %2581 = vrot.lane.b32.xlu1 %v5560_v45, %s4407_s13 }
0x1ab1   :  { %2577 = vrot.lane.b32.xlu0 %v5537_v17, %s4407_s13  ;;  %2575 = vrot.lane.b32.xlu1 %v5533_v31, %s4407_s13 }
0x1af2   :  { %v2588_v15 = vpop.permute.xlu1 %2587 }
0x1afa   :  { %v2586_v46 = vpop.permute.xlu2 %2585 }
0x1b02   :  { %v2580_v36 = vpop.permute.xlu2 %2579 }
0x1b13   :  { %v2590_v30 = vpop.permute.xlu0 %2589 }
0x1b14   :  { %3922 = vmatpush.xpose.msk.msra.mxu1 %vm120_vm1, %v2590_v30 }
0x1b18   :  { %3923 = vmatpush.xpose.msk.msra.mxu1 %vm120_vm1, %v2588_v15 }
0x1b1b   :  { %v2584_v39 = vpop.permute.xlu0 %2583  ;;  %v2582_v47 = vpop.permute.xlu1 %2581 }
0x1b1c   :  { %3924 = vmatpush.xpose.msk.msra.mxu1 %vm120_vm1, %v2586_v46 }
0x1b20   :  { %3925 = vmatpush.xpose.msk.msra.mxu1 %vm120_vm1, %v2584_v39 }
0x1b23   :  { %v2578_v48 = vpop.permute.xlu0 %2577  ;;  %v2576_v40 = vpop.permute.xlu1 %2575 }
0x1b24   :  { %3926 = vmatpush.xpose.msk.msra.mxu1 %vm120_vm1, %v2582_v47  ;;  %v4102_v47 = vpack.i.bf16 %v5558_v44, %v5560_v45 }
0x1b28   :  { %3927 = vmatpush.xpose.msk.msra.mxu1 %vm120_vm1, %v2580_v36 }
0x1b2c   :  { %3928 = vmatpush.xpose.msk.msra.mxu1 %vm120_vm1, %v2578_v48 }
0x1b30   :  { %3929 = vmatpush.xpose.msk.msra.mxu1 %vm120_vm1, %v2576_v40 }
0x1b33   :  { %3930 = vmatmul.msk.f32.vlgmr.msra.gmra.mxu1 %vm120_vm1, %v5533_v31 }
0x1b3b   :  { %3931 = vmatmul.msk.f32.gmra.mxu1 %vm120_vm1, %v5537_v17 }
0x1b43   :  { %3932 = vmatmul.msk.f32.gmra.mxu1 %vm120_vm1, %v5558_v44 }
0x1b4b   :  { %3933 = vmatmul.msk.f32.gmra.mxu1 %vm120_vm1, %v5560_v45 }
0x1b53   :  { %3934 = vmatmul.msk.f32.gmra.mxu1 %vm120_vm1, %v2568_v43 }
0x1b5b   :  { %3935 = vmatmul.msk.f32.gmra.mxu1 %vm120_vm1, %v2570_v35 }
0x1b63   :  { %3936 = vmatmul.msk.f32.gmra.mxu1 %vm120_vm1, %v5549_v37 }
0x1b6b   :  { %3937 = vmatmul.msk.f32.gmra.mxu1 %vm120_vm1, %v5553_v26 }
0x1bb0   :  { %v2640_v41 = vpop.f32.mrf.mxu1 }
0x1bb1   :  { %v2641_v50 = vadd.f32 %v4386_v38, %v2640_v41 }
0x1bb3   :  { %v2664_v34 = vsel %vm194_vm2, %v2641_v50, -inf }
0x1bb4   :  { %2665 = vmax.xlane.f32.xlu2 %v2664_v34 }
0x1bb8   :  { %v2643_v52 = vpop.f32.mrf.mxu1 }
0x1bb9   :  { %v2644_v33 = vadd.f32 %v4387_v54, %v2643_v52 }
0x1bbb   :  { %v2667_v1 = vsel %vm194_vm2, %v2644_v33, -inf }
0x1bbc   :  { %2668 = vmax.xlane.f32.xlu0 %v2667_v1 }
0x1bc0   :  { %v2646_v53 = vpop.f32.mrf.mxu1 }
0x1bc1   :  { %v5604_v60 = vadd.f32 %v4388_v59, %v2646_v53 }
0x1bc3   :  { %v2670_v56 = vsel %vm194_vm2, %v5604_v60, -inf }
0x1bc4   :  { %2671 = vmax.xlane.f32.xlu1 %v2670_v56 }
0x1bc8   :  { %v2649_v61 = vpop.f32.mrf.mxu1 }
0x1bc9   :  { %v2650_v62 = vadd.f32 %v4389_v51, %v2649_v61 }
0x1bcb   :  { %v2673_v58 = vsel %vm194_vm2, %v2650_v62, -inf }
0x1bcc   :  { %2674 = vmax.xlane.f32.xlu2 %v2673_v58 }
0x1bd0   :  { %v2652_v4 = vpop.f32.mrf.mxu1  ;;  %4098 = vrot.lane.b32.xlu0 %v4097_v0, %s4408_s24 }
0x1bd1   :  { %v2653_v55 = vadd.f32 %v4390_v3, %v2652_v4 }
0x1bd3   :  { %v2676_v42 = vsel %vm194_vm2, %v2653_v55, -inf }
0x1bd4   :  { %2677 = vmax.xlane.f32.xlu2 %v2676_v42 }
0x1bd8   :  { %v2655_v6 = vpop.f32.mrf.mxu1 }
0x1bd9   :  { %v5627_v49 = vadd.f32 %v4392_v20, %v2655_v6 }
0x1bdb   :  { %v2679_v57 = vsel %vm194_vm2, %v5627_v49, -inf }
0x1bdd   :  { %4093 = vrot.lane.b32.xlu1 %v4092_v10, %s4408_s24 }
0x1be0   :  { %v2658_v13 = vpop.f32.mrf.mxu1 }
0x1be1   :  { %v2659_v16 = vadd.f32 %v4391_v2, %v2658_v13 }
0x1be3   :  { %v2682_v19 = vsel %vm194_vm2, %v2659_v16, -inf }
0x1be4   :  { %2683 = vmax.xlane.f32.xlu2 %v2682_v19 }
0x1be8   :  { %v2661_v23 = vpop.f32.mrf.mxu1 }
0x1be9   :  { %v5634_v63 = vadd.f32 %v4393_v18, %v2661_v23 }
0x1beb   :  { %v2685_v24 = vsel %vm194_vm2, %v5634_v63, -inf }
0x1bfa   :  { %2680 = vmax.xlane.f32.xlu0 %v2679_v57 }
0x1c07   :  { %2686 = vmax.xlane.f32.xlu1 %v2685_v24 }
0x1c0e   :  { %4108 = vrot.lane.b32.xlu0 %v4107_v14, %s4408_s24 }
0x1c27   :  { %v2666_v28 = vpop.xlane.xlu2 %2665 }
0x1c28   :  { %v2688_v8 = vsub.f32 %v2641_v50, %v2666_v28 }
0x1c2a   :  { %v2696_v22 = vmul.f32 1.442695, %v2688_v8 }
0x1c2c   :  { %4304 = vpow2.f32 %v2696_v22 }
0x1c2f   :  { %v2669_v12 = vpop.xlane.xlu0 %2668 }
0x1c30   :  { %v2689_v7 = vsub.f32 %v2644_v33, %v2669_v12 }
0x1c32   :  { %v5641_v29 = vpop.eup %4304  ;;  %v2698_v32 = vmul.f32 1.442695, %v2689_v7 }
0x1c33   :  { %v2712_v37 = vsel %vm194_vm2, %v5641_v29, 0.0 }
0x1c34   :  { %4306 = vpow2.f32 %v2698_v32  ;;  %2713 = vadd.xlane.f32.xlu2 %v2712_v37 }
0x1c37   :  { %v2672_v30 = vpop.xlane.xlu1 %2671 }
0x1c38   :  { %v2690_v59 = vsub.f32 %v5604_v60, %v2672_v30 }
0x1c3a   :  { %v5645_v35 = vpop.eup %4306  ;;  %v2700_v61 = vmul.f32 1.442695, %v2690_v59  ;;  %v3020_v59 = vld [vmem:[%s6013_s5 + $0x290] sm:$0xff] }
0x1c3b   :  { %v2715_v31 = vsel %vm194_vm2, %v5645_v35, 0.0 }
0x1c3c   :  { %2716 = vadd.xlane.f32.xlu0 %v2715_v31 }
0x1c3f   :  { %v2675_v17 = vpop.xlane.xlu2 %2674 }
0x1c40   :  { %v2691_v26 = vsub.f32 %v2650_v62, %v2675_v17 }
0x1c42   :  { %v2702_v43 = vmul.f32 1.442695, %v2691_v26  ;;  %v4099_v38 = vpop.permute.xlu0 %4098 }
0x1c43   :  { %v4100_v54 = vunpack.i.l.bf16 %v4099_v38  ;;  %v4101_v44 = vunpack.i.h.bf16 %v4099_v38 }
0x1c44   :  { %4308 = vpow2.f32 %v2702_v43 }
0x1c47   :  { %v2678_v15 = vpop.xlane.xlu2 %2677 }
0x1c48   :  { %v2692_v46 = vsub.f32 %v2653_v55, %v2678_v15 }
0x1c4a   :  { %v5649_v39 = vpop.eup %4308  ;;  %v2704_v36 = vmul.f32 1.442695, %v2692_v46 }
0x1c4b   :  { %v2721_v48 = vsel %vm194_vm2, %v5649_v39, 0.0 }
0x1c4c   :  { %4310 = vpow2.f32 %v2704_v36  ;;  %4103 = vrot.lane.b32.xlu2 %v4102_v47, %s4408_s24  ;;  %2722 = vadd.xlane.f32.xlu1 %v2721_v48  ;;  %v2527_v36 = vld [vmem:[%s6013_s5 + $0x260] sm:$0xff] }
0x1c4d   :  { %2862 = vmatpush.msrb.mxu2 %v2527_v36 }
0x1c4f   :  { %v4094_v40 = vpop.permute.xlu1 %4093 }
0x1c50   :  { %v4095_v41 = vunpack.i.l.bf16 %v4094_v40  ;;  %v4096_v34 = vunpack.i.h.bf16 %v4094_v40  ;;  %v2528_v40 = vld [vmem:[%s6013_s5 + $0x268] sm:$0xff] }
0x1c51   :  { %2894 = vmatpush.msrb.mxu3 %v2528_v40 }
0x1c52   :  { %v5656_v50 = vpop.eup %4310  ;;  %2808 = vmatpush.msra.mxu0 %v4095_v41 }
0x1c53   :  { %v2724_v52 = vsel %vm194_vm2, %v5656_v50, 0.0 }
0x1c54   :  { %2809 = vmatpush.msra.mxu0 %v4096_v34  ;;  %2725 = vadd.xlane.f32.xlu1 %v2724_v52  ;;  %v2530_v34 = vld [vmem:[%s6013_s5 + $0x278] sm:$0xff] }
0x1c55   :  { %2956 = vmatpush.msra.mxu3 %v2530_v34 }
0x1c56   :  { %2810 = vmatpush.msra.mxu0 %v4100_v54 }
0x1c57   :  { %v2684_v45 = vpop.xlane.xlu2 %2683 }
0x1c58   :  { %v2694_v33 = vsub.f32 %v2659_v16, %v2684_v45  ;;  %2811 = vmatpush.msra.mxu0 %v4101_v44 }
0x1c5a   :  { %v2708_v1 = vmul.f32 1.442695, %v2694_v33 }
0x1c5c   :  { %4312 = vpow2.f32 %v2708_v1 }
0x1c5d   :  { %4314 = vpow2.f32 %v2700_v61 }
0x1c62   :  { %v5660_v53 = vpop.eup %4312 }
0x1c63   :  { %v2730_v56 = vsel %vm194_vm2, %v5660_v53, 0.0  ;;  %v4315_v0 = vpop.eup %4314 }
0x1c64   :  { %2731 = vadd.xlane.f32.xlu1 %v2730_v56  ;;  %v2718_v4 = vsel %vm194_vm2, %v4315_v0, 0.0  ;;  %v3021_v56 = vld [vmem:[%s6013_s5 + $0x298] sm:$0xff] }
0x1c65   :  { %v4112_v61 = vpack.i.bf16 %v3020_v59, %v3021_v56 }
0x1c6d   :  { %v2681_v51 = vpop.xlane.xlu0 %2680 }
0x1c6e   :  { %v2693_v62 = vsub.f32 %v5627_v49, %v2681_v51 }
0x1c70   :  { %v2706_v58 = vmul.f32 1.442695, %v2693_v62  ;;  %v3019_v62 = vld [vmem:[%s6013_s5 + $0x288] sm:$0xff] }
0x1c72   :  { %4316 = vpow2.f32 %v2706_v58  ;;  %v3018_v58 = vld [vmem:[%s6013_s5 + $0x280] sm:$0xff] }
0x1c75   :  { %2719 = vadd.xlane.f32.xlu2 %v2718_v4  ;;  %v2870_v4 = vperm.slane %v5530_v9, 1 }
0x1c78   :  { %v4317_v3 = vpop.eup %4316 }
0x1c79   :  { %v2727_v55 = vsel %vm194_vm2, %v4317_v3, 0.0 }
0x1c7a   :  { %v2687_v42 = vpop.xlane.xlu1 %2686  ;;  %2728 = vadd.xlane.f32.xlu0 %v2727_v55 }
0x1c7b   :  { %v2695_v60 = vsub.f32 %v5634_v63, %v2687_v42 }
0x1c7d   :  { %v2710_v6 = vmul.f32 1.442695, %v2695_v60 }
0x1c7f   :  { %4318 = vpow2.f32 %v2710_v6 }
0x1c80   :  { %v4109_v16 = vpop.permute.xlu0 %4108 }
0x1c81   :  { %v4110_v18 = vunpack.i.l.bf16 %v4109_v16  ;;  %v4111_v24 = vunpack.i.h.bf16 %v4109_v16 }
0x1c85   :  { %v4319_v10 = vpop.eup %4318 }
0x1c86   :  { %v2733_v13 = vsel %vm194_vm2, %v4319_v10, 0.0 }
0x1c87   :  { %2734 = vadd.xlane.f32.xlu0 %v2733_v13 }
0x1c9b   :  { %4113 = vrot.lane.b32.xlu0 %v4112_v61, %s4407_s13 }
0x1ca7   :  { %v2714_v2 = vpop.xlane.xlu2 %2713 }
0x1ca8   :  { %4320 = vrcp.f32 %v2714_v2 }
0x1cae   :  { %v4321_v23 = vpop.eup %4320 }
0x1caf   :  { %v4104_v19 = vpop.permute.xlu2 %4103  ;;  %v2717_v57 = vpop.xlane.xlu0 %2716  ;;  %v2744_v63 = vmul.f32 %v4321_v23, %v5641_v29 }
0x1cb0   :  { %v4105_v20 = vunpack.i.l.bf16 %v4104_v19  ;;  %v4106_v49 = vunpack.i.h.bf16 %v4104_v19  ;;  %4322 = vrcp.f32 %v2717_v57 }
0x1cb2   :  { %2812 = vmatpush.msra.mxu0 %v4105_v20 }
0x1cb4   :  { %2813 = vmatpush.msra.mxu0 %v4106_v49 }
0x1cb6   :  { %2814 = vmatpush.msra.mxu0 %v4110_v18  ;;  %v4323_v14 = vpop.eup %4322 }
0x1cb7   :  { %v2745_v28 = vmul.f32 %v4323_v14, %v5645_v35  ;;  %v4117_v14 = vpack.i.bf16 %v3018_v58, %v3019_v62 }
0x1cb8   :  { %2815 = vmatpush.msra.mxu0 %v4111_v24 }
0x1cb9   :  { %3938 = vmatmul.msk.f32.vlgmr.msra.gmra.mxu0 %vm194_vm2, %v2744_v63 }
0x1cbf   :  { %v2723_v22 = vpop.xlane.xlu1 %2722 }
0x1cc1   :  { %3939 = vmatmul.msk.f32.gmra.mxu0 %vm194_vm2, %v2745_v28 }
0x1cc7   :  { %v2726_v32 = vpop.xlane.xlu1 %2725 }
0x1cd7   :  { %v2732_v26 = vpop.xlane.xlu1 %2731 }
0x1ce8   :  { %v2720_v8 = vpop.xlane.xlu2 %2719 }
0x1ce9   :  { %4324 = vrcp.f32 %v2720_v8 }
0x1cea   :  { %4326 = vrcp.f32 %v2723_v22 }
0x1ceb   :  { %4328 = vrcp.f32 %v2726_v32 }
0x1ced   :  { %v2729_v31 = vpop.xlane.xlu0 %2728 }
0x1cee   :  { %4330 = vrcp.f32 %v2729_v31 }
0x1cef   :  { %v4325_v12 = vpop.eup %4324  ;;  %4332 = vrcp.f32 %v2732_v26 }
0x1cf0   :  { %v2746_v7 = vmul.f32 %v4325_v12, %v4315_v0  ;;  %v4327_v37 = vpop.eup %4326 }
0x1cf1   :  { %v2747_v29 = vmul.f32 %v4327_v37, %v5649_v39  ;;  %v4329_v17 = vpop.eup %4328 }
0x1cf2   :  { %3940 = vmatmul.msk.f32.gmra.mxu0 %vm194_vm2, %v2746_v7  ;;  %v2748_v35 = vmul.f32 %v4329_v17, %v5656_v50  ;;  %v2529_v50 = vld [vmem:[%s6013_s5 + $0x270] sm:$0xff] }
0x1cf3   :  { %2925 = vmatpush.msra.mxu2 %v2529_v50 }
0x1cf4   :  { %v4331_v43 = vpop.eup %4330 }
0x1cf5   :  { %v2749_v30 = vmul.f32 %v4331_v43, %v4317_v3  ;;  %v4333_v46 = vpop.eup %4332 }
0x1cf6   :  { %v2750_v39 = vmul.f32 %v4333_v46, %v5660_v53 }
0x1cfa   :  { %3941 = vmatmul.msk.f32.gmra.mxu0 %vm194_vm2, %v2747_v29  ;;  %v2735_v15 = vpop.xlane.xlu0 %2734 }
0x1cfb   :  { %4334 = vrcp.f32 %v2735_v15 }
0x1d01   :  { %v4335_v47 = vpop.eup %4334 }
0x1d02   :  { %3942 = vmatmul.msk.f32.gmra.mxu0 %vm194_vm2, %v2748_v35  ;;  %v2751_v48 = vmul.f32 %v4335_v47, %v4319_v10 }
0x1d0a   :  { %3943 = vmatmul.msk.f32.gmra.mxu0 %vm194_vm2, %v2749_v30 }
0x1d0d   :  { %v4114_v28 = vpop.permute.xlu0 %4113 }
0x1d0e   :  { %v4116_v8 = vunpack.i.h.bf16 %v4114_v28  ;;  %v4115_v22 = vunpack.i.l.bf16 %v4114_v28 }
0x1d12   :  { %3944 = vmatmul.msk.f32.gmra.mxu0 %vm194_vm2, %v2750_v39 }
0x1d1a   :  { %3945 = vmatmul.msk.f32.gmra.mxu0 %vm194_vm2, %v2751_v48 }
0x1d36   :  { %v2817_v41 = vpop.f32.mrf.mxu0 }
0x1d37   :  { %3946 = vmatmul.msk.f32.vlgmr.msrb.gmra.mxu2 %vm120_vm1, %v2817_v41 }
0x1d38   :  { %3045 = vmatpush.msrb.mxu2 %v3021_v56 }
0x1d3a   :  { %3046 = vmatpush.msrb.mxu2 %v3020_v59  ;;  %v3015_v59 = vperm.slane %v5530_v9, 3 }
0x1d3c   :  { %3047 = vmatpush.msrb.mxu2 %v3019_v62 }
0x1d3e   :  { %v2820_v38 = vpop.f32.mrf.mxu0  ;;  %3048 = vmatpush.msrb.mxu2 %v3018_v58 }
0x1d3f   :  { %3947 = vmatmul.msk.f32.gmra.mxu2 %vm120_vm1, %v2820_v38 }
0x1d6f   :  { %v2823_v52 = vpop.f32.mrf.mxu0 }
0x1d70   :  { %3948 = vmatmul.msk.f32.vlgmr.msrb.gmra.mxu3 %vm120_vm1, %v2823_v52 }
0x1d71   :  { %3088 = vmatpush.msrb.mxu3 %v4115_v22 }
0x1d73   :  { %3089 = vmatpush.msrb.mxu3 %v4116_v8 }
0x1d77   :  { %v2826_v54 = vpop.f32.mrf.mxu0 }
0x1d78   :  { %3949 = vmatmul.msk.f32.gmra.mxu3 %vm120_vm1, %v2826_v54 }
0x1d7f   :  { %v2829_v44 = vpop.f32.mrf.mxu0 }
0x1d80   :  { %3950 = vmatmul.msk.f32.vlgmr.msra.gmra.mxu2 %vm120_vm1, %v2829_v44 }
0x1d87   :  { %v2832_v45 = vpop.f32.mrf.mxu0 }
0x1d88   :  { %3951 = vmatmul.msk.f32.gmra.mxu2 %vm120_vm1, %v2832_v45  ;;  %v3012_v45 = vperm.slane %v5530_v9, 2 }
0x1d8f   :  { %v2835_v33 = vpop.f32.mrf.mxu0 }
0x1d90   :  { %3952 = vmatmul.msk.f32.vlgmr.msra.gmra.mxu3 %vm120_vm1, %v2835_v33 }
0x1d97   :  { %v2838_v1 = vpop.f32.mrf.mxu0 }
0x1d98   :  { %3953 = vmatmul.msk.f32.gmra.mxu3 %vm120_vm1, %v2838_v1 }
0x1dba   :  { %v2864_v53 = vpop.f32.mrf.mxu2 }
0x1dbb   :  { %v2871_v42 = vadd.f32 %v2870_v4, %v2864_v53 }
0x1dc2   :  { %v2867_v0 = vpop.f32.mrf.mxu2 }
0x1dc3   :  { %v2872_v2 = vadd.f32 %v2870_v4, %v2867_v0 }
0x1df3   :  { %v2896_v51 = vpop.f32.mrf.mxu3 }
0x1df4   :  { %v2902_v60 = vadd.f32 %v2896_v51, %v2871_v42 }
0x1dfb   :  { %v2899_v3 = vpop.f32.mrf.mxu3 }
0x1dfc   :  { %v2903_v20 = vadd.f32 %v2899_v3, %v2872_v2 }
0x1e03   :  { %v2927_v55 = vpop.f32.mrf.mxu2 }
0x1e04   :  { %v2933_v6 = vadd.f32 %v2927_v55, %v2902_v60 }
0x1e0b   :  { %v2930_v19 = vpop.f32.mrf.mxu2 }
0x1e0c   :  { %v2934_v57 = vadd.f32 %v2930_v19, %v2903_v20 }
0x1e13   :  { %v2958_v10 = vpop.f32.mrf.mxu3 }
0x1e14   :  { %v2964_v13 = vadd.f32 %v2958_v10, %v2933_v6 }
0x1e16   :  { %v2966_v16 = vadd.f32 %v2964_v13, %v5519_v5  ;;  %v5723_v5 = vperm.slane %v5530_v9, 4 }
0x1e18   :  { %v2968_v49 = vsel %vm60_vm0, %v2966_v16, 0.0  ;;  %3073 = vrot.lane.b32.xlu0 %v5723_v5, %s4407_s13 }
0x1e19   :  { %2969 = vadd.xlane.f32.xlu2 %v2968_v49 }
0x1e1b   :  { %v2961_v23 = vpop.f32.mrf.mxu3 }
0x1e1c   :  { %v2965_v18 = vadd.f32 %v2961_v23, %v2934_v57 }
0x1e1e   :  { %v2967_v24 = vadd.f32 %v2965_v18, %v5523_v25 }
0x1e20   :  { %v2971_v63 = vsel %vm60_vm0, %v2967_v24, 0.0 }
0x1e21   :  { %2972 = vadd.xlane.f32.xlu1 %v2971_v63 }
0x1e31   :  { %4118 = vrot.lane.b32.xlu2 %v4117_v14, %s4407_s13 }
0x1e8a   :  { %v3074_v44 = vpop.permute.xlu0 %3073 }
0x1e8c   :  { %v2970_v12 = vpop.xlane.xlu2 %2969 }
0x1e8d   :  { %v2974_v25 = vmul.f32 %v2970_v12, %v4681_v11 }
0x1e8f   :  { %v2976_v7 = vsub.f32 %v2966_v16, %v2974_v25 }
0x1e91   :  { %v2978_v32 = vmul.f32 %v2976_v7, %v2976_v7 }
0x1e93   :  { %v2980_v37 = vsel %vm60_vm0, %v2978_v32, 0.0 }
0x1e94   :  { %v4119_v29 = vpop.permute.xlu2 %4118  ;;  %2981 = vadd.xlane.f32.xlu1 %v2980_v37  ;;  %v2973_v31 = vpop.xlane.xlu1 %2972  ;;  %v4395_v37 = vld [vmem:[%s6018_s4 + $0x8] sm:$0xff] }
0x1e95   :  { %v4121_v17 = vunpack.i.h.bf16 %v4119_v29  ;;  %v4120_v35 = vunpack.i.l.bf16 %v4119_v29  ;;  %v2975_v26 = vmul.f32 %v2973_v31, %v4681_v11 }
0x1e97   :  { %v2977_v43 = vsub.f32 %v2967_v24, %v2975_v26  ;;  %3090 = vmatpush.msrb.mxu3 %v4120_v35  ;;  %v4396_v26 = vld [vmem:[%s6018_s4 + $0x10] sm:$0xff] }
0x1e99   :  { %3091 = vmatpush.msrb.mxu3 %v4121_v17  ;;  %v2979_v30 = vmul.f32 %v2977_v43, %v2977_v43 }
0x1e9a   :  { %3956 = vmatmul.msk.f32.vlgmr.msrb.gmra.mxu3 %vm60_vm0, %v5269_v27 }
0x1e9b   :  { %v2983_v15 = vsel %vm60_vm0, %v2979_v30, 0.0 }
0x1e9c   :  { %2984 = vadd.xlane.f32.xlu1 %v2983_v15 }
0x1ea2   :  { %3957 = vmatmul.msk.f32.gmra.mxu3 %vm60_vm0, %v5274_v21 }
0x1f07   :  { %v2982_v46 = vpop.xlane.xlu1 %2981 }
0x1f08   :  { %v2986_v39 = vmul.f32 %v2982_v46, %v4681_v11  ;;  %v4397_v46 = vld [vmem:[%s6018_s4 + $0x18] sm:$0xff] }
0x1f0a   :  { %v2988_v47 = vadd.f32 1e-05, %v2986_v39 }
0x1f0c   :  { %4336 = vrsqrt.f32 %v2988_v47  ;;  %vm2996_vm14 = vweird.f32 %v2988_v47 }
0x1f0f   :  { %v2985_v36 = vpop.xlane.xlu1 %2984 }
0x1f10   :  { %v2987_v48 = vmul.f32 %v2985_v36, %v4681_v11 }
0x1f12   :  { %v4337_v40 = vpop.eup %4336  ;;  %v2989_v41 = vadd.f32 1e-05, %v2987_v48 }
0x1f13   :  { %v2991_v38 = vmul.f32 %v4337_v40, %v2988_v47  ;;  %vm2997_vm13 = vweird.f32 %v4337_v40 }
0x1f14   :  { %4338 = vrsqrt.f32 %v2989_v41  ;;  %vm2998_vm15 = vmor %vm2996_vm14, %vm2997_vm13  ;;  %vm3006_vm4 = vweird.f32 %v2989_v41 }
0x1f15   :  { %v2992_v50 = vmul.f32 %v4337_v40, %v2991_v38 }
0x1f17   :  { %v2993_v27 = vmul.f32 0.5, %v2992_v50 }
0x1f19   :  { %v2994_v34 = vsub.f32 1.5, %v2993_v27 }
0x1f1a   :  { %v4339_v52 = vpop.eup %4338 }
0x1f1b   :  { %v2995_v54 = vmul.f32 %v4337_v40, %v2994_v34  ;;  %v3001_v21 = vmul.f32 %v4339_v52, %v2989_v41  ;;  %vm3007_vm3 = vweird.f32 %v4339_v52 }
0x1f1c   :  { %vm3008_vm5 = vmor %vm3006_vm4, %vm3007_vm3 }
0x1f1d   :  { %v2999_v33 = vsel %vm2998_vm15, %v4337_v40, %v2995_v54  ;;  %v3002_v1 = vmul.f32 %v4339_v52, %v3001_v21  ;;  %v3093_v53 = vpop.f32.mrf.mxu3 }
0x1f1e   :  { %v3010_v56 = vmul.f32 %v2999_v33, %v2976_v7  ;;  %v5739_v61 = vadd.f32 %v3093_v53, %v3074_v44  ;;  %v4400_v53 = vld [vmem:[%s6018_s4 + $0x28] sm:$0xff] }
0x1f1f   :  { %v3003_v51 = vmul.f32 0.5, %v3002_v1 }
0x1f20   :  { %v3013_v62 = vmul.f32 %v3012_v45, %v3010_v56  ;;  %3123 = vrot.lane.b32.xlu2 %v5739_v61, %s4406_s12 }
0x1f21   :  { %v3004_v58 = vsub.f32 1.5, %v3003_v51 }
0x1f22   :  { %v5743_v0 = vadd.f32 %v3015_v59, %v3013_v62  ;;  %v4401_v62 = vld [vmem:[%s6018_s4 + $0x38] sm:$0xff] }
0x1f23   :  { %v3005_v4 = vmul.f32 %v4339_v52, %v3004_v58 }
0x1f24   :  { %3954 = vmatmul.msk.f32.vlgmr.msrb.gmra.mxu2 %vm60_vm0, %v5743_v0 }
0x1f25   :  { %v3009_v3 = vsel %vm3008_vm5, %v4339_v52, %v3005_v4  ;;  %v3096_v9 = vpop.f32.mrf.mxu3  ;;  %v4398_v52 = vld [vmem:[%s6018_s4 + $0x20] sm:$0xff] }
0x1f26   :  { %v3011_v55 = vmul.f32 %v3009_v3, %v2977_v43  ;;  %v5747_v42 = vadd.f32 %v3096_v9, %v3074_v44 }
0x1f28   :  { %3121 = vrot.lane.b32.xlu0 %v5747_v42, %s4405_s0  ;;  %3119 = vrot.lane.b32.xlu2 %v5739_v61, %s4405_s0  ;;  %v3014_v60 = vmul.f32 %v3012_v45, %v3011_v55  ;;  %v4399_v45 = vld [vmem:[%s6018_s4 + $0x30] sm:$0xff]  ;;  %v4137_v9 = vpack.i.bf16 %v5739_v61, %v5747_v42 }
0x1f29   :  { %3125 = vrot.lane.b32.xlu1 %v5747_v42, %s4406_s12 }
0x1f2a   :  { %v5755_v6 = vadd.f32 %v3015_v59, %v3014_v60 }
0x1f2c   :  { %3955 = vmatmul.msk.f32.gmra.mxu2 %vm60_vm0, %v5755_v6 }
0x1f30   :  { %3117 = vrot.lane.b32.xlu0 %v5747_v42, %s4404_s11  ;;  %3115 = vrot.lane.b32.xlu2 %v5739_v61, %s4404_s11 }
0x1f7a   :  { %v5763_v10 = vpop.permute.xlu2 %3123 }
0x1f82   :  { %v5765_v13 = vpop.permute.xlu2 %3119 }
0x1f8a   :  { %v5784_v23 = vpop.permute.xlu2 %3115 }
0x1f9a   :  { %v3122_v2 = vpop.permute.xlu0 %3121 }
0x1f9b   :  { %v4127_v16 = vpack.i.bf16 %v5765_v13, %v3122_v2  ;;  %v5768_v19 = vpop.permute.xlu1 %3125 }
0x1f9c   :  { %3958 = vmatpush.xpose.msk.msrb.mxu0 %vm120_vm1, %v5768_v19  ;;  %v4122_v38 = vpack.i.bf16 %v5763_v10, %v5768_v19 }
0x1fa0   :  { %3959 = vmatpush.xpose.msk.msrb.mxu0 %vm120_vm1, %v5763_v10 }
0x1fa2   :  { %v5780_v57 = vpop.permute.xlu0 %3117 }
0x1fa3   :  { %v4132_v4 = vpack.i.bf16 %v5784_v23, %v5780_v57 }
0x1fa4   :  { %3960 = vmatpush.xpose.msk.msrb.mxu0 %vm120_vm1, %v3122_v2 }
0x1fa7   :  { %v3050_v20 = vpop.f32.mrf.mxu2 }
0x1fa8   :  { %v3051_v49 = vadd.f32 %v3050_v20, %v5723_v5  ;;  %3961 = vmatpush.xpose.msk.msrb.mxu0 %vm120_vm1, %v5765_v13 }
0x1faa   :  { %3105 = vrot.lane.b32.xlu2 %v3051_v49, %s4405_s0  ;;  %3101 = vrot.lane.b32.xlu0 %v3051_v49, %s4404_s11 }
0x1fac   :  { %3962 = vmatpush.xpose.msk.msrb.mxu0 %vm120_vm1, %v5780_v57 }
0x1faf   :  { %v3053_v18 = vpop.f32.mrf.mxu2 }
0x1fb0   :  { %v3054_v24 = vadd.f32 %v3053_v18, %v5723_v5  ;;  %3963 = vmatpush.xpose.msk.msrb.mxu0 %vm120_vm1, %v5784_v23  ;;  %v4394_v5 = vld [vmem:[%s6018_s4] sm:$0xff] }
0x1fb2   :  { %3111 = vrot.lane.b32.xlu2 %v3054_v24, %s4406_s12  ;;  %3107 = vrot.lane.b32.xlu0 %v3054_v24, %s4405_s0 }
0x1fb3   :  { %3103 = vrot.lane.b32.xlu1 %v3054_v24, %s4404_s11 }
0x1fb4   :  { %3964 = vmatpush.xpose.msk.msrb.mxu0 %vm120_vm1, %v5747_v42 }
0x1fb8   :  { %3965 = vmatpush.xpose.msk.msrb.mxu0 %vm120_vm1, %v5739_v61 }
0x1fbb   :  { %3109 = vrot.lane.b32.xlu1 %v3051_v49, %s4406_s12  ;;  %3966 = vmatmul.msk.f32.vlgmr.msrb.gmra.mxu0 %vm120_vm1, %v3051_v49 }
0x1fc3   :  { %3967 = vmatmul.msk.f32.gmra.mxu0 %vm120_vm1, %v3054_v24 }
0x2004   :  { %v3106_v28 = vpop.permute.xlu2 %3105 }
0x200c   :  { %v3112_v17 = vpop.permute.xlu2 %3111 }
0x201c   :  { %v3102_v63 = vpop.permute.xlu0 %3101 }
0x201d   :  { %3968 = vmatmul.msk.f32.gmra.mxu0 %vm120_vm1, %v3102_v63 }
0x2024   :  { %v3108_v8 = vpop.permute.xlu0 %3107 }
0x2025   :  { %v3104_v14 = vpop.permute.xlu1 %3103 }
0x2026   :  { %3969 = vmatmul.msk.f32.gmra.mxu0 %vm120_vm1, %v3104_v14 }
0x202d   :  { %v3110_v7 = vpop.permute.xlu1 %3109 }
0x202e   :  { %3970 = vmatmul.msk.f32.gmra.mxu0 %vm120_vm1, %v3106_v28 }
0x2036   :  { %3971 = vmatmul.msk.f32.gmra.mxu0 %vm120_vm1, %v3108_v8 }
0x2038   :  { %v3176_v22 = vpop.f32.mrf.mxu0 }
0x2039   :  { %v3177_v12 = vadd.f32 %v4394_v5, %v3176_v22 }
0x203b   :  { %v3200_v25 = vsel %vm194_vm2, %v3177_v12, -inf }
0x203c   :  { %3201 = vmax.xlane.f32.xlu0 %v3200_v25 }
0x203e   :  { %3972 = vmatmul.msk.f32.gmra.mxu0 %vm120_vm1, %v3110_v7 }
0x2040   :  { %v3179_v32 = vpop.f32.mrf.mxu0 }
0x2041   :  { %v3180_v29 = vadd.f32 %v4395_v37, %v3179_v32 }
0x2043   :  { %v3203_v31 = vsel %vm194_vm2, %v3180_v29, -inf }
0x2044   :  { %3204 = vmax.xlane.f32.xlu1 %v3203_v31 }
0x2046   :  { %3973 = vmatmul.msk.f32.gmra.mxu0 %vm120_vm1, %v3112_v17 }
0x209a   :  { %v3182_v35 = vpop.f32.mrf.mxu0 }
0x209b   :  { %v3183_v43 = vadd.f32 %v4396_v26, %v3182_v35 }
0x209d   :  { %v3206_v30 = vsel %vm194_vm2, %v3183_v43, -inf }
0x209e   :  { %3207 = vmax.xlane.f32.xlu2 %v3206_v30 }
0x20a3   :  { %v3185_v15 = vpop.f32.mrf.mxu0 }
0x20a4   :  { %v3186_v39 = vadd.f32 %v4397_v46, %v3185_v15 }
0x20a6   :  { %v3209_v47 = vsel %vm194_vm2, %v3186_v39, -inf }
0x20a7   :  { %3210 = vmax.xlane.f32.xlu0 %v3209_v47 }
0x20ab   :  { %v3188_v48 = vpop.f32.mrf.mxu0 }
0x20ac   :  { %v3189_v54 = vadd.f32 %v4398_v52, %v3188_v48 }
0x20ae   :  { %v3212_v21 = vsel %vm194_vm2, %v3189_v54, -inf }
0x20af   :  { %v3202_v36 = vpop.xlane.xlu0 %3201 }
0x20b0   :  { %v3224_v40 = vsub.f32 %v3177_v12, %v3202_v36 }
0x20b2   :  { %v3232_v41 = vmul.f32 1.442695, %v3224_v40 }
0x20b3   :  { %v3191_v27 = vpop.f32.mrf.mxu0 }
0x20b4   :  { %4340 = vpow2.f32 %v3232_v41  ;;  %v3192_v59 = vadd.f32 %v4400_v53, %v3191_v27 }
0x20b6   :  { %4128 = vrot.lane.b32.xlu2 %v4127_v16, %s4407_s13  ;;  %v3215_v51 = vsel %vm194_vm2, %v3192_v59, -inf }
0x20b7   :  { %v3205_v55 = vpop.xlane.xlu1 %3204 }
0x20b8   :  { %v3225_v60 = vsub.f32 %v3180_v29, %v3205_v55 }
0x20ba   :  { %v5824_v50 = vpop.eup %4340  ;;  %v3234_v10 = vmul.f32 1.442695, %v3225_v60  ;;  %v3022_v60 = vld [vmem:[%s6013_s5 + $0x2a0] sm:$0xff] }
0x20bb   :  { %4123 = vrot.lane.b32.xlu0 %v4122_v38, %s4407_s13  ;;  %v3248_v34 = vsel %vm194_vm2, %v5824_v50, 0.0  ;;  %v3194_v44 = vpop.f32.mrf.mxu0  ;;  %3398 = vmatpush.msra.mxu3 %v3022_v60 }
0x20bc   :  { %3249 = vadd.xlane.f32.xlu1 %v3248_v34  ;;  %v3195_v33 = vadd.f32 %v4399_v45, %v3194_v44  ;;  %4342 = vpow2.f32 %v3234_v10 }
0x20be   :  { %v3218_v1 = vsel %vm194_vm2, %v3195_v33, -inf }
0x20c2   :  { %v5854_v20 = vpop.eup %4342 }
0x20c3   :  { %v3197_v56 = vpop.f32.mrf.mxu0  ;;  %v3251_v42 = vsel %vm194_vm2, %v5854_v20, 0.0 }
0x20c4   :  { %3213 = vmax.xlane.f32.xlu1 %v3212_v21  ;;  %v5844_v58 = vadd.f32 %v4401_v62, %v3197_v56 }
0x20c6   :  { %v3221_v3 = vsel %vm194_vm2, %v5844_v58, -inf }
0x20cc   :  { %3219 = vmax.xlane.f32.xlu1 %v3218_v1 }
0x20df   :  { %3216 = vmax.xlane.f32.xlu2 %v3215_v51 }
0x20e5   :  { %3222 = vmax.xlane.f32.xlu0 %v3221_v3  ;;  %4133 = vrot.lane.b32.xlu1 %v4132_v4, %s4407_s13 }
0x20f7   :  { %4138 = vrot.lane.b32.xlu2 %v4137_v9, %s4407_s13 }
0x2111   :  { %v3208_v13 = vpop.xlane.xlu2 %3207 }
0x2112   :  { %v3226_v2 = vsub.f32 %v3183_v43, %v3208_v13 }
0x2114   :  { %v3236_v16 = vmul.f32 1.442695, %v3226_v2 }
0x2116   :  { %4344 = vpow2.f32 %v3236_v16 }
0x2119   :  { %v4129_v28 = vpop.permute.xlu2 %4128 }
0x211a   :  { %v3211_v19 = vpop.xlane.xlu0 %3210  ;;  %v4130_v5 = vunpack.i.l.bf16 %v4129_v28  ;;  %v4131_v12 = vunpack.i.h.bf16 %v4129_v28 }
0x211b   :  { %v3227_v49 = vsub.f32 %v3186_v39, %v3211_v19 }
0x211c   :  { %v5856_v57 = vpop.eup %4344 }
0x211d   :  { %v3238_v23 = vmul.f32 1.442695, %v3227_v49  ;;  %v3254_v61 = vsel %vm194_vm2, %v5856_v57, 0.0 }
0x211e   :  { %3255 = vadd.xlane.f32.xlu1 %v3254_v61 }
0x211f   :  { %4346 = vpow2.f32 %v3238_v23 }
0x2120   :  { %3252 = vadd.xlane.f32.xlu2 %v3251_v42  ;;  %v3023_v42 = vld [vmem:[%s6013_s5 + $0x2a8] sm:$0xff] }
0x2121   :  { %3430 = vmatpush.msrb.mxu1 %v3023_v42 }
0x2125   :  { %v5862_v18 = vpop.eup %4346 }
0x2126   :  { %v3257_v24 = vsel %vm194_vm2, %v5862_v18, 0.0 }
0x2127   :  { %3258 = vadd.xlane.f32.xlu0 %v3257_v24  ;;  %v3024_v24 = vld [vmem:[%s6013_s5 + $0x2b0] sm:$0xff] }
0x2128   :  { %3461 = vmatpush.msrb.mxu3 %v3024_v24 }
0x212d   :  { %v4124_v63 = vpop.permute.xlu0 %4123 }
0x212e   :  { %v4125_v14 = vunpack.i.l.bf16 %v4124_v63  ;;  %v4126_v22 = vunpack.i.h.bf16 %v4124_v63 }
0x212f   :  { %v3250_v8 = vpop.xlane.xlu1 %3249 }
0x2130   :  { %3344 = vmatpush.msra.mxu2 %v4125_v14 }
0x2132   :  { %3345 = vmatpush.msra.mxu2 %v4126_v22 }
0x2134   :  { %3346 = vmatpush.msra.mxu2 %v4130_v5 }
0x2136   :  { %3347 = vmatpush.msra.mxu2 %v4131_v12 }
0x2137   :  { %v3214_v25 = vpop.xlane.xlu1 %3213 }
0x2138   :  { %v3228_v7 = vsub.f32 %v3189_v54, %v3214_v25 }
0x213a   :  { %v3240_v32 = vmul.f32 1.442695, %v3228_v7 }
0x213c   :  { %4348 = vpow2.f32 %v3240_v32 }
0x213f   :  { %v3220_v37 = vpop.xlane.xlu1 %3219 }
0x2140   :  { %v3230_v29 = vsub.f32 %v3195_v33, %v3220_v37  ;;  %v5910_v37 = vld [vmem:[%s6013_s5 + $0x320] sm:$0xff] }
0x2141   :  { %v3548_v24 = vperm.slane %v5910_v37, 6 }
0x2142   :  { %v4349_v31 = vpop.eup %4348  ;;  %v3244_v17 = vmul.f32 1.442695, %v3230_v29  ;;  %v3406_v29 = vperm.slane %v5910_v37, 5 }
0x2143   :  { %v3260_v35 = vsel %vm194_vm2, %v4349_v31, 0.0 }
0x2144   :  { %4350 = vpow2.f32 %v3244_v17  ;;  %3261 = vadd.xlane.f32.xlu0 %v3260_v35 }
0x2145   :  { %4352 = vrcp.f32 %v3250_v8  ;;  %v3025_v8 = vld [vmem:[%s6013_s5 + $0x2b8] sm:$0xff] }
0x2146   :  { %3492 = vmatpush.msra.mxu1 %v3025_v8 }
0x214a   :  { %v5867_v26 = vpop.eup %4350 }
0x214b   :  { %v3266_v43 = vsel %vm194_vm2, %v5867_v26, 0.0  ;;  %v4353_v34 = vpop.eup %4352 }
0x214c   :  { %3267 = vadd.xlane.f32.xlu2 %v3266_v43  ;;  %v3280_v44 = vmul.f32 %v4353_v34, %v5824_v50 }
0x2152   :  { %v3217_v30 = vpop.xlane.xlu2 %3216 }
0x2153   :  { %v3229_v15 = vsub.f32 %v3192_v59, %v3217_v30 }
0x2155   :  { %v3242_v46 = vmul.f32 1.442695, %v3229_v15 }
0x2157   :  { %4354 = vpow2.f32 %v3242_v46  ;;  %v4134_v39 = vpop.permute.xlu1 %4133 }
0x2158   :  { %v4135_v47 = vunpack.i.l.bf16 %v4134_v39  ;;  %v3223_v36 = vpop.xlane.xlu0 %3222  ;;  %v4136_v40 = vunpack.i.h.bf16 %v4134_v39 }
0x2159   :  { %v3231_v48 = vsub.f32 %v5844_v58, %v3223_v36 }
0x215a   :  { %3348 = vmatpush.msra.mxu2 %v4135_v47  ;;  %v4139_v41 = vpop.permute.xlu2 %4138 }
0x215b   :  { %v3246_v38 = vmul.f32 1.442695, %v3231_v48  ;;  %v4140_v27 = vunpack.i.l.bf16 %v4139_v41  ;;  %v4141_v54 = vunpack.i.h.bf16 %v4139_v41 }
0x215c   :  { %3349 = vmatpush.msra.mxu2 %v4136_v40 }
0x215d   :  { %v4355_v52 = vpop.eup %4354  ;;  %4356 = vpow2.f32 %v3246_v38 }
0x215e   :  { %3350 = vmatpush.msra.mxu2 %v4140_v27  ;;  %v3263_v21 = vsel %vm194_vm2, %v4355_v52, 0.0 }
0x215f   :  { %3264 = vadd.xlane.f32.xlu0 %v3263_v21 }
0x2160   :  { %3351 = vmatpush.msra.mxu2 %v4141_v54 }
0x2161   :  { %3974 = vmatmul.msk.f32.vlgmr.msra.gmra.mxu2 %vm194_vm2, %v3280_v44 }
0x2163   :  { %v4357_v45 = vpop.eup %4356 }
0x2164   :  { %v3269_v33 = vsel %vm194_vm2, %v4357_v45, 0.0 }
0x2165   :  { %3270 = vadd.xlane.f32.xlu1 %v3269_v33 }
0x2191   :  { %v3256_v53 = vpop.xlane.xlu1 %3255 }
0x2193   :  { %v3253_v1 = vpop.xlane.xlu2 %3252 }
0x2194   :  { %4358 = vrcp.f32 %v3253_v1 }
0x2195   :  { %4360 = vrcp.f32 %v3256_v53 }
0x219a   :  { %v4359_v59 = vpop.eup %4358  ;;  %v3259_v51 = vpop.xlane.xlu0 %3258 }
0x219b   :  { %v3281_v56 = vmul.f32 %v4359_v59, %v5854_v20  ;;  %v4361_v62 = vpop.eup %4360  ;;  %4362 = vrcp.f32 %v3259_v51  ;;  %v3555_v51 = vld [vmem:[%s6013_s5 + $0x2c8] sm:$0xff] }
0x219c   :  { %v3282_v50 = vmul.f32 %v4361_v62, %v5856_v57  ;;  %v3554_v62 = vld [vmem:[%s6013_s5 + $0x2c0] sm:$0xff] }
0x219d   :  { %3975 = vmatmul.msk.f32.gmra.mxu2 %vm194_vm2, %v3281_v56  ;;  %v3556_v56 = vld [vmem:[%s6013_s5 + $0x2d0] sm:$0xff] }
0x21a1   :  { %v4363_v58 = vpop.eup %4362 }
0x21a2   :  { %v3283_v4 = vmul.f32 %v4363_v58, %v5862_v18 }
0x21a5   :  { %3976 = vmatmul.msk.f32.gmra.mxu2 %vm194_vm2, %v3282_v50 }
0x21ad   :  { %3977 = vmatmul.msk.f32.gmra.mxu2 %vm194_vm2, %v3283_v4 }
0x21b7   :  { %v3262_v3 = vpop.xlane.xlu0 %3261 }
0x21b8   :  { %4364 = vrcp.f32 %v3262_v3  ;;  %v3597_v3 = vld [vmem:[%s6013_s5 + $0x318] sm:$0xff] }
0x21be   :  { %v4365_v9 = vpop.eup %4364 }
0x21bf   :  { %v3284_v55 = vmul.f32 %v4365_v9, %v4349_v31  ;;  %v3268_v13 = vpop.xlane.xlu2 %3267  ;;  %v3596_v9 = vld [vmem:[%s6013_s5 + $0x310] sm:$0xff] }
0x21c1   :  { %3978 = vmatmul.msk.f32.gmra.mxu2 %vm194_vm2, %v3284_v55  ;;  %v3595_v55 = vld [vmem:[%s6013_s5 + $0x308] sm:$0xff] }
0x21d2   :  { %v3265_v10 = vpop.xlane.xlu0 %3264 }
0x21d3   :  { %4366 = vrcp.f32 %v3265_v10 }
0x21d4   :  { %4368 = vrcp.f32 %v3268_v13  ;;  %v3594_v13 = vld [vmem:[%s6013_s5 + $0x300] sm:$0xff] }
0x21d8   :  { %v3271_v19 = vpop.xlane.xlu1 %3270 }
0x21d9   :  { %v4367_v2 = vpop.eup %4366  ;;  %4370 = vrcp.f32 %v3271_v19  ;;  %v3593_v19 = vld [vmem:[%s6013_s5 + $0x2f8] sm:$0xff] }
0x21da   :  { %v3285_v16 = vmul.f32 %v4367_v2, %v4355_v52  ;;  %v4369_v20 = vpop.eup %4368 }
0x21db   :  { %v3286_v49 = vmul.f32 %v4369_v20, %v5867_v26 }
0x21dc   :  { %3979 = vmatmul.msk.f32.gmra.mxu2 %vm194_vm2, %v3285_v16 }
0x21df   :  { %v4371_v23 = vpop.eup %4370 }
0x21e0   :  { %v3287_v61 = vmul.f32 %v4371_v23, %v4357_v45 }
0x21e4   :  { %v3353_v57 = vpop.f32.mrf.mxu2  ;;  %3980 = vmatmul.msk.f32.gmra.mxu2 %vm194_vm2, %v3286_v49 }
0x21e5   :  { %3982 = vmatmul.msk.f32.vlgmr.msra.gmra.mxu3 %vm120_vm1, %v3353_v57 }
0x21ec   :  { %3981 = vmatmul.msk.f32.gmra.mxu2 %vm194_vm2, %v3287_v61 }
0x2220   :  { %v3356_v18 = vpop.f32.mrf.mxu2 }
0x2221   :  { %3983 = vmatmul.msk.f32.gmra.mxu3 %vm120_vm1, %v3356_v18 }
0x2228   :  { %v3359_v63 = vpop.f32.mrf.mxu2 }
0x2229   :  { %3984 = vmatmul.msk.f32.vlgmr.msrb.gmra.mxu1 %vm120_vm1, %v3359_v63 }
0x222a   :  { %3613 = vmatpush.msrb.mxu1 %v3597_v3 }
0x222c   :  { %3614 = vmatpush.msrb.mxu1 %v3596_v9 }
0x222e   :  { %3615 = vmatpush.msrb.mxu1 %v3595_v55 }
0x2230   :  { %v3362_v14 = vpop.f32.mrf.mxu2  ;;  %3616 = vmatpush.msrb.mxu1 %v3594_v13 }
0x2231   :  { %3985 = vmatmul.msk.f32.gmra.mxu1 %vm120_vm1, %v3362_v14 }
0x2232   :  { %3617 = vmatpush.msrb.mxu1 %v3593_v19 }
0x2244   :  { %v3365_v28 = vpop.f32.mrf.mxu2 }
0x2245   :  { %3986 = vmatmul.msk.f32.vlgmr.msrb.gmra.mxu3 %vm120_vm1, %v3365_v28  ;;  %v3551_v28 = vperm.slane %v5910_v37, 7  ;;  %v3592_v37 = vld [vmem:[%s6013_s5 + $0x2f0] sm:$0xff] }
0x2246   :  { %3618 = vmatpush.msrb.mxu1 %v3592_v37 }
0x225f   :  { %v3368_v22 = vpop.f32.mrf.mxu2 }
0x2260   :  { %3987 = vmatmul.msk.f32.gmra.mxu3 %vm120_vm1, %v3368_v22 }
0x2267   :  { %v3371_v5 = vpop.f32.mrf.mxu2 }
0x2268   :  { %3988 = vmatmul.msk.f32.vlgmr.msra.gmra.mxu1 %vm120_vm1, %v3371_v5  ;;  %v3400_v25 = vpop.f32.mrf.mxu3 }
0x2269   :  { %v3407_v17 = vadd.f32 %v3406_v29, %v3400_v25 }
0x226f   :  { %v3374_v12 = vpop.f32.mrf.mxu2 }
0x2270   :  { %3989 = vmatmul.msk.f32.gmra.mxu1 %vm120_vm1, %v3374_v12 }
0x22a4   :  { %v3403_v32 = vpop.f32.mrf.mxu3 }
0x22a5   :  { %v3408_v46 = vadd.f32 %v3406_v29, %v3403_v32 }
0x22a6   :  { %v3432_v7 = vpop.f32.mrf.mxu1 }
0x22a7   :  { %v3438_v26 = vadd.f32 %v3432_v7, %v3407_v17 }
0x22ae   :  { %v3435_v31 = vpop.f32.mrf.mxu1 }
0x22af   :  { %v3439_v36 = vadd.f32 %v3435_v31, %v3408_v46 }
0x22c8   :  { %v3463_v35 = vpop.f32.mrf.mxu3 }
0x22c9   :  { %v3469_v43 = vadd.f32 %v3463_v35, %v3438_v26  ;;  %v3591_v35 = vld [vmem:[%s6013_s5 + $0x2e8] sm:$0xff]  ;;  %v3590_v26 = vld [vmem:[%s6013_s5 + $0x2e0] sm:$0xff] }
0x22ca   :  { %3619 = vmatpush.msrb.mxu1 %v3591_v35 }
0x22cc   :  { %3620 = vmatpush.msrb.mxu1 %v3590_v26 }
0x22e3   :  { %v3466_v47 = vpop.f32.mrf.mxu3 }
0x22e4   :  { %v3470_v40 = vadd.f32 %v3466_v47, %v3439_v36 }
0x22e5   :  { %v3494_v30 = vpop.f32.mrf.mxu1 }
0x22e6   :  { %v3500_v15 = vadd.f32 %v3494_v30, %v3469_v43  ;;  %v5966_v43 = vld [vmem:[%s6013_s5 + $0x328] sm:$0xff] }
0x22e7   :  { %v3558_v30 = vperm.slane %v5966_v43, 0 }
0x22e8   :  { %v3502_v39 = vadd.f32 %v3500_v15, %v5743_v0 }
0x22ea   :  { %v3504_v48 = vsel %vm60_vm0, %v3502_v39, 0.0 }
0x22eb   :  { %3505 = vadd.xlane.f32.xlu0 %v3504_v48 }
0x22ed   :  { %v3497_v41 = vpop.f32.mrf.mxu1 }
0x22ee   :  { %v3501_v38 = vadd.f32 %v3497_v41, %v3470_v40  ;;  %v3598_v40 = vperm.slane %v5966_v43, 1 }
0x22f0   :  { %v3503_v27 = vadd.f32 %v3501_v38, %v5755_v6  ;;  %v3557_v6 = vld [vmem:[%s6013_s5 + $0x2d8] sm:$0xff] }
0x22f1   :  { %3577 = vmatpush.msra.mxu3 %v3557_v6 }
0x22f2   :  { %v3507_v34 = vsel %vm60_vm0, %v3503_v27, 0.0 }
0x22f3   :  { %3508 = vadd.xlane.f32.xlu2 %v3507_v34  ;;  %3578 = vmatpush.msra.mxu3 %v3556_v56 }
0x22f5   :  { %3579 = vmatpush.msra.mxu3 %v3555_v51 }
0x22f7   :  { %3580 = vmatpush.msra.mxu3 %v3554_v62 }
0x235e   :  { %v3506_v52 = vpop.xlane.xlu0 %3505 }
0x235f   :  { %v3510_v54 = vmul.f32 %v3506_v52, %v4681_v11 }
0x2361   :  { %v3512_v21 = vsub.f32 %v3502_v39, %v3510_v54 }
0x2363   :  { %v3514_v44 = vmul.f32 %v3512_v21, %v3512_v21 }
0x2365   :  { %v3516_v0 = vsel %vm60_vm0, %v3514_v44, 0.0 }
0x2366   :  { %3517 = vadd.xlane.f32.xlu1 %v3516_v0  ;;  %v3509_v45 = vpop.xlane.xlu2 %3508 }
0x2367   :  { %v3511_v33 = vmul.f32 %v3509_v45, %v4681_v11 }
0x2369   :  { %v3513_v1 = vsub.f32 %v3503_v27, %v3511_v33 }
0x236b   :  { %v3515_v53 = vmul.f32 %v3513_v1, %v3513_v1 }
0x236d   :  { %v3519_v59 = vsel %vm60_vm0, %v3515_v53, 0.0 }
0x236e   :  { %3520 = vadd.xlane.f32.xlu0 %v3519_v59 }
0x23d9   :  { %v3518_v50 = vpop.xlane.xlu1 %3517 }
0x23da   :  { %v3522_v58 = vmul.f32 %v3518_v50, %v4681_v11 }
0x23dc   :  { %v3524_v4 = vadd.f32 1e-05, %v3522_v58 }
0x23de   :  { %4372 = vrsqrt.f32 %v3524_v4  ;;  %vm3532_vm6 = vweird.f32 %v3524_v4 }
0x23e1   :  { %v3521_v60 = vpop.xlane.xlu0 %3520 }
0x23e2   :  { %v3523_v10 = vmul.f32 %v3521_v60, %v4681_v11 }
0x23e4   :  { %v4373_v2 = vpop.eup %4372  ;;  %v3525_v16 = vadd.f32 1e-05, %v3523_v10 }
0x23e5   :  { %v3527_v20 = vmul.f32 %v4373_v2, %v3524_v4  ;;  %vm3533_vm1 = vweird.f32 %v4373_v2 }
0x23e6   :  { %4374 = vrsqrt.f32 %v3525_v16  ;;  %vm3534_vm7 = vmor %vm3532_vm6, %vm3533_vm1  ;;  %vm3542_vm9 = vweird.f32 %v3525_v16 }
0x23e7   :  { %v3528_v49 = vmul.f32 %v4373_v2, %v3527_v20 }
0x23e9   :  { %v3529_v57 = vmul.f32 0.5, %v3528_v49 }
0x23eb   :  { %v3530_v23 = vsub.f32 1.5, %v3529_v57  ;;  %v3674_v57 = vperm.slane %v5966_v43, 2 }
0x23ec   :  { %v4375_v61 = vpop.eup %4374 }
0x23ed   :  { %v3531_v42 = vmul.f32 %v4373_v2, %v3530_v23  ;;  %v3537_v18 = vmul.f32 %v4375_v61, %v3525_v16  ;;  %vm3543_vm8 = vweird.f32 %v4375_v61 }
0x23ee   :  { %vm3544_vm10 = vmor %vm3542_vm9, %vm3543_vm8 }
0x23ef   :  { %v3535_v63 = vsel %vm3534_vm7, %v4373_v2, %v3531_v42  ;;  %v3538_v14 = vmul.f32 %v4375_v61, %v3537_v18  ;;  %v3677_v18 = vperm.slane %v5966_v43, 3 }
0x23f0   :  { %v3546_v8 = vmul.f32 %v3535_v63, %v3512_v21 }
0x23f1   :  { %v3539_v22 = vmul.f32 0.5, %v3538_v14 }
0x23f2   :  { %v3549_v5 = vmul.f32 %v3548_v24, %v3546_v8 }
0x23f3   :  { %v3540_v12 = vsub.f32 1.5, %v3539_v22 }
0x23f4   :  { %v3552_v25 = vadd.f32 %v3551_v28, %v3549_v5 }
0x23f5   :  { %v3541_v7 = vmul.f32 %v4375_v61, %v3540_v12 }
0x23f6   :  { %3990 = vmatmul.msk.f32.vlgmr.msra.gmra.mxu3 %vm60_vm0, %v3552_v25 }
0x23f7   :  { %v3545_v32 = vsel %vm3544_vm10, %v4375_v61, %v3541_v7 }
0x23f8   :  { %v3547_v29 = vmul.f32 %v3545_v32, %v3513_v1 }
0x23fa   :  { %v3550_v31 = vmul.f32 %v3548_v24, %v3547_v29 }
0x23fc   :  { %v3553_v17 = vadd.f32 %v3551_v28, %v3550_v31 }
0x23fe   :  { %3991 = vmatmul.msk.f32.gmra.mxu3 %vm60_vm0, %v3553_v17 }
0x2479   :  { %v3582_v15 = vpop.f32.mrf.mxu3 }
0x247a   :  { %v3583_v46 = vadd.f32 %v3582_v15, %v3558_v30 }
0x247c   :  { %v3588_v39 = vmax.f32 %v3583_v46, 0.0 }
0x247e   :  { %3992 = vmatmul.msk.f32.vlgmr.msrb.gmra.mxu1 %vm194_vm2, %v3588_v39  ;;  %v3733_v39 = vld [vmem:[%s6013_s5 + $0x348] sm:$0xff] }
0x247f   :  { %3753 = vmatpush.msrb.mxu3 %v3733_v39 }
0x2481   :  { %v3585_v47 = vpop.f32.mrf.mxu3 }
0x2482   :  { %v3586_v36 = vadd.f32 %v3585_v47, %v3558_v30  ;;  %v3732_v47 = vld [vmem:[%s6013_s5 + $0x340] sm:$0xff] }
0x2483   :  { %3754 = vmatpush.msrb.mxu3 %v3732_v47 }
0x2484   :  { %v3589_v48 = vmax.f32 %v3586_v36, 0.0  ;;  %v3731_v36 = vld [vmem:[%s6013_s5 + $0x338] sm:$0xff] }
0x2485   :  { %3755 = vmatpush.msrb.mxu3 %v3731_v36 }
0x2486   :  { %3993 = vmatmul.msk.f32.gmra.mxu1 %vm194_vm2, %v3589_v48  ;;  %v3730_v48 = vld [vmem:[%s6013_s5 + $0x330] sm:$0xff] }
0x2487   :  { %3756 = vmatpush.msrb.mxu3 %v3730_v48 }
0x24fb   :  { %v3622_v41 = vpop.f32.mrf.mxu1 }
0x24fc   :  { %v3623_v38 = vadd.f32 %v3622_v41, %v3598_v40 }
0x24fe   :  { %v3628_v27 = vadd.f32 %v3623_v38, %v3552_v25 }
0x2500   :  { %v3630_v34 = vsel %vm60_vm0, %v3628_v27, 0.0 }
0x2501   :  { %3631 = vadd.xlane.f32.xlu2 %v3630_v34 }
0x2503   :  { %v3625_v52 = vpop.f32.mrf.mxu1 }
0x2504   :  { %v3626_v54 = vadd.f32 %v3625_v52, %v3598_v40 }
0x2506   :  { %v3629_v21 = vadd.f32 %v3626_v54, %v3553_v17 }
0x2508   :  { %v3633_v44 = vsel %vm60_vm0, %v3629_v21, 0.0 }
0x2509   :  { %3634 = vadd.xlane.f32.xlu1 %v3633_v44 }
0x2574   :  { %v3632_v0 = vpop.xlane.xlu2 %3631 }
0x2575   :  { %v3636_v45 = vmul.f32 %v3632_v0, %v4681_v11 }
0x2577   :  { %v3638_v33 = vsub.f32 %v3628_v27, %v3636_v45 }
0x2579   :  { %v3640_v1 = vmul.f32 %v3638_v33, %v3638_v33 }
0x257b   :  { %v3642_v53 = vsel %vm60_vm0, %v3640_v1, 0.0 }
0x257c   :  { %v3635_v59 = vpop.xlane.xlu1 %3634  ;;  %3643 = vadd.xlane.f32.xlu0 %v3642_v53 }
0x257d   :  { %v3637_v6 = vmul.f32 %v3635_v59, %v4681_v11  ;;  %v4403_v59 = vld [vmem:[%s6013_s5 + $0x350] sm:$0xff] }
0x257f   :  { %v3639_v56 = vsub.f32 %v3629_v21, %v3637_v6  ;;  %v3724_v6 = vperm.slane %v4403_v59, 2 }
0x2581   :  { %v3641_v51 = vmul.f32 %v3639_v56, %v3639_v56 }
0x2583   :  { %v3645_v62 = vsel %vm60_vm0, %v3641_v51, 0.0  ;;  %v3727_v51 = vperm.slane %v4403_v59, 3 }
0x2584   :  { %3646 = vadd.xlane.f32.xlu2 %v3645_v62 }
0x25ef   :  { %v3644_v50 = vpop.xlane.xlu0 %3643 }
0x25f0   :  { %v3648_v58 = vmul.f32 %v3644_v50, %v4681_v11 }
0x25f2   :  { %v3650_v4 = vadd.f32 1e-05, %v3648_v58 }
0x25f4   :  { %4376 = vrsqrt.f32 %v3650_v4  ;;  %vm3658_vm11 = vweird.f32 %v3650_v4 }
0x25f7   :  { %v3647_v3 = vpop.xlane.xlu2 %3646 }
0x25f8   :  { %v3649_v9 = vmul.f32 %v3647_v3, %v4681_v11 }
0x25fa   :  { %v4377_v55 = vpop.eup %4376  ;;  %v3651_v60 = vadd.f32 1e-05, %v3649_v9 }
0x25fb   :  { %v3653_v10 = vmul.f32 %v4377_v55, %v3650_v4  ;;  %vm3659_vm2 = vweird.f32 %v4377_v55 }
0x25fc   :  { %4378 = vrsqrt.f32 %v3651_v60  ;;  %vm3660_vm12 = vmor %vm3658_vm11, %vm3659_vm2  ;;  %vm3668_vm14 = vweird.f32 %v3651_v60 }
0x25fd   :  { %v3654_v13 = vmul.f32 %v4377_v55, %v3653_v10 }
0x25ff   :  { %v3655_v2 = vmul.f32 0.5, %v3654_v13 }
0x2601   :  { %v3656_v16 = vsub.f32 1.5, %v3655_v2  ;;  %v3734_v2 = vperm.slane %v4403_v59, 4 }
0x2602   :  { %v4379_v19 = vpop.eup %4378 }
0x2603   :  { %v3657_v20 = vmul.f32 %v4377_v55, %v3656_v16  ;;  %v3663_v49 = vmul.f32 %v4379_v19, %v3651_v60  ;;  %vm3669_vm13 = vweird.f32 %v4379_v19 }
0x2604   :  { %vm3670_vm15 = vmor %vm3668_vm14, %vm3669_vm13 }
0x2605   :  { %v3664_v23 = vmul.f32 %v4379_v19, %v3663_v49  ;;  %v3661_v61 = vsel %vm3660_vm12, %v4377_v55, %v3657_v20 }
0x2606   :  { %v3672_v42 = vmul.f32 %v3661_v61, %v3638_v33 }
0x2607   :  { %v3665_v24 = vmul.f32 0.5, %v3664_v23 }
0x2608   :  { %v3675_v63 = vmul.f32 %v3674_v57, %v3672_v42 }
0x2609   :  { %v3666_v14 = vsub.f32 1.5, %v3665_v24 }
0x260a   :  { %v3678_v28 = vadd.f32 %v3677_v18, %v3675_v63 }
0x260b   :  { %v3667_v8 = vmul.f32 %v4379_v19, %v3666_v14 }
0x260c   :  { %v3680_v22 = vsel %vm60_vm0, %v3678_v28, 0.0 }
0x260d   :  { %3681 = vadd.xlane.f32.xlu1 %v3680_v22  ;;  %v3671_v5 = vsel %vm3670_vm15, %v4379_v19, %v3667_v8 }
0x260e   :  { %v3673_v12 = vmul.f32 %v3671_v5, %v3639_v56 }
0x2610   :  { %v3676_v25 = vmul.f32 %v3674_v57, %v3673_v12 }
0x2612   :  { %v3679_v7 = vadd.f32 %v3677_v18, %v3676_v25 }
0x2614   :  { %v3683_v32 = vsel %vm60_vm0, %v3679_v7, 0.0 }
0x2615   :  { %3684 = vadd.xlane.f32.xlu0 %v3683_v32 }
0x2680   :  { %v3682_v29 = vpop.xlane.xlu1 %3681 }
0x2681   :  { %v3686_v31 = vmul.f32 %v3682_v29, %v4681_v11 }
0x2683   :  { %v3688_v17 = vsub.f32 %v3678_v28, %v3686_v31 }
0x2685   :  { %v3690_v37 = vmul.f32 %v3688_v17, %v3688_v17 }
0x2687   :  { %v3692_v35 = vsel %vm60_vm0, %v3690_v37, 0.0 }
0x2688   :  { %3693 = vadd.xlane.f32.xlu2 %v3692_v35  ;;  %v3685_v26 = vpop.xlane.xlu0 %3684 }
0x2689   :  { %v3687_v43 = vmul.f32 %v3685_v26, %v4681_v11 }
0x268b   :  { %v3689_v30 = vsub.f32 %v3679_v7, %v3687_v43 }
0x268d   :  { %v3691_v15 = vmul.f32 %v3689_v30, %v3689_v30 }
0x268f   :  { %v3695_v46 = vsel %vm60_vm0, %v3691_v15, 0.0 }
0x2690   :  { %3696 = vadd.xlane.f32.xlu1 %v3695_v46 }
0x26fb   :  { %v3694_v40 = vpop.xlane.xlu2 %3693 }
0x26fc   :  { %v3698_v41 = vmul.f32 %v3694_v40, %v4681_v11 }
0x26fe   :  { %v3700_v38 = vadd.f32 1e-05, %v3698_v41 }
0x2700   :  { %4380 = vrsqrt.f32 %v3700_v38  ;;  %vm3708_vm4 = vweird.f32 %v3700_v38 }
0x2703   :  { %v3697_v27 = vpop.xlane.xlu1 %3696 }
0x2704   :  { %v3699_v34 = vmul.f32 %v3697_v27, %v4681_v11 }
0x2706   :  { %v4381_v52 = vpop.eup %4380  ;;  %v3701_v54 = vadd.f32 1e-05, %v3699_v34 }
0x2707   :  { %v3703_v21 = vmul.f32 %v4381_v52, %v3700_v38  ;;  %vm3709_vm3 = vweird.f32 %v4381_v52 }
0x2708   :  { %4382 = vrsqrt.f32 %v3701_v54  ;;  %vm3710_vm5 = vmor %vm3708_vm4, %vm3709_vm3  ;;  %vm3718_vm6 = vweird.f32 %v3701_v54 }
0x2709   :  { %v3704_v44 = vmul.f32 %v4381_v52, %v3703_v21 }
0x270b   :  { %v3705_v0 = vmul.f32 0.5, %v3704_v44 }
0x270d   :  { %v3706_v45 = vsub.f32 1.5, %v3705_v0 }
0x270e   :  { %v4383_v33 = vpop.eup %4382 }
0x270f   :  { %v3707_v1 = vmul.f32 %v4381_v52, %v3706_v45  ;;  %v3713_v53 = vmul.f32 %v4383_v33, %v3701_v54  ;;  %vm3719_vm1 = vweird.f32 %v4383_v33 }
0x2710   :  { %vm3720_vm7 = vmor %vm3718_vm6, %vm3719_vm1 }
0x2711   :  { %v3711_v56 = vsel %vm3710_vm5, %v4381_v52, %v3707_v1  ;;  %v3714_v11 = vmul.f32 %v4383_v33, %v3713_v53 }
0x2712   :  { %v3722_v62 = vmul.f32 %v3711_v56, %v3688_v17 }
0x2713   :  { %v3715_v50 = vmul.f32 0.5, %v3714_v11 }
0x2714   :  { %v3725_v58 = vmul.f32 %v3724_v6, %v3722_v62 }
0x2715   :  { %v3716_v4 = vsub.f32 1.5, %v3715_v50 }
0x2716   :  { %v3728_v3 = vadd.f32 %v3727_v51, %v3725_v58 }
0x2717   :  { %v3717_v9 = vmul.f32 %v4383_v33, %v3716_v4 }
0x2718   :  { %3994 = vmatmul.msk.f32.vlgmr.msrb.gmra.mxu3 %vm60_vm0, %v3728_v3 }
0x2719   :  { %v3721_v55 = vsel %vm3720_vm7, %v4383_v33, %v3717_v9 }
0x271a   :  { %v3723_v60 = vmul.f32 %v3721_v55, %v3689_v30 }
0x271c   :  { %v3726_v10 = vmul.f32 %v3724_v6, %v3723_v60 }
0x271e   :  { %v3729_v13 = vadd.f32 %v3727_v51, %v3726_v10 }
0x2720   :  { %3995 = vmatmul.msk.f32.gmra.mxu3 %vm60_vm0, %v3729_v13 }
0x279b   :  { %v3758_v16 = vpop.f32.mrf.mxu3 }
0x279c   :  { %v3759_v19 = vadd.f32 %v3758_v16, %v3734_v2 }
0x279e   :  { %3764 = vst [vmem:[%s6019_s6] sm:$0xff] %v3759_v19 }
0x27a3   :  { %v3761_v20 = vpop.f32.mrf.mxu3 }
0x27a4   :  { %v3762_v49 = vadd.f32 %v3761_v20, %v3734_v2 }
0x27a6   :  { %3765 = vst [vmem:[%s6019_s6 + $0x8] sm:$0xff] %v3762_v49 }

</bundles_post_ra>
